<compile_context>
chip_gen: v6e
topology: v6e:2x2x1
jax: 0.10.0
libtpu: 0.0.40
codegen_flags: <defaults>
</compile_context>

<pallas_src>
import functools

import jax
import jax.numpy as jnp
from jax.experimental import pallas as pl
from jax.experimental.pallas import tpu as pltpu

ADAPTIVE_RATE = 0.01
EPS = 1e-5


def _round_up(x, m):
    return ((x + m - 1) // m) * m


def _neural_adaptive_kernel(
    # inputs (all padded to lane/sublane-aligned shapes in the wrapper)
    x_ref, ctx_ref,
    we_ref, be_ref,
    w1_ref, b1_ref, g1_ref, bt1_ref,
    w2_ref, b2_ref, g2_ref, bt2_ref,
    wih0_ref, whh0_ref, b0_ref,
    wih1_ref, whh1_ref, b1s_ref,
    wcgs_ref, wcgc_ref, bcg_ref, gcg_ref, btcg_ref,
    wi1_ref, bi1_ref, wi2_ref, bi2_ref, gig_ref, btig_ref,
    simp_ref, wf_ref, bf_ref,
    # outputs
    out_ref, imp_ref,
    # scratch
    pre_ref,
    *, b_valid, h_valid,
):
    S, Bp, INp = x_ref.shape
    Hp = we_ref.shape[1]
    f32 = jnp.float32

    # Masks over padded batch rows / hidden lanes (valid extents are static).
    bmask3 = (jax.lax.broadcasted_iota(jnp.int32, (1, Bp, Hp), 1) < b_valid).astype(f32)
    lmask3 = (jax.lax.broadcasted_iota(jnp.int32, (1, Bp, Hp), 2) < h_valid).astype(f32)
    mask3 = bmask3 * lmask3                      # (1, Bp, Hp)
    lmask2 = (jax.lax.broadcasted_iota(jnp.int32, (1, Hp), 1) < h_valid).astype(f32)
    bmask2 = (jax.lax.broadcasted_iota(jnp.int32, (Bp, 1), 0) < b_valid).astype(f32)

    inv_bh = 1.0 / (b_valid * h_valid)
    inv_h = 1.0 / h_valid
    inv_b = 1.0 / b_valid

    def batchnorm(z, gamma, beta):
        # z: (S, Bp, Hp).  BatchNorm1d channel dim == seq position; training-mode
        # batch statistics over the valid (batch, hidden) slab of each channel.
        m = jnp.sum(jnp.sum(z * mask3, axis=2, keepdims=True), axis=1, keepdims=True) * inv_bh
        d = (z - m) * mask3
        v = jnp.sum(jnp.sum(d * d, axis=2, keepdims=True), axis=1, keepdims=True) * inv_bh
        return (z - m) * jax.lax.rsqrt(v + EPS) * gamma + beta

    def layernorm(a, gamma, beta):
        mu = jnp.sum(a * lmask2, axis=-1, keepdims=True) * inv_h
        d = (a - mu) * lmask2
        var = jnp.sum(d * d, axis=-1, keepdims=True) * inv_h
        return (a - mu) * jax.lax.rsqrt(var + EPS) * gamma + beta

    # ---- Phase 1: all non-recurrent work as sequence-wide matmuls ----------
    x2 = x_ref[...].reshape(S * Bp, INp)
    y = jnp.dot(x2, we_ref[...], preferred_element_type=f32) + be_ref[...]
    z = jnp.dot(y, w1_ref[...], preferred_element_type=f32) + b1_ref[...]
    z = jnp.maximum(batchnorm(z.reshape(S, Bp, Hp), g1_ref[...], bt1_ref[...]), 0.0)
    z = jnp.dot(z.reshape(S * Bp, Hp), w2_ref[...], preferred_element_type=f32) + b2_ref[...]
    z = jnp.maximum(batchnorm(z.reshape(S, Bp, Hp), g2_ref[...], bt2_ref[...]), 0.0)
    # x-path pre-gates of LSTM cell 0 (bih0+bhh0 already folded in the wrapper).
    pre = jnp.dot(z.reshape(S * Bp, Hp), wih0_ref[...], preferred_element_type=f32) + b0_ref[...]
    pre_ref[...] = pre.reshape(S, Bp, 4 * Hp)

    # ---- Phase 2: recurrence — only h-dependent matmuls left in the loop ---
    whh0 = whh0_ref[...]
    wih1 = wih1_ref[...]
    whh1 = whh1_ref[...]
    b1s = b1s_ref[...]

    def gates_to_hc(gates, c):
        # PyTorch LSTMCell gate order: input, forget, cell, output.
        # Gate blocks are placed at 128-aligned (Hp) offsets by the wrapper.
        i = jax.nn.sigmoid(gates[:, 0 * Hp:1 * Hp])
        f = jax.nn.sigmoid(gates[:, 1 * Hp:2 * Hp])
        g = jnp.tanh(gates[:, 2 * Hp:3 * Hp])
        o = jax.nn.sigmoid(gates[:, 3 * Hp:4 * Hp])
        c_new = f * c + i * g
        return o * jnp.tanh(c_new), c_new

    def step(s, carry):
        h0, c0, h1, c1 = carry
        gates0 = pre_ref[s] + jnp.dot(h0, whh0, preferred_element_type=f32)
        h0, c0 = gates_to_hc(gates0, c0)
        gates1 = (jnp.dot(h0, wih1, preferred_element_type=f32)
                  + jnp.dot(h1, whh1, preferred_element_type=f32) + b1s)
        h1, c1 = gates_to_hc(gates1, c1)
        return h0, c0, h1, c1

    zeros = jnp.zeros((Bp, Hp), f32)
    _, _, h1, _ = jax.lax.fori_loop(0, S, step, (zeros, zeros, zeros, zeros))

    # ---- Phase 3: compression gate, importance generator, outputs ----------
    processed = h1                                                      # (Bp, Hp)
    cg = (jnp.dot(processed, wcgs_ref[...], preferred_element_type=f32)
          + jnp.dot(ctx_ref[...], wcgc_ref[...], preferred_element_type=f32)
          + bcg_ref[...])
    comp_sig = jax.nn.sigmoid(layernorm(cg, gcg_ref[...], btcg_ref[...]))
    compressed = processed * comp_sig

    t = jnp.maximum(
        jnp.dot(compressed, wi1_ref[...], preferred_element_type=f32) + bi1_ref[...], 0.0)
    t = jnp.dot(t, wi2_ref[...], preferred_element_type=f32) + bi2_ref[...]
    imp_sig = jax.nn.sigmoid(layernorm(t, gig_ref[...], btig_ref[...]))

    mean_abs = jnp.sum(jnp.abs(imp_sig) * bmask2, axis=0, keepdims=True) * inv_b
    imp_ref[...] = simp_ref[...] + ADAPTIVE_RATE * (mean_abs - simp_ref[...])
    # TODO(synk): the memory_allocation buffer update is a module side-effect
    # that is never returned by forward(); it is intentionally omitted here.

    out_ref[...] = jnp.dot(compressed, wf_ref[...], preferred_element_type=f32) + bf_ref[...]


def neural_adaptive_forward(x, context, params):
    """x: (batch, seq, input_size), context: (batch, hidden). Returns (output, importance)."""
    B, S, IN = x.shape
    H = params["we"].shape[1]
    OUT = params["wf"].shape[1]
    assert S == H, "reference module requires seq_len == hidden_size (BatchNorm1d constraint)"

    f32 = jnp.float32
    Bp = _round_up(B, 8)      # sublane alignment
    Hp = _round_up(H, 128)    # lane alignment
    INp = _round_up(IN, 128)
    OUTp = _round_up(OUT, 128)

    def pad2(a, rows, cols):
        a = a.astype(f32)
        return jnp.pad(a, ((0, rows - a.shape[0]), (0, cols - a.shape[1])))

    def pad_gate(a, rows):
        # (r, 4H) -> (rows, 4*Hp): each i/f/g/o block placed at a 128-aligned offset.
        a = a.astype(f32)
        blocks = [jnp.pad(a[:, k * H:(k + 1) * H],
                          ((0, rows - a.shape[0]), (0, Hp - H))) for k in range(4)]
        return jnp.concatenate(blocks, axis=1)

    def bn_param(v):
        # per-channel (= per seq position) scalar, broadcast over lanes once here
        return jnp.broadcast_to(v.astype(f32).reshape(S, 1, 1), (S, 1, Hp))

    # (batch, seq, feat) -> (seq, batch, feat), then pad (single fused XLA pass).
    x_p = jnp.pad(jnp.transpose(x.astype(f32), (1, 0, 2)),
                  ((0, 0), (0, Bp - B), (0, INp - IN)))
    ctx_p = pad2(context, Bp, Hp)

    args = (
        x_p, ctx_p,
        pad2(params["we"], INp, Hp), pad2(params["be"], 1, Hp),
        pad2(params["w1"], Hp, Hp), pad2(params["b1"], 1, Hp),
        bn_param(params["g1"]), bn_param(params["bt1"]),
        pad2(params["w2"], Hp, Hp), pad2(params["b2"], 1, Hp),
        bn_param(params["g2"]), bn_param(params["bt2"]),
        pad_gate(params["wih0"], Hp), pad_gate(params["whh0"], Hp),
        pad_gate(params["bih0"] + params["bhh0"], 1),          # fused bias, cell 0
        pad_gate(params["wih1"], Hp), pad_gate(params["whh1"], Hp),
        pad_gate(params["bih1"] + params["bhh1"], 1),          # fused bias, cell 1
        pad2(params["wcgs"], Hp, Hp), pad2(params["wcgc"], Hp, Hp), pad2(params["bcg"], 1, Hp),
        pad2(params["gcg"], 1, Hp), pad2(params["btcg"], 1, Hp),
        pad2(params["wi1"], Hp, Hp), pad2(params["bi1"], 1, Hp),
        pad2(params["wi2"], Hp, Hp), pad2(params["bi2"], 1, Hp),
        pad2(params["gig"], 1, Hp), pad2(params["btig"], 1, Hp),
        pad2(params["state_importance"], 1, Hp),
        pad2(params["wf"], Hp, OUTp), pad2(params["bf"], 1, OUTp),
    )

    vmem = pl.BlockSpec(memory_space=pltpu.MemorySpace.VMEM)
    kernel = functools.partial(_neural_adaptive_kernel, b_valid=B, h_valid=H)

    out_p, imp_p = pl.pallas_call(
        kernel,
        out_shape=(jax.ShapeDtypeStruct((Bp, OUTp), f32),
                   jax.ShapeDtypeStruct((1, Hp), f32)),
        in_specs=[vmem] * len(args),
        out_specs=(vmem, vmem),
        scratch_shapes=[pltpu.VMEM((S, Bp, 4 * Hp), f32)],    # precomputed x-path pre-gates
        compiler_params=pltpu.CompilerParams(vmem_limit_bytes=48 * 1024 * 1024),
    )(*args)

    return out_p[:B, :OUT], imp_p[:, :H]


def init_params(key, input_size, hidden_size, output_size):
    """Deterministic synthetic parameters (math orientation: (in, out))."""
    H, IN, OUT = hidden_size, input_size, output_size
    keys = iter(jax.random.split(key, 40))

    def w(shape, scale=0.1):
        return jax.random.normal(next(keys), shape, jnp.float32) * scale

    return {
        # embedding
        "we": w((IN, H)), "be": w((1, H)),
        # core layer 1 (Linear + BatchNorm1d)
        "w1": w((H, H)), "b1": w((1, H)),
        "g1": jnp.ones((H,), jnp.float32), "bt1": jnp.zeros((H,), jnp.float32),
        # core layer 2
        "w2": w((H, H)), "b2": w((1, H)),
        "g2": jnp.ones((H,), jnp.float32), "bt2": jnp.zeros((H,), jnp.float32),
        # LSTM cell 0 / 1 (input_size == hidden_size == H), gate order i,f,g,o
        "wih0": w((H, 4 * H)), "whh0": w((H, 4 * H)),
        "bih0": w((1, 4 * H)), "bhh0": w((1, 4 * H)),
        "wih1": w((H, 4 * H)), "whh1": w((H, 4 * H)),
        "bih1": w((1, 4 * H)), "bhh1": w((1, 4 * H)),
        # compression gate: Linear(2H -> H) split into [processed | context] halves
        "wcgs": w((H, H)), "wcgc": w((H, H)), "bcg": w((1, H)),
        "gcg": jnp.ones((1, H), jnp.float32), "btcg": jnp.zeros((1, H), jnp.float32),
        # importance generator
        "wi1": w((H, H)), "bi1": w((1, H)),
        "wi2": w((H, H)), "bi2": w((1, H)),
        "gig": jnp.ones((1, H), jnp.float32), "btig": jnp.zeros((1, H), jnp.float32),
        # registered buffer
        "state_importance": jnp.ones((1, H), jnp.float32),
        # final layer
        "wf": w((H, OUT)), "bf": w((1, OUT)),
    }


def _reference_forward(x, context, p):
    """Pure-JAX reference (mirrors the PyTorch module in training-mode BN)."""
    f32 = jnp.float32
    hi = jax.lax.Precision.HIGHEST
    H = p["we"].shape[1]
    x = x.astype(f32)

    def bn(z, gamma, beta):   # channel dim = seq (axis 1); stats over (batch, hidden)
        m = jnp.mean(z, axis=(0, 2), keepdims=True)
        v = jnp.mean((z - m) ** 2, axis=(0, 2), keepdims=True)
        return (z - m) / jnp.sqrt(v + EPS) * gamma.reshape(1, -1, 1) + beta.reshape(1, -1, 1)

    def ln(a, gamma, beta):
        m = jnp.mean(a, axis=-1, keepdims=True)
        v = jnp.mean((a - m) ** 2, axis=-1, keepdims=True)
        return (a - m) / jnp.sqrt(v + EPS) * gamma + beta

    y = jnp.dot(x, p["we"], precision=hi) + p["be"]
    z = jnp.maximum(bn(jnp.dot(y, p["w1"], precision=hi) + p["b1"], p["g1"], p["bt1"]), 0.0)
    z = jnp.maximum(bn(jnp.dot(z, p["w2"], precision=hi) + p["b2"], p["g2"], p["bt2"]), 0.0)

    B = x.shape[0]
    h0 = jnp.zeros((B, H), f32); c0 = h0; h1 = h0; c1 = h0

    def cell(xt, h, c, wih, whh, bih, bhh):
        g = jnp.dot(xt, wih, precision=hi) + bih + jnp.dot(h, whh, precision=hi) + bhh
        i = jax.nn.sigmoid(g[:, :H]); f = jax.nn.sigmoid(g[:, H:2 * H])
        gg = jnp.tanh(g[:, 2 * H:3 * H]); o = jax.nn.sigmoid(g[:, 3 * H:])
        c = f * c + i * gg
        return o * jnp.tanh(c), c

    for s in range(x.shape[1]):
        h0, c0 = cell(z[:, s, :], h0, c0, p["wih0"], p["whh0"], p["bih0"], p["bhh0"])
        h1, c1 = cell(h0, h1, c1, p["wih1"], p["whh1"], p["bih1"], p["bhh1"])

    processed = h1
    cg = jax.nn.sigmoid(ln(jnp.dot(processed, p["wcgs"], precision=hi)
                           + jnp.dot(context, p["wcgc"], precision=hi) + p["bcg"],
                           p["gcg"], p["btcg"]))
    compressed = processed * cg
    t = jnp.maximum(jnp.dot(compressed, p["wi1"], precision=hi) + p["bi1"], 0.0)
    t = jnp.dot(t, p["wi2"], precision=hi) + p["bi2"]
    imp = jax.nn.sigmoid(ln(t, p["gig"], p["btig"]))
    importance = p["state_importance"] + ADAPTIVE_RATE * (
        jnp.mean(jnp.abs(imp), axis=0, keepdims=True) - p["state_importance"])
    out = jnp.dot(compressed, p["wf"], precision=hi) + p["bf"]
    return out, importance


if __name__ == "__main__":
    # Small shapes: seq must equal hidden (see NOTE at top of file).
    B, S, IN, H, OUT = 4, 16, 8, 16, 8

    key = jax.random.PRNGKey(0)
    k_params, k_x, k_ctx = jax.random.split(key, 3)

    params = init_params(k_params, IN, H, OUT)
    x = jax.random.normal(k_x, (B, S, IN), jnp.float32)
    context = jax.random.normal(k_ctx, (B, H), jnp.float32)

    fwd = jax.jit(neural_adaptive_forward)
    output, importance = jax.block_until_ready(fwd(x, context, params))

    assert output.shape == (B, OUT)
    assert importance.shape == (1, H)
    assert bool(jnp.all(jnp.isfinite(output))) and bool(jnp.all(jnp.isfinite(importance)))

    # Numerical check against the pure-JAX reference.
    ref_out, ref_imp = _reference_forward(x, context, params)
    assert bool(jnp.allclose(output, ref_out, rtol=2e-2, atol=2e-2)), \
        f"max|diff|={float(jnp.max(jnp.abs(output - ref_out)))}"
    assert bool(jnp.allclose(importance, ref_imp, rtol=2e-2, atol=2e-2)), \
        f"max|diff|={float(jnp.max(jnp.abs(importance - ref_imp)))}"

    print("KERNEL_OK")
</pallas_src>

<mosaic_0001>
module attributes {stable_mosaic.version = 11 : i64} {
  func.func @_neural_adaptive_kernel(%arg0: memref<16x8x128xf32, #tpu.memory_space<vmem>>, %arg1: memref<8x128xf32, #tpu.memory_space<vmem>>, %arg2: memref<128x128xf32, #tpu.memory_space<vmem>>, %arg3: memref<1x128xf32, #tpu.memory_space<vmem>>, %arg4: memref<128x128xf32, #tpu.memory_space<vmem>>, %arg5: memref<1x128xf32, #tpu.memory_space<vmem>>, %arg6: memref<16x1x128xf32, #tpu.memory_space<vmem>>, %arg7: memref<16x1x128xf32, #tpu.memory_space<vmem>>, %arg8: memref<128x128xf32, #tpu.memory_space<vmem>>, %arg9: memref<1x128xf32, #tpu.memory_space<vmem>>, %arg10: memref<16x1x128xf32, #tpu.memory_space<vmem>>, %arg11: memref<16x1x128xf32, #tpu.memory_space<vmem>>, %arg12: memref<128x512xf32, #tpu.memory_space<vmem>>, %arg13: memref<128x512xf32, #tpu.memory_space<vmem>>, %arg14: memref<1x512xf32, #tpu.memory_space<vmem>>, %arg15: memref<128x512xf32, #tpu.memory_space<vmem>>, %arg16: memref<128x512xf32, #tpu.memory_space<vmem>>, %arg17: memref<1x512xf32, #tpu.memory_space<vmem>>, %arg18: memref<128x128xf32, #tpu.memory_space<vmem>>, %arg19: memref<128x128xf32, #tpu.memory_space<vmem>>, %arg20: memref<1x128xf32, #tpu.memory_space<vmem>>, %arg21: memref<1x128xf32, #tpu.memory_space<vmem>>, %arg22: memref<1x128xf32, #tpu.memory_space<vmem>>, %arg23: memref<128x128xf32, #tpu.memory_space<vmem>>, %arg24: memref<1x128xf32, #tpu.memory_space<vmem>>, %arg25: memref<128x128xf32, #tpu.memory_space<vmem>>, %arg26: memref<1x128xf32, #tpu.memory_space<vmem>>, %arg27: memref<1x128xf32, #tpu.memory_space<vmem>>, %arg28: memref<1x128xf32, #tpu.memory_space<vmem>>, %arg29: memref<1x128xf32, #tpu.memory_space<vmem>>, %arg30: memref<128x128xf32, #tpu.memory_space<vmem>>, %arg31: memref<1x128xf32, #tpu.memory_space<vmem>>, %arg32: memref<8x128xf32, #tpu.memory_space<vmem>>, %arg33: memref<1x128xf32, #tpu.memory_space<vmem>>, %arg34: memref<16x8x512xf32, #tpu.memory_space<vmem>>) attributes {dimension_semantics = [], scalar_prefetch = 0 : i64, scratch_operands = 1 : i64, tpu.core_type = #tpu.core_type<tc>} {
    %0 = tpu.iota {dimensions = array<i32: 1>} : vector<1x8x128xi32>
    %c4_i32 = arith.constant 4 : i32
    %1 = vector.broadcast %c4_i32 : i32 to vector<1x8x128xi32>
    %2 = arith.cmpi slt, %0, %1 : vector<1x8x128xi32>
    %3 = arith.extui %2 : vector<1x8x128xi1> to vector<1x8x128xi32>
    %4 = arith.sitofp %3 : vector<1x8x128xi32> to vector<1x8x128xf32>
    %5 = tpu.iota {dimensions = array<i32: 2>} : vector<1x8x128xi32>
    %c16_i32 = arith.constant 16 : i32
    %6 = vector.broadcast %c16_i32 : i32 to vector<1x8x128xi32>
    %7 = arith.cmpi slt, %5, %6 : vector<1x8x128xi32>
    %8 = arith.extui %7 : vector<1x8x128xi1> to vector<1x8x128xi32>
    %9 = arith.sitofp %8 : vector<1x8x128xi32> to vector<1x8x128xf32>
    %10 = arith.mulf %4, %9 : vector<1x8x128xf32>
    %11 = tpu.iota {dimensions = array<i32: 1>} : vector<1x128xi32>
    %c16_i32_0 = arith.constant 16 : i32
    %12 = vector.broadcast %c16_i32_0 : i32 to vector<1x128xi32>
    %13 = arith.cmpi slt, %11, %12 : vector<1x128xi32>
    %14 = arith.extui %13 : vector<1x128xi1> to vector<1x128xi32>
    %15 = arith.sitofp %14 : vector<1x128xi32> to vector<1x128xf32>
    %16 = tpu.iota {dimensions = array<i32: 0>} : vector<8x1xi32>
    %c4_i32_1 = arith.constant 4 : i32
    %17 = vector.broadcast %c4_i32_1 : i32 to vector<8x1xi32>
    %18 = arith.cmpi slt, %16, %17 : vector<8x1xi32>
    %19 = arith.extui %18 : vector<8x1xi1> to vector<8x1xi32>
    %20 = arith.sitofp %19 : vector<8x1xi32> to vector<8x1xf32>
    %c0 = arith.constant 0 : index
    %c0_2 = arith.constant 0 : index
    %c0_3 = arith.constant 0 : index
    %21 = vector.load %arg0[%c0, %c0_2, %c0_3] : memref<16x8x128xf32, #tpu.memory_space<vmem>>, vector<16x8x128xf32>
    %22 = vector.shape_cast %21 : vector<16x8x128xf32> to vector<128x128xf32>
    %c0_4 = arith.constant 0 : index
    %c0_5 = arith.constant 0 : index
    %23 = vector.load %arg2[%c0_4, %c0_5] : memref<128x128xf32, #tpu.memory_space<vmem>>, vector<128x128xf32>
    %cst = arith.constant dense<0.000000e+00> : vector<128x128xf32>
    %24 = tpu.matmul %22, %23, %cst {dimension_numbers = #tpu.dot_dimension_numbers<[1], [0], [0], [1], [0, 0, 1, 1], [], []>} : vector<128x128xf32>, vector<128x128xf32>, vector<128x128xf32> -> vector<128x128xf32>
    %c0_6 = arith.constant 0 : index
    %c0_7 = arith.constant 0 : index
    %25 = vector.load %arg3[%c0_6, %c0_7] : memref<1x128xf32, #tpu.memory_space<vmem>>, vector<1x128xf32>
    %26 = vector.broadcast %25 : vector<1x128xf32> to vector<128x128xf32>
    %27 = arith.addf %24, %26 : vector<128x128xf32>
    %c0_8 = arith.constant 0 : index
    %c0_9 = arith.constant 0 : index
    %28 = vector.load %arg4[%c0_8, %c0_9] : memref<128x128xf32, #tpu.memory_space<vmem>>, vector<128x128xf32>
    %cst_10 = arith.constant dense<0.000000e+00> : vector<128x128xf32>
    %29 = tpu.matmul %27, %28, %cst_10 {dimension_numbers = #tpu.dot_dimension_numbers<[1], [0], [0], [1], [0, 0, 1, 1], [], []>} : vector<128x128xf32>, vector<128x128xf32>, vector<128x128xf32> -> vector<128x128xf32>
    %c0_11 = arith.constant 0 : index
    %c0_12 = arith.constant 0 : index
    %30 = vector.load %arg5[%c0_11, %c0_12] : memref<1x128xf32, #tpu.memory_space<vmem>>, vector<1x128xf32>
    %31 = vector.broadcast %30 : vector<1x128xf32> to vector<128x128xf32>
    %32 = arith.addf %29, %31 : vector<128x128xf32>
    %33 = vector.shape_cast %32 : vector<128x128xf32> to vector<16x8x128xf32>
    %c0_13 = arith.constant 0 : index
    %c0_14 = arith.constant 0 : index
    %c0_15 = arith.constant 0 : index
    %34 = vector.load %arg6[%c0_13, %c0_14, %c0_15] : memref<16x1x128xf32, #tpu.memory_space<vmem>>, vector<16x1x128xf32>
    %c0_16 = arith.constant 0 : index
    %c0_17 = arith.constant 0 : index
    %c0_18 = arith.constant 0 : index
    %35 = vector.load %arg7[%c0_16, %c0_17, %c0_18] : memref<16x1x128xf32, #tpu.memory_space<vmem>>, vector<16x1x128xf32>
    %36 = vector.broadcast %10 : vector<1x8x128xf32> to vector<16x8x128xf32>
    %37 = arith.mulf %33, %36 : vector<16x8x128xf32>
    %cst_19 = arith.constant dense<0.000000e+00> : vector<16x8xf32>
    %38 = vector.multi_reduction <add>, %37, %cst_19 [2] : vector<16x8x128xf32> to vector<16x8xf32>
    %39 = vector.shape_cast %38 : vector<16x8xf32> to vector<16x8x1xf32>
    %cst_20 = arith.constant dense<0.000000e+00> : vector<16x1xf32>
    %40 = vector.multi_reduction <add>, %39, %cst_20 [1] : vector<16x8x1xf32> to vector<16x1xf32>
    %41 = vector.shape_cast %40 : vector<16x1xf32> to vector<16x1x1xf32>
    %cst_21 = arith.constant 1.562500e-02 : f32
    %42 = vector.broadcast %cst_21 : f32 to vector<16x1x1xf32>
    %43 = arith.mulf %41, %42 : vector<16x1x1xf32>
    %44 = vector.broadcast %43 : vector<16x1x1xf32> to vector<16x8x128xf32>
    %45 = arith.subf %33, %44 : vector<16x8x128xf32>
    %46 = vector.broadcast %10 : vector<1x8x128xf32> to vector<16x8x128xf32>
    %47 = arith.mulf %45, %46 : vector<16x8x128xf32>
    %48 = arith.mulf %47, %47 : vector<16x8x128xf32>
    %cst_22 = arith.constant dense<0.000000e+00> : vector<16x8xf32>
    %49 = vector.multi_reduction <add>, %48, %cst_22 [2] : vector<16x8x128xf32> to vector<16x8xf32>
    %50 = vector.shape_cast %49 : vector<16x8xf32> to vector<16x8x1xf32>
    %cst_23 = arith.constant dense<0.000000e+00> : vector<16x1xf32>
    %51 = vector.multi_reduction <add>, %50, %cst_23 [1] : vector<16x8x1xf32> to vector<16x1xf32>
    %52 = vector.shape_cast %51 : vector<16x1xf32> to vector<16x1x1xf32>
    %cst_24 = arith.constant 1.562500e-02 : f32
    %53 = vector.broadcast %cst_24 : f32 to vector<16x1x1xf32>
    %54 = arith.mulf %52, %53 : vector<16x1x1xf32>
    %55 = vector.broadcast %43 : vector<16x1x1xf32> to vector<16x8x128xf32>
    %56 = arith.subf %33, %55 : vector<16x8x128xf32>
    %cst_25 = arith.constant 9.99999974E-6 : f32
    %57 = vector.broadcast %cst_25 : f32 to vector<16x1x1xf32>
    %58 = arith.addf %54, %57 : vector<16x1x1xf32>
    %59 = math.rsqrt %58 : vector<16x1x1xf32>
    %60 = vector.broadcast %59 : vector<16x1x1xf32> to vector<16x8x128xf32>
    %61 = arith.mulf %56, %60 : vector<16x8x128xf32>
    %62 = vector.broadcast %34 : vector<16x1x128xf32> to vector<16x8x128xf32>
    %63 = arith.mulf %61, %62 : vector<16x8x128xf32>
    %64 = vector.broadcast %35 : vector<16x1x128xf32> to vector<16x8x128xf32>
    %65 = arith.addf %63, %64 : vector<16x8x128xf32>
    %cst_26 = arith.constant 0.000000e+00 : f32
    %66 = vector.broadcast %cst_26 : f32 to vector<16x8x128xf32>
    %67 = arith.maximumf %65, %66 : vector<16x8x128xf32>
    %68 = vector.shape_cast %67 : vector<16x8x128xf32> to vector<128x128xf32>
    %c0_27 = arith.constant 0 : index
    %c0_28 = arith.constant 0 : index
    %69 = vector.load %arg8[%c0_27, %c0_28] : memref<128x128xf32, #tpu.memory_space<vmem>>, vector<128x128xf32>
    %cst_29 = arith.constant dense<0.000000e+00> : vector<128x128xf32>
    %70 = tpu.matmul %68, %69, %cst_29 {dimension_numbers = #tpu.dot_dimension_numbers<[1], [0], [0], [1], [0, 0, 1, 1], [], []>} : vector<128x128xf32>, vector<128x128xf32>, vector<128x128xf32> -> vector<128x128xf32>
    %c0_30 = arith.constant 0 : index
    %c0_31 = arith.constant 0 : index
    %71 = vector.load %arg9[%c0_30, %c0_31] : memref<1x128xf32, #tpu.memory_space<vmem>>, vector<1x128xf32>
    %72 = vector.broadcast %71 : vector<1x128xf32> to vector<128x128xf32>
    %73 = arith.addf %70, %72 : vector<128x128xf32>
    %74 = vector.shape_cast %73 : vector<128x128xf32> to vector<16x8x128xf32>
    %c0_32 = arith.constant 0 : index
    %c0_33 = arith.constant 0 : index
    %c0_34 = arith.constant 0 : index
    %75 = vector.load %arg10[%c0_32, %c0_33, %c0_34] : memref<16x1x128xf32, #tpu.memory_space<vmem>>, vector<16x1x128xf32>
    %c0_35 = arith.constant 0 : index
    %c0_36 = arith.constant 0 : index
    %c0_37 = arith.constant 0 : index
    %76 = vector.load %arg11[%c0_35, %c0_36, %c0_37] : memref<16x1x128xf32, #tpu.memory_space<vmem>>, vector<16x1x128xf32>
    %77 = vector.broadcast %10 : vector<1x8x128xf32> to vector<16x8x128xf32>
    %78 = arith.mulf %74, %77 : vector<16x8x128xf32>
    %cst_38 = arith.constant dense<0.000000e+00> : vector<16x8xf32>
    %79 = vector.multi_reduction <add>, %78, %cst_38 [2] : vector<16x8x128xf32> to vector<16x8xf32>
    %80 = vector.shape_cast %79 : vector<16x8xf32> to vector<16x8x1xf32>
    %cst_39 = arith.constant dense<0.000000e+00> : vector<16x1xf32>
    %81 = vector.multi_reduction <add>, %80, %cst_39 [1] : vector<16x8x1xf32> to vector<16x1xf32>
    %82 = vector.shape_cast %81 : vector<16x1xf32> to vector<16x1x1xf32>
    %cst_40 = arith.constant 1.562500e-02 : f32
    %83 = vector.broadcast %cst_40 : f32 to vector<16x1x1xf32>
    %84 = arith.mulf %82, %83 : vector<16x1x1xf32>
    %85 = vector.broadcast %84 : vector<16x1x1xf32> to vector<16x8x128xf32>
    %86 = arith.subf %74, %85 : vector<16x8x128xf32>
    %87 = vector.broadcast %10 : vector<1x8x128xf32> to vector<16x8x128xf32>
    %88 = arith.mulf %86, %87 : vector<16x8x128xf32>
    %89 = arith.mulf %88, %88 : vector<16x8x128xf32>
    %cst_41 = arith.constant dense<0.000000e+00> : vector<16x8xf32>
    %90 = vector.multi_reduction <add>, %89, %cst_41 [2] : vector<16x8x128xf32> to vector<16x8xf32>
    %91 = vector.shape_cast %90 : vector<16x8xf32> to vector<16x8x1xf32>
    %cst_42 = arith.constant dense<0.000000e+00> : vector<16x1xf32>
    %92 = vector.multi_reduction <add>, %91, %cst_42 [1] : vector<16x8x1xf32> to vector<16x1xf32>
    %93 = vector.shape_cast %92 : vector<16x1xf32> to vector<16x1x1xf32>
    %cst_43 = arith.constant 1.562500e-02 : f32
    %94 = vector.broadcast %cst_43 : f32 to vector<16x1x1xf32>
    %95 = arith.mulf %93, %94 : vector<16x1x1xf32>
    %96 = vector.broadcast %84 : vector<16x1x1xf32> to vector<16x8x128xf32>
    %97 = arith.subf %74, %96 : vector<16x8x128xf32>
    %cst_44 = arith.constant 9.99999974E-6 : f32
    %98 = vector.broadcast %cst_44 : f32 to vector<16x1x1xf32>
    %99 = arith.addf %95, %98 : vector<16x1x1xf32>
    %100 = math.rsqrt %99 : vector<16x1x1xf32>
    %101 = vector.broadcast %100 : vector<16x1x1xf32> to vector<16x8x128xf32>
    %102 = arith.mulf %97, %101 : vector<16x8x128xf32>
    %103 = vector.broadcast %75 : vector<16x1x128xf32> to vector<16x8x128xf32>
    %104 = arith.mulf %102, %103 : vector<16x8x128xf32>
    %105 = vector.broadcast %76 : vector<16x1x128xf32> to vector<16x8x128xf32>
    %106 = arith.addf %104, %105 : vector<16x8x128xf32>
    %cst_45 = arith.constant 0.000000e+00 : f32
    %107 = vector.broadcast %cst_45 : f32 to vector<16x8x128xf32>
    %108 = arith.maximumf %106, %107 : vector<16x8x128xf32>
    %109 = vector.shape_cast %108 : vector<16x8x128xf32> to vector<128x128xf32>
    %c0_46 = arith.constant 0 : index
    %c0_47 = arith.constant 0 : index
    %110 = vector.load %arg12[%c0_46, %c0_47] : memref<128x512xf32, #tpu.memory_space<vmem>>, vector<128x512xf32>
    %cst_48 = arith.constant dense<0.000000e+00> : vector<128x512xf32>
    %111 = tpu.matmul %109, %110, %cst_48 {dimension_numbers = #tpu.dot_dimension_numbers<[1], [0], [0], [1], [0, 0, 1, 1], [], []>} : vector<128x128xf32>, vector<128x512xf32>, vector<128x512xf32> -> vector<128x512xf32>
    %c0_49 = arith.constant 0 : index
    %c0_50 = arith.constant 0 : index
    %112 = vector.load %arg14[%c0_49, %c0_50] : memref<1x512xf32, #tpu.memory_space<vmem>>, vector<1x512xf32>
    %113 = vector.broadcast %112 : vector<1x512xf32> to vector<128x512xf32>
    %114 = arith.addf %111, %113 : vector<128x512xf32>
    %115 = vector.shape_cast %114 : vector<128x512xf32> to vector<16x8x512xf32>
    %c0_51 = arith.constant 0 : index
    %c0_52 = arith.constant 0 : index
    %c0_53 = arith.constant 0 : index
    %116 = vector.load %arg34[%c0_51, %c0_52, %c0_53] : memref<16x8x512xf32, #tpu.memory_space<vmem>>, vector<16x8x512xf32>
    tpu.vector_store %arg34[%c0_51, %c0_52, %c0_53], %115 {strides = array<i32>} : memref<16x8x512xf32, #tpu.memory_space<vmem>>, vector<16x8x512xf32>,
    %c0_54 = arith.constant 0 : index
    %c0_55 = arith.constant 0 : index
    %117 = vector.load %arg13[%c0_54, %c0_55] : memref<128x512xf32, #tpu.memory_space<vmem>>, vector<128x512xf32>
    %c0_56 = arith.constant 0 : index
    %c0_57 = arith.constant 0 : index
    %118 = vector.load %arg15[%c0_56, %c0_57] : memref<128x512xf32, #tpu.memory_space<vmem>>, vector<128x512xf32>
    %c0_58 = arith.constant 0 : index
    %c0_59 = arith.constant 0 : index
    %119 = vector.load %arg16[%c0_58, %c0_59] : memref<128x512xf32, #tpu.memory_space<vmem>>, vector<128x512xf32>
    %c0_60 = arith.constant 0 : index
    %c0_61 = arith.constant 0 : index
    %120 = vector.load %arg17[%c0_60, %c0_61] : memref<1x512xf32, #tpu.memory_space<vmem>>, vector<1x512xf32>
    %cst_62 = arith.constant 0.000000e+00 : f32
    %121 = vector.broadcast %cst_62 : f32 to vector<8x128xf32>
    %c0_i32 = arith.constant 0 : i32
    %c16_i32_63 = arith.constant 16 : i32
    %122 = arith.addi %c0_i32, %c16_i32_63 : i32
    %c1_i32 = arith.constant 1 : i32
    %123:4 = scf.for %arg35 = %c0_i32 to %122 step %c1_i32 iter_args(%arg36 = %121, %arg37 = %121, %arg38 = %121, %arg39 = %121) -> (vector<8x128xf32>, vector<8x128xf32>, vector<8x128xf32>, vector<8x128xf32>)  : i32 {
      %232 = arith.index_cast %arg35 : i32 to index
      %c0_122 = arith.constant 0 : index
      %c0_123 = arith.constant 0 : index
      %233 = vector.load %arg34[%232, %c0_122, %c0_123] : memref<16x8x512xf32, #tpu.memory_space<vmem>>, vector<1x8x512xf32>
      %234 = vector.shape_cast %233 : vector<1x8x512xf32> to vector<8x512xf32>
      %cst_124 = arith.constant dense<0.000000e+00> : vector<8x512xf32>
      %235 = tpu.matmul %arg36, %117, %cst_124 {dimension_numbers = #tpu.dot_dimension_numbers<[1], [0], [0], [1], [0, 0, 1, 1], [], []>} : vector<8x128xf32>, vector<128x512xf32>, vector<8x512xf32> -> vector<8x512xf32>
      %236 = arith.addf %234, %235 : vector<8x512xf32>
      %237 = vector.extract_strided_slice %236 {offsets = [0, 0], sizes = [8, 128], strides = [1, 1]} : vector<8x512xf32> to vector<8x128xf32>
      %238 = arith.negf %237 : vector<8x128xf32>
      %239 = math.exp %238 : vector<8x128xf32>
      %cst_125 = arith.constant 1.000000e+00 : f32
      %240 = vector.broadcast %cst_125 : f32 to vector<8x128xf32>
      %241 = arith.addf %240, %239 : vector<8x128xf32>
      %242 = arith.divf %240, %241 : vector<8x128xf32>
      %243 = vector.extract_strided_slice %236 {offsets = [0, 128], sizes = [8, 128], strides = [1, 1]} : vector<8x512xf32> to vector<8x128xf32>
      %244 = arith.negf %243 : vector<8x128xf32>
      %245 = math.exp %244 : vector<8x128xf32>
      %cst_126 = arith.constant 1.000000e+00 : f32
      %246 = vector.broadcast %cst_126 : f32 to vector<8x128xf32>
      %247 = arith.addf %246, %245 : vector<8x128xf32>
      %248 = arith.divf %246, %247 : vector<8x128xf32>
      %249 = vector.extract_strided_slice %236 {offsets = [0, 256], sizes = [8, 128], strides = [1, 1]} : vector<8x512xf32> to vector<8x128xf32>
      %250 = math.tanh %249 : vector<8x128xf32>
      %251 = vector.extract_strided_slice %236 {offsets = [0, 384], sizes = [8, 128], strides = [1, 1]} : vector<8x512xf32> to vector<8x128xf32>
      %252 = arith.negf %251 : vector<8x128xf32>
      %253 = math.exp %252 : vector<8x128xf32>
      %cst_127 = arith.constant 1.000000e+00 : f32
      %254 = vector.broadcast %cst_127 : f32 to vector<8x128xf32>
      %255 = arith.addf %254, %253 : vector<8x128xf32>
      %256 = arith.divf %254, %255 : vector<8x128xf32>
      %257 = arith.mulf %248, %arg37 : vector<8x128xf32>
      %258 = arith.mulf %242, %250 : vector<8x128xf32>
      %259 = arith.addf %257, %258 : vector<8x128xf32>
      %260 = math.tanh %259 : vector<8x128xf32>
      %261 = arith.mulf %256, %260 : vector<8x128xf32>
      %cst_128 = arith.constant dense<0.000000e+00> : vector<8x512xf32>
      %262 = tpu.matmul %261, %118, %cst_128 {dimension_numbers = #tpu.dot_dimension_numbers<[1], [0], [0], [1], [0, 0, 1, 1], [], []>} : vector<8x128xf32>, vector<128x512xf32>, vector<8x512xf32> -> vector<8x512xf32>
      %cst_129 = arith.constant dense<0.000000e+00> : vector<8x512xf32>
      %263 = tpu.matmul %arg38, %119, %cst_129 {dimension_numbers = #tpu.dot_dimension_numbers<[1], [0], [0], [1], [0, 0, 1, 1], [], []>} : vector<8x128xf32>, vector<128x512xf32>, vector<8x512xf32> -> vector<8x512xf32>
      %264 = arith.addf %262, %263 : vector<8x512xf32>
      %265 = vector.broadcast %120 : vector<1x512xf32> to vector<8x512xf32>
      %266 = arith.addf %264, %265 : vector<8x512xf32>
      %267 = vector.extract_strided_slice %266 {offsets = [0, 0], sizes = [8, 128], strides = [1, 1]} : vector<8x512xf32> to vector<8x128xf32>
      %268 = arith.negf %267 : vector<8x128xf32>
      %269 = math.exp %268 : vector<8x128xf32>
      %cst_130 = arith.constant 1.000000e+00 : f32
      %270 = vector.broadcast %cst_130 : f32 to vector<8x128xf32>
      %271 = arith.addf %270, %269 : vector<8x128xf32>
      %272 = arith.divf %270, %271 : vector<8x128xf32>
      %273 = vector.extract_strided_slice %266 {offsets = [0, 128], sizes = [8, 128], strides = [1, 1]} : vector<8x512xf32> to vector<8x128xf32>
      %274 = arith.negf %273 : vector<8x128xf32>
      %275 = math.exp %274 : vector<8x128xf32>
      %cst_131 = arith.constant 1.000000e+00 : f32
      %276 = vector.broadcast %cst_131 : f32 to vector<8x128xf32>
      %277 = arith.addf %276, %275 : vector<8x128xf32>
      %278 = arith.divf %276, %277 : vector<8x128xf32>
      %279 = vector.extract_strided_slice %266 {offsets = [0, 256], sizes = [8, 128], strides = [1, 1]} : vector<8x512xf32> to vector<8x128xf32>
      %280 = math.tanh %279 : vector<8x128xf32>
      %281 = vector.extract_strided_slice %266 {offsets = [0, 384], sizes = [8, 128], strides = [1, 1]} : vector<8x512xf32> to vector<8x128xf32>
      %282 = arith.negf %281 : vector<8x128xf32>
      %283 = math.exp %282 : vector<8x128xf32>
      %cst_132 = arith.constant 1.000000e+00 : f32
      %284 = vector.broadcast %cst_132 : f32 to vector<8x128xf32>
      %285 = arith.addf %284, %283 : vector<8x128xf32>
      %286 = arith.divf %284, %285 : vector<8x128xf32>
      %287 = arith.mulf %278, %arg39 : vector<8x128xf32>
      %288 = arith.mulf %272, %280 : vector<8x128xf32>
      %289 = arith.addf %287, %288 : vector<8x128xf32>
      %290 = math.tanh %289 : vector<8x128xf32>
      %291 = arith.mulf %286, %290 : vector<8x128xf32>
      scf.yield %261, %259, %291, %289 : vector<8x128xf32>, vector<8x128xf32>, vector<8x128xf32>, vector<8x128xf32>
    }
    %c16_i32_64 = arith.constant 16 : i32
    %c0_65 = arith.constant 0 : index
    %c0_66 = arith.constant 0 : index
    %124 = vector.load %arg18[%c0_65, %c0_66] : memref<128x128xf32, #tpu.memory_space<vmem>>, vector<128x128xf32>
    %cst_67 = arith.constant dense<0.000000e+00> : vector<8x128xf32>
    %125 = tpu.matmul %123#2, %124, %cst_67 {dimension_numbers = #tpu.dot_dimension_numbers<[1], [0], [0], [1], [0, 0, 1, 1], [], []>} : vector<8x128xf32>, vector<128x128xf32>, vector<8x128xf32> -> vector<8x128xf32>
    %c0_68 = arith.constant 0 : index
    %c0_69 = arith.constant 0 : index
    %126 = vector.load %arg1[%c0_68, %c0_69] : memref<8x128xf32, #tpu.memory_space<vmem>>, vector<8x128xf32>
    %c0_70 = arith.constant 0 : index
    %c0_71 = arith.constant 0 : index
    %127 = vector.load %arg19[%c0_70, %c0_71] : memref<128x128xf32, #tpu.memory_space<vmem>>, vector<128x128xf32>
    %cst_72 = arith.constant dense<0.000000e+00> : vector<8x128xf32>
    %128 = tpu.matmul %126, %127, %cst_72 {dimension_numbers = #tpu.dot_dimension_numbers<[1], [0], [0], [1], [0, 0, 1, 1], [], []>} : vector<8x128xf32>, vector<128x128xf32>, vector<8x128xf32> -> vector<8x128xf32>
    %129 = arith.addf %125, %128 : vector<8x128xf32>
    %c0_73 = arith.constant 0 : index
    %c0_74 = arith.constant 0 : index
    %130 = vector.load %arg20[%c0_73, %c0_74] : memref<1x128xf32, #tpu.memory_space<vmem>>, vector<1x128xf32>
    %131 = vector.broadcast %130 : vector<1x128xf32> to vector<8x128xf32>
    %132 = arith.addf %129, %131 : vector<8x128xf32>
    %c0_75 = arith.constant 0 : index
    %c0_76 = arith.constant 0 : index
    %133 = vector.load %arg21[%c0_75, %c0_76] : memref<1x128xf32, #tpu.memory_space<vmem>>, vector<1x128xf32>
    %c0_77 = arith.constant 0 : index
    %c0_78 = arith.constant 0 : index
    %134 = vector.load %arg22[%c0_77, %c0_78] : memref<1x128xf32, #tpu.memory_space<vmem>>, vector<1x128xf32>
    %135 = vector.broadcast %15 : vector<1x128xf32> to vector<8x128xf32>
    %136 = arith.mulf %132, %135 : vector<8x128xf32>
    %cst_79 = arith.constant dense<0.000000e+00> : vector<8xf32>
    %137 = vector.multi_reduction <add>, %136, %cst_79 [1] : vector<8x128xf32> to vector<8xf32>
    %138 = vector.shape_cast %137 : vector<8xf32> to vector<8x1xf32>
    %cst_80 = arith.constant 6.250000e-02 : f32
    %139 = vector.broadcast %cst_80 : f32 to vector<8x1xf32>
    %140 = arith.mulf %138, %139 : vector<8x1xf32>
    %141 = vector.broadcast %140 : vector<8x1xf32> to vector<8x128xf32>
    %142 = arith.subf %132, %141 : vector<8x128xf32>
    %143 = vector.broadcast %15 : vector<1x128xf32> to vector<8x128xf32>
    %144 = arith.mulf %142, %143 : vector<8x128xf32>
    %145 = arith.mulf %144, %144 : vector<8x128xf32>
    %cst_81 = arith.constant dense<0.000000e+00> : vector<8xf32>
    %146 = vector.multi_reduction <add>, %145, %cst_81 [1] : vector<8x128xf32> to vector<8xf32>
    %147 = vector.shape_cast %146 : vector<8xf32> to vector<8x1xf32>
    %cst_82 = arith.constant 6.250000e-02 : f32
    %148 = vector.broadcast %cst_82 : f32 to vector<8x1xf32>
    %149 = arith.mulf %147, %148 : vector<8x1xf32>
    %150 = vector.broadcast %140 : vector<8x1xf32> to vector<8x128xf32>
    %151 = arith.subf %132, %150 : vector<8x128xf32>
    %cst_83 = arith.constant 9.99999974E-6 : f32
    %152 = vector.broadcast %cst_83 : f32 to vector<8x1xf32>
    %153 = arith.addf %149, %152 : vector<8x1xf32>
    %154 = math.rsqrt %153 : vector<8x1xf32>
    %155 = vector.broadcast %154 : vector<8x1xf32> to vector<8x128xf32>
    %156 = arith.mulf %151, %155 : vector<8x128xf32>
    %157 = vector.broadcast %133 : vector<1x128xf32> to vector<8x128xf32>
    %158 = arith.mulf %156, %157 : vector<8x128xf32>
    %159 = vector.broadcast %134 : vector<1x128xf32> to vector<8x128xf32>
    %160 = arith.addf %158, %159 : vector<8x128xf32>
    %161 = arith.negf %160 : vector<8x128xf32>
    %162 = math.exp %161 : vector<8x128xf32>
    %cst_84 = arith.constant 1.000000e+00 : f32
    %163 = vector.broadcast %cst_84 : f32 to vector<8x128xf32>
    %164 = arith.addf %163, %162 : vector<8x128xf32>
    %165 = arith.divf %163, %164 : vector<8x128xf32>
    %166 = arith.mulf %123#2, %165 : vector<8x128xf32>
    %c0_85 = arith.constant 0 : index
    %c0_86 = arith.constant 0 : index
    %167 = vector.load %arg23[%c0_85, %c0_86] : memref<128x128xf32, #tpu.memory_space<vmem>>, vector<128x128xf32>
    %cst_87 = arith.constant dense<0.000000e+00> : vector<8x128xf32>
    %168 = tpu.matmul %166, %167, %cst_87 {dimension_numbers = #tpu.dot_dimension_numbers<[1], [0], [0], [1], [0, 0, 1, 1], [], []>} : vector<8x128xf32>, vector<128x128xf32>, vector<8x128xf32> -> vector<8x128xf32>
    %c0_88 = arith.constant 0 : index
    %c0_89 = arith.constant 0 : index
    %169 = vector.load %arg24[%c0_88, %c0_89] : memref<1x128xf32, #tpu.memory_space<vmem>>, vector<1x128xf32>
    %170 = vector.broadcast %169 : vector<1x128xf32> to vector<8x128xf32>
    %171 = arith.addf %168, %170 : vector<8x128xf32>
    %cst_90 = arith.constant 0.000000e+00 : f32
    %172 = vector.broadcast %cst_90 : f32 to vector<8x128xf32>
    %173 = arith.maximumf %171, %172 : vector<8x128xf32>
    %c0_91 = arith.constant 0 : index
    %c0_92 = arith.constant 0 : index
    %174 = vector.load %arg25[%c0_91, %c0_92] : memref<128x128xf32, #tpu.memory_space<vmem>>, vector<128x128xf32>
    %cst_93 = arith.constant dense<0.000000e+00> : vector<8x128xf32>
    %175 = tpu.matmul %173, %174, %cst_93 {dimension_numbers = #tpu.dot_dimension_numbers<[1], [0], [0], [1], [0, 0, 1, 1], [], []>} : vector<8x128xf32>, vector<128x128xf32>, vector<8x128xf32> -> vector<8x128xf32>
    %c0_94 = arith.constant 0 : index
    %c0_95 = arith.constant 0 : index
    %176 = vector.load %arg26[%c0_94, %c0_95] : memref<1x128xf32, #tpu.memory_space<vmem>>, vector<1x128xf32>
    %177 = vector.broadcast %176 : vector<1x128xf32> to vector<8x128xf32>
    %178 = arith.addf %175, %177 : vector<8x128xf32>
    %c0_96 = arith.constant 0 : index
    %c0_97 = arith.constant 0 : index
    %179 = vector.load %arg27[%c0_96, %c0_97] : memref<1x128xf32, #tpu.memory_space<vmem>>, vector<1x128xf32>
    %c0_98 = arith.constant 0 : index
    %c0_99 = arith.constant 0 : index
    %180 = vector.load %arg28[%c0_98, %c0_99] : memref<1x128xf32, #tpu.memory_space<vmem>>, vector<1x128xf32>
    %181 = vector.broadcast %15 : vector<1x128xf32> to vector<8x128xf32>
    %182 = arith.mulf %178, %181 : vector<8x128xf32>
    %cst_100 = arith.constant dense<0.000000e+00> : vector<8xf32>
    %183 = vector.multi_reduction <add>, %182, %cst_100 [1] : vector<8x128xf32> to vector<8xf32>
    %184 = vector.shape_cast %183 : vector<8xf32> to vector<8x1xf32>
    %cst_101 = arith.constant 6.250000e-02 : f32
    %185 = vector.broadcast %cst_101 : f32 to vector<8x1xf32>
    %186 = arith.mulf %184, %185 : vector<8x1xf32>
    %187 = vector.broadcast %186 : vector<8x1xf32> to vector<8x128xf32>
    %188 = arith.subf %178, %187 : vector<8x128xf32>
    %189 = vector.broadcast %15 : vector<1x128xf32> to vector<8x128xf32>
    %190 = arith.mulf %188, %189 : vector<8x128xf32>
    %191 = arith.mulf %190, %190 : vector<8x128xf32>
    %cst_102 = arith.constant dense<0.000000e+00> : vector<8xf32>
    %192 = vector.multi_reduction <add>, %191, %cst_102 [1] : vector<8x128xf32> to vector<8xf32>
    %193 = vector.shape_cast %192 : vector<8xf32> to vector<8x1xf32>
    %cst_103 = arith.constant 6.250000e-02 : f32
    %194 = vector.broadcast %cst_103 : f32 to vector<8x1xf32>
    %195 = arith.mulf %193, %194 : vector<8x1xf32>
    %196 = vector.broadcast %186 : vector<8x1xf32> to vector<8x128xf32>
    %197 = arith.subf %178, %196 : vector<8x128xf32>
    %cst_104 = arith.constant 9.99999974E-6 : f32
    %198 = vector.broadcast %cst_104 : f32 to vector<8x1xf32>
    %199 = arith.addf %195, %198 : vector<8x1xf32>
    %200 = math.rsqrt %199 : vector<8x1xf32>
    %201 = vector.broadcast %200 : vector<8x1xf32> to vector<8x128xf32>
    %202 = arith.mulf %197, %201 : vector<8x128xf32>
    %203 = vector.broadcast %179 : vector<1x128xf32> to vector<8x128xf32>
    %204 = arith.mulf %202, %203 : vector<8x128xf32>
    %205 = vector.broadcast %180 : vector<1x128xf32> to vector<8x128xf32>
    %206 = arith.addf %204, %205 : vector<8x128xf32>
    %207 = arith.negf %206 : vector<8x128xf32>
    %208 = math.exp %207 : vector<8x128xf32>
    %cst_105 = arith.constant 1.000000e+00 : f32
    %209 = vector.broadcast %cst_105 : f32 to vector<8x128xf32>
    %210 = arith.addf %209, %208 : vector<8x128xf32>
    %211 = arith.divf %209, %210 : vector<8x128xf32>
    %212 = math.absf %211 : vector<8x128xf32>
    %213 = vector.broadcast %20 : vector<8x1xf32> to vector<8x128xf32>
    %214 = arith.mulf %212, %213 : vector<8x128xf32>
    %cst_106 = arith.constant dense<0.000000e+00> : vector<128xf32>
    %215 = vector.multi_reduction <add>, %214, %cst_106 [0] : vector<8x128xf32> to vector<128xf32>
    %216 = vector.shape_cast %215 : vector<128xf32> to vector<1x128xf32>
    %cst_107 = arith.constant 2.500000e-01 : f32
    %217 = vector.broadcast %cst_107 : f32 to vector<1x128xf32>
    %218 = arith.mulf %216, %217 : vector<1x128xf32>
    %c0_108 = arith.constant 0 : index
    %c0_109 = arith.constant 0 : index
    %219 = vector.load %arg29[%c0_108, %c0_109] : memref<1x128xf32, #tpu.memory_space<vmem>>, vector<1x128xf32>
    %c0_110 = arith.constant 0 : index
    %c0_111 = arith.constant 0 : index
    %220 = vector.load %arg29[%c0_110, %c0_111] : memref<1x128xf32, #tpu.memory_space<vmem>>, vector<1x128xf32>
    %221 = arith.subf %218, %220 : vector<1x128xf32>
    %cst_112 = arith.constant 0.00999999977 : f32
    %222 = vector.broadcast %cst_112 : f32 to vector<1x128xf32>
    %223 = arith.mulf %222, %221 : vector<1x128xf32>
    %224 = arith.addf %219, %223 : vector<1x128xf32>
    %c0_113 = arith.constant 0 : index
    %c0_114 = arith.constant 0 : index
    %225 = vector.load %arg33[%c0_113, %c0_114] : memref<1x128xf32, #tpu.memory_space<vmem>>, vector<1x128xf32>
    tpu.vector_store %arg33[%c0_113, %c0_114], %224 {strides = array<i32>} : memref<1x128xf32, #tpu.memory_space<vmem>>, vector<1x128xf32>,
    %c0_115 = arith.constant 0 : index
    %c0_116 = arith.constant 0 : index
    %226 = vector.load %arg30[%c0_115, %c0_116] : memref<128x128xf32, #tpu.memory_space<vmem>>, vector<128x128xf32>
    %cst_117 = arith.constant dense<0.000000e+00> : vector<8x128xf32>
    %227 = tpu.matmul %166, %226, %cst_117 {dimension_numbers = #tpu.dot_dimension_numbers<[1], [0], [0], [1], [0, 0, 1, 1], [], []>} : vector<8x128xf32>, vector<128x128xf32>, vector<8x128xf32> -> vector<8x128xf32>
    %c0_118 = arith.constant 0 : index
    %c0_119 = arith.constant 0 : index
    %228 = vector.load %arg31[%c0_118, %c0_119] : memref<1x128xf32, #tpu.memory_space<vmem>>, vector<1x128xf32>
    %229 = vector.broadcast %228 : vector<1x128xf32> to vector<8x128xf32>
    %230 = arith.addf %227, %229 : vector<8x128xf32>
    %c0_120 = arith.constant 0 : index
    %c0_121 = arith.constant 0 : index
    %231 = vector.load %arg32[%c0_120, %c0_121] : memref<8x128xf32, #tpu.memory_space<vmem>>, vector<8x128xf32>
    tpu.vector_store %arg32[%c0_120, %c0_121], %230 {strides = array<i32>} : memref<8x128xf32, #tpu.memory_space<vmem>>, vector<8x128xf32>,
    return
  }
}

</mosaic_0001>

<bundles_post_ra>
// kernel: neural_adaptive_forward.1
= control target key start
LH: loop header
LB: loop body
LE: loop exit
PB: predicated region body
PF: predicated region fallthrough
CT: control target
= control target key end

     0   :  { %s4706_s6 = smov 1   ;;  %s4707_s10 = smov 2   ;;  %s6719_s0 = inlined_call_operand.smem [shape: u32[34], index: -1, kind: input, shape index: {}] }
   0x1   :  { %s4751_s5 = sld [smem:[%s6719_s0]]   ;;  %s4708_s14 = smov 3  }
   0x2   :  { %s4756_s9 = sld [smem:[%s6719_s0 + %s4706_s6]]   ;;  %s4709_s18 = smov 4  }
   0x3   :  { %s4761_s13 = sld [smem:[%s6719_s0 + %s4707_s10]]   ;;  %s4710_s22 = smov 5  }
   0x4   :  { %s4766_s17 = sld [smem:[%s6719_s0 + %s4708_s14]]   ;;  %s4711_s26 = smov 6  }
   0x5   :  { %s4771_s21 = sld [smem:[%s6719_s0 + %s4709_s18]]   ;;  %s4712_s30 = smov 7  }
   0x6   :  { %s4776_s25 = sld [smem:[%s6719_s0 + %s4710_s22]]   ;;  %s4713_s4 = smov 8  }
   0x7   :  { %s4781_s29 = sld [smem:[%s6719_s0 + %s4711_s26]]   ;;  %s4714_s10 = smov 9  }
   0x8   :  { %6754 = sst [smem:[#allocation6_spill]] %s4756_s9  ;;  %s4715_s15 = smov 10  }
   0x9   :  { %s4786_s3 = sld [smem:[%s6719_s0 + %s4712_s30]]   ;;  %s4716_s20 = smov 11  }
   0xa   :  { %s4791_s8 = sld [smem:[%s6719_s0 + %s4713_s4]]   ;;  %s4717_s26 = smov 12  }
   0xb   :  { %s4796_s14 = sld [smem:[%s6719_s0 + %s4714_s10]]   ;;  %s4718_s1 = smov 13  }
   0xc   :  { %s4801_s19 = sld [smem:[%s6719_s0 + %s4715_s15]]   ;;  %s4719_s7 = smov 14  }
   0xd   :  { %s4806_s24 = sld [smem:[%s6719_s0 + %s4716_s20]]   ;;  %s4720_s15 = smov 15  }
   0xe   :  { %s4811_s30 = sld [smem:[%s6719_s0 + %s4717_s26]]   ;;  %s4721_s22 = smov 16  }
   0xf   :  { %s4816_s6 = sld [smem:[%s6719_s0 + %s4718_s1]]   ;;  %s4722_s28 = smov 17  }
  0x10   :  { %s4821_s12 = sld [smem:[%s6719_s0 + %s4719_s7]]   ;;  %s4723_s7 = smov 18  }
  0x11   :  { %s4826_s20 = sld [smem:[%s6719_s0 + %s4720_s15]]   ;;  %s4724_s15 = smov 19  }
  0x12   :  { %s4831_s27 = sld [smem:[%s6719_s0 + %s4721_s22]]   ;;  %s4725_s22 = smov 20  }
  0x13   :  { %s4836_s4 = sld [smem:[%s6719_s0 + %s4722_s28]]   ;;  %s4726_s28 = smov 21  }
  0x14   :  { %s4841_s9 = sld [smem:[%s6719_s0 + %s4723_s7]]   ;;  %s4727_s7 = smov 22  }
  0x16   :  { %6755 = sst [smem:[#allocation7_spill]] %s4821_s12 }
  0x17   :  { %s4846_s12 = sld [smem:[%s6719_s0 + %s4724_s15]]   ;;  %s4728_s15 = smov 23  }
  0x18   :  { %6756 = sst [smem:[#allocation8_spill]] %s4831_s27 }
  0x19   :  { %6757 = sst [smem:[#allocation9_spill]] %s4836_s4 }
  0x1a   :  { %6758 = sst [smem:[#allocation10_spill]] %s4841_s9 }
  0x1b   :  { %s4851_s27 = sld [smem:[%s6719_s0 + %s4725_s22]]   ;;  %s4729_s22 = smov 24  }
  0x1c   :  { %s4856_s4 = sld [smem:[%s6719_s0 + %s4726_s28]]   ;;  %s4730_s28 = smov 25  }
  0x1d   :  { %6759 = sst [smem:[#allocation11_spill]] %s4846_s12 }
  0x1e   :  { %s4861_s9 = sld [smem:[%s6719_s0 + %s4727_s7]]   ;;  %s4731_s7 = smov 26  }
  0x1f   :  { %s4866_s12 = sld [smem:[%s6719_s0 + %s4728_s15]]   ;;  %s4732_s15 = smov 27  }
  0x21   :  { %6760 = sst [smem:[#allocation12_spill]] %s4851_s27 }
  0x22   :  { %6761 = sst [smem:[#allocation13_spill]] %s4856_s4 }
  0x23   :  { %s4871_s27 = sld [smem:[%s6719_s0 + %s4729_s22]]   ;;  %s4733_s22 = smov 28  }
  0x24   :  { %6762 = sst [smem:[#allocation14_spill]] %s4861_s9 }
  0x25   :  { %6763 = sst [smem:[#allocation15_spill]] %s4866_s12 }
  0x26   :  { %s4876_s4 = sld [smem:[%s6719_s0 + %s4730_s28]]   ;;  %s4734_s28 = smov 29  }
  0x27   :  { %s4881_s9 = sld [smem:[%s6719_s0 + %s4731_s7]]   ;;  %s4735_s7 = smov 30  }
  0x28   :  { %s4886_s12 = sld [smem:[%s6719_s0 + %s4732_s15]]   ;;  %s4736_s15 = smov 31  }
  0x29   :  { %6764 = sst [smem:[#allocation16_spill]] %s4871_s27 }
  0x2a   :  { %s4891_s27 = sld [smem:[%s6719_s0 + %s4733_s22]]   ;;  %s4737_s22 = smov 32  }
  0x2c   :  { %6765 = sst [smem:[#allocation17_spill]] %s4876_s4 }
  0x2d   :  { %6766 = sst [smem:[#allocation18_spill]] %s4881_s9 }
  0x2e   :  { %6767 = sst [smem:[#allocation19_spill]] %s4886_s12 }
  0x2f   :  { %s4896_s4 = sld [smem:[%s6719_s0 + %s4734_s28]]   ;;  %s4738_s28 = smov 33  }
  0x30   :  { %6768 = sst [smem:[#allocation20_spill]] %s4891_s27 }
  0x31   :  { %s4901_s9 = sld [smem:[%s6719_s0 + %s4735_s7]]  }
  0x32   :  { %s4906_s12 = sld [smem:[%s6719_s0 + %s4736_s15]]  }
  0x33   :  { %s4911_s27 = sld [smem:[%s6719_s0 + %s4737_s22]]  }
  0x35   :  { %6769 = sst [smem:[#allocation21_spill]] %s4896_s4 }
  0x36   :  { %s4916_s4 = sld [smem:[%s6719_s0 + %s4738_s28]]  }
  0x37   :  { %73 = vsyncpa [#allocation4], 0  ;;  %v180_v0 = vld [vmem:[%s4761_s13 + $0x78] sm:$0xff]  ;;  %v179_v1 = vld [vmem:[%s4761_s13 + $0x70] sm:$0xff]  ;;  %s6877_s0 = sld [smem:[#allocation7_spill]] }
  0x38   :  { %4084 = vmatprep.subr.mxu0 %v180_v0  ;;  %v178_v2 = vld [vmem:[%s4761_s13 + $0x68] sm:$0xff]  ;;  %v177_v3 = vld [vmem:[%s4761_s13 + $0x60] sm:$0xff]  ;;  %v176_v5 = vld [vmem:[%s4761_s13 + $0x58] sm:$0xff] }
  0x39   :  { %4085 = vmatpush3.msra.mxu0 %v180_v0  ;;  %v149_v4 = vld [vmem:[%s4751_s5] sm:$0xff]  ;;  %v175_v6 = vld [vmem:[%s4761_s13 + $0x50] sm:$0xff]  ;;  %v174_v7 = vld [vmem:[%s4761_s13 + $0x48] sm:$0xff] }
  0x3a   :  { %4086 = vmatprep.subr.mxu0 %v179_v1  ;;  %4116 = vmatprep.mubr.f32.mxu0 %v149_v4  ;;  %v348_v8 = vld [vmem:[%s4771_s21 + $0x78] sm:$0xff]  ;;  %v347_v9 = vld [vmem:[%s4771_s21 + $0x70] sm:$0xff]  ;;  %v173_v10 = vld [vmem:[%s4761_s13 + $0x40] sm:$0xff] }
  0x3b   :  { %4087 = vmatpush3.msra.mxu0 %v179_v1  ;;  %4140 = vmatprep.subr.mxu1 %v348_v8  ;;  %v346_v11 = vld [vmem:[%s4771_s21 + $0x68] sm:$0xff]  ;;  %v172_v12 = vld [vmem:[%s4761_s13 + $0x38] sm:$0xff]  ;;  %v345_v13 = vld [vmem:[%s4771_s21 + $0x60] sm:$0xff] }
  0x3c   :  { %4088 = vmatprep.subr.mxu0 %v178_v2  ;;  %4141 = vmatpush3.msra.mxu1 %v348_v8  ;;  %v171_v14 = vld [vmem:[%s4761_s13 + $0x30] sm:$0xff]  ;;  %v344_v15 = vld [vmem:[%s4771_s21 + $0x58] sm:$0xff]  ;;  %v170_v16 = vld [vmem:[%s4761_s13 + $0x28] sm:$0xff] }
  0x3d   :  { %4089 = vmatpush3.msra.mxu0 %v178_v2  ;;  %4142 = vmatprep.subr.mxu1 %v347_v9  ;;  %v343_v17 = vld [vmem:[%s4771_s21 + $0x50] sm:$0xff]  ;;  %v169_v18 = vld [vmem:[%s4761_s13 + $0x20] sm:$0xff]  ;;  %v342_v19 = vld [vmem:[%s4771_s21 + $0x48] sm:$0xff] }
  0x3e   :  { %4090 = vmatprep.subr.mxu0 %v177_v3  ;;  %4143 = vmatpush3.msra.mxu1 %v347_v9  ;;  %v168_v20 = vld [vmem:[%s4761_s13 + $0x18] sm:$0xff]  ;;  %v341_v21 = vld [vmem:[%s4771_s21 + $0x40] sm:$0xff]  ;;  %v167_v22 = vld [vmem:[%s4761_s13 + $0x10] sm:$0xff] }
  0x3f   :  { %4091 = vmatpush3.msra.mxu0 %v177_v3  ;;  %4144 = vmatprep.subr.mxu1 %v346_v11  ;;  %v340_v23 = vld [vmem:[%s4771_s21 + $0x38] sm:$0xff]  ;;  %v166_v24 = vld [vmem:[%s4761_s13 + $0x8] sm:$0xff]  ;;  %v339_v25 = vld [vmem:[%s4771_s21 + $0x30] sm:$0xff] }
  0x40   :  { %4092 = vmatprep.subr.mxu0 %v176_v5  ;;  %4145 = vmatpush3.msra.mxu1 %v346_v11  ;;  %v165_v26 = vld [vmem:[%s4761_s13] sm:$0xff]  ;;  %v338_v27 = vld [vmem:[%s4771_s21 + $0x28] sm:$0xff]  ;;  %v151_v29 = vld [vmem:[%s4751_s5 + $0x10] sm:$0xff]  ;;  %s6968_s13 = sld [smem:[#allocation9_spill]] }
  0x41   :  { %4093 = vmatpush3.msra.mxu0 %v176_v5  ;;  %4146 = vmatprep.subr.mxu1 %v345_v13  ;;  %v150_v28 = vld [vmem:[%s4751_s5 + $0x8] sm:$0xff]  ;;  %v337_v30 = vld [vmem:[%s4771_s21 + $0x20] sm:$0xff]  ;;  %v336_v31 = vld [vmem:[%s4771_s21 + $0x18] sm:$0xff] }
  0x42   :  { %4094 = vmatprep.subr.mxu0 %v175_v6  ;;  %4147 = vmatpush3.msra.mxu1 %v345_v13  ;;  %v152_v32 = vld [vmem:[%s4751_s5 + $0x18] sm:$0xff]  ;;  %v153_v33 = vld [vmem:[%s4751_s5 + $0x20] sm:$0xff]  ;;  %v154_v34 = vld [vmem:[%s4751_s5 + $0x28] sm:$0xff] }
  0x43   :  { %4095 = vmatpush3.msra.mxu0 %v175_v6  ;;  %4148 = vmatprep.subr.mxu1 %v344_v15  ;;  %v155_v35 = vld [vmem:[%s4751_s5 + $0x30] sm:$0xff]  ;;  %v156_v36 = vld [vmem:[%s4751_s5 + $0x38] sm:$0xff]  ;;  %v157_v37 = vld [vmem:[%s4751_s5 + $0x40] sm:$0xff] }
  0x44   :  { %4096 = vmatprep.subr.mxu0 %v174_v7  ;;  %4149 = vmatpush3.msra.mxu1 %v344_v15  ;;  %v158_v38 = vld [vmem:[%s4751_s5 + $0x48] sm:$0xff]  ;;  %v159_v39 = vld [vmem:[%s4751_s5 + $0x50] sm:$0xff]  ;;  %v160_v40 = vld [vmem:[%s4751_s5 + $0x58] sm:$0xff] }
  0x45   :  { %4097 = vmatpush3.msra.mxu0 %v174_v7  ;;  %4150 = vmatprep.subr.mxu1 %v343_v17  ;;  %v161_v41 = vld [vmem:[%s4751_s5 + $0x60] sm:$0xff]  ;;  %v162_v42 = vld [vmem:[%s4751_s5 + $0x68] sm:$0xff]  ;;  %v163_v43 = vld [vmem:[%s4751_s5 + $0x70] sm:$0xff] }
  0x46   :  { %4098 = vmatprep.subr.mxu0 %v173_v10  ;;  %4151 = vmatpush3.msra.mxu1 %v343_v17  ;;  %v164_v44 = vld [vmem:[%s4751_s5 + $0x78] sm:$0xff]  ;;  %v335_v45 = vld [vmem:[%s4771_s21 + $0x10] sm:$0xff]  ;;  %v334_v46 = vld [vmem:[%s4771_s21 + $0x8] sm:$0xff]  ;;  %v6725_v17 = vmov 0.0   ;;  %s6893_s5 = sld [smem:[#allocation8_spill]] }
  0x47   :  { %4099 = vmatpush3.msra.mxu0 %v173_v10  ;;  %4152 = vmatprep.subr.mxu1 %v342_v19  ;;  %v333_v47 = vld [vmem:[%s4771_s21] sm:$0xff] }
  0x48   :  { %4100 = vmatprep.subr.mxu0 %v172_v12  ;;  %4153 = vmatpush3.msra.mxu1 %v342_v19  ;;  %v3817_v49 = vld [vmem:[%s4766_s17] ss:$0 sm:$0xff]  ;;  %s6278_s17 = smov 0  }
  0x49   :  { %4101 = vmatpush3.msra.mxu0 %v172_v12  ;;  %4154 = vmatprep.subr.mxu1 %v341_v21 }
  0x4a   :  { %4102 = vmatprep.subr.mxu0 %v171_v14  ;;  %4155 = vmatpush3.msra.mxu1 %v341_v21 }
  0x4b   :  { %4103 = vmatpush3.msra.mxu0 %v171_v14  ;;  %4156 = vmatprep.subr.mxu1 %v340_v23 }
  0x4c   :  { %4104 = vmatprep.subr.mxu0 %v170_v16  ;;  %4157 = vmatpush3.msra.mxu1 %v340_v23 }
  0x4d   :  { %4105 = vmatpush3.msra.mxu0 %v170_v16  ;;  %4158 = vmatprep.subr.mxu1 %v339_v25 }
  0x4e   :  { %4106 = vmatprep.subr.mxu0 %v169_v18  ;;  %4159 = vmatpush3.msra.mxu1 %v339_v25 }
  0x4f   :  { %4107 = vmatpush3.msra.mxu0 %v169_v18  ;;  %4160 = vmatprep.subr.mxu1 %v338_v27  ;;  %v138_v18 = vlaneseq }
  0x50   :  { %4108 = vmatprep.subr.mxu0 %v168_v20  ;;  %4161 = vmatpush3.msra.mxu1 %v338_v27 }
  0x51   :  { %4109 = vmatpush3.msra.mxu0 %v168_v20  ;;  %4162 = vmatprep.subr.mxu1 %v337_v30  ;;  %v4968_v19 = vshrl.u32 %v138_v18, 7  ;;  %v144_v20 = vand.u32 127, %v138_v18 }
  0x52   :  { %4110 = vmatprep.subr.mxu0 %v167_v22  ;;  %4163 = vmatpush3.msra.mxu1 %v337_v30 }
  0x53   :  { %4111 = vmatpush3.msra.mxu0 %v167_v22  ;;  %4164 = vmatprep.subr.mxu1 %v336_v31  ;;  %6770 = vst [vmem:[#allocation22_spill] sm:$0xff] %v4968_v19  ;;  %vm140_vm0 = vcmp.lt.s32.totalorder %v4968_v19, 4  ;;  %vm145_vm1 = vcmp.lt.s32.totalorder %v144_v20, 16 }
  0x54   :  { %4112 = vmatprep.subr.mxu0 %v166_v24  ;;  %4165 = vmatpush3.msra.mxu1 %v336_v31  ;;  %v4972_v22 = vsel %vm140_vm0, 1.0, %v6725_v17  ;;  %v4975_v23 = vsel %vm145_vm1, 1.0, %v6725_v17 }
  0x55   :  { %4113 = vmatpush3.msra.mxu0 %v166_v24  ;;  %4166 = vmatprep.subr.mxu1 %v335_v45  ;;  %6771 = vst [vmem:[#allocation23_spill] sm:$0xff] %v4972_v22  ;;  %6772 = vst [vmem:[#allocation24_spill] sm:$0xff] %v4975_v23  ;;  %v3818_v24 = vld [vmem:[%s4776_s25] ss:$0 sm:$0xff]  ;;  %v4982_v27 = vmul.f32 %v4975_v23, %v4972_v22 }
  0x56   :  { %4114 = vmatprep.subr.mxu0 %v165_v26  ;;  %4167 = vmatpush3.msra.mxu1 %v335_v45 }
  0x57   :  { %4115 = vmatpush3.msra.mxu0 %v165_v26  ;;  %4168 = vmatprep.subr.mxu1 %v334_v46 }
  0x58   :  { %4117 = vmatmul.mubr.f32.vlgmr.msra.gmra.mxu0 %v150_v28  ;;  %4169 = vmatpush3.msra.mxu1 %v334_v46 }
  0x59   :  { %4119 = vmatprep.mubr.f32.mxu0 %v151_v29  ;;  %4170 = vmatprep.subr.mxu1 %v333_v47 }
  0x5a   :  { %4171 = vmatpush3.msra.mxu1 %v333_v47 }
  0x5c   :  { %4120 = vmatmul.mubr.f32.gmra.mxu0 %v152_v32 }
  0x5d   :  { %4122 = vmatprep.mubr.f32.mxu0 %v153_v33 }
  0x60   :  { %4123 = vmatmul.mubr.f32.gmra.mxu0 %v154_v34 }
  0x61   :  { %4125 = vmatprep.mubr.f32.mxu0 %v155_v35 }
  0x64   :  { %4126 = vmatmul.mubr.f32.gmra.mxu0 %v156_v36 }
  0x65   :  { %4128 = vmatprep.mubr.f32.mxu0 %v157_v37 }
  0x68   :  { %4129 = vmatmul.mubr.f32.gmra.mxu0 %v158_v38 }
  0x69   :  { %4131 = vmatprep.mubr.f32.mxu0 %v159_v39 }
  0x6c   :  { %4132 = vmatmul.mubr.f32.gmra.mxu0 %v160_v40 }
  0x6d   :  { %4134 = vmatprep.mubr.f32.mxu0 %v161_v41 }
  0x70   :  { %4135 = vmatmul.mubr.f32.gmra.mxu0 %v162_v42 }
  0x71   :  { %4137 = vmatprep.mubr.f32.mxu0 %v163_v43 }
  0x74   :  { %4138 = vmatmul.mubr.f32.gmra.mxu0 %v164_v44 }
 0x118   :  { %v4118_v48 = vpop.f32.mrf.mxu0 }
 0x119   :  { %v260_v52 = vadd.f32 %v4118_v48, %v3817_v49 }
 0x11a   :  { %v254_v50 = vpop.f32.mrf.mxu0 }
 0x11b   :  { %v255_v51 = vadd.f32 %v3817_v49, %v254_v50 }
 0x11c   :  { %v4121_v53 = vpop.f32.mrf.mxu0 }
 0x11d   :  { %4172 = vmatprep.mubr.f32.mxu1 %v255_v51  ;;  %v270_v54 = vadd.f32 %v4121_v53, %v3817_v49 }
 0x11e   :  { %v264_v55 = vpop.f32.mrf.mxu0  ;;  %4173 = vmatmul.mubr.f32.vlgmr.msra.gmra.mxu1 %v260_v52 }
 0x11f   :  { %v265_v56 = vadd.f32 %v3817_v49, %v264_v55 }
 0x120   :  { %v4124_v57 = vpop.f32.mrf.mxu0 }
 0x121   :  { %4175 = vmatprep.mubr.f32.mxu1 %v265_v56  ;;  %v280_v58 = vadd.f32 %v4124_v57, %v3817_v49 }
 0x122   :  { %v274_v59 = vpop.f32.mrf.mxu0  ;;  %4176 = vmatmul.mubr.f32.gmra.mxu1 %v270_v54 }
 0x123   :  { %v275_v60 = vadd.f32 %v3817_v49, %v274_v59 }
 0x124   :  { %v4127_v61 = vpop.f32.mrf.mxu0 }
 0x125   :  { %4178 = vmatprep.mubr.f32.mxu1 %v275_v60  ;;  %v290_v62 = vadd.f32 %v4127_v61, %v3817_v49 }
 0x126   :  { %v284_v63 = vpop.f32.mrf.mxu0  ;;  %4179 = vmatmul.mubr.f32.gmra.mxu1 %v280_v58 }
 0x127   :  { %v285_v0 = vadd.f32 %v3817_v49, %v284_v63 }
 0x128   :  { %v4130_v1 = vpop.f32.mrf.mxu0 }
 0x129   :  { %4181 = vmatprep.mubr.f32.mxu1 %v285_v0  ;;  %v300_v2 = vadd.f32 %v4130_v1, %v3817_v49 }
 0x12a   :  { %v294_v3 = vpop.f32.mrf.mxu0  ;;  %4182 = vmatmul.mubr.f32.gmra.mxu1 %v290_v62 }
 0x12b   :  { %v295_v4 = vadd.f32 %v3817_v49, %v294_v3 }
 0x12c   :  { %v4133_v5 = vpop.f32.mrf.mxu0 }
 0x12d   :  { %4184 = vmatprep.mubr.f32.mxu1 %v295_v4  ;;  %v310_v6 = vadd.f32 %v4133_v5, %v3817_v49 }
 0x12e   :  { %v304_v7 = vpop.f32.mrf.mxu0  ;;  %4185 = vmatmul.mubr.f32.gmra.mxu1 %v300_v2 }
 0x12f   :  { %v305_v8 = vadd.f32 %v3817_v49, %v304_v7 }
 0x130   :  { %v4136_v9 = vpop.f32.mrf.mxu0 }
 0x131   :  { %4187 = vmatprep.mubr.f32.mxu1 %v305_v8  ;;  %v320_v10 = vadd.f32 %v4136_v9, %v3817_v49 }
 0x132   :  { %v314_v11 = vpop.f32.mrf.mxu0  ;;  %4188 = vmatmul.mubr.f32.gmra.mxu1 %v310_v6 }
 0x133   :  { %v315_v12 = vadd.f32 %v3817_v49, %v314_v11 }
 0x134   :  { %v4139_v13 = vpop.f32.mrf.mxu0 }
 0x135   :  { %4190 = vmatprep.mubr.f32.mxu1 %v315_v12  ;;  %v330_v14 = vadd.f32 %v4139_v13, %v3817_v49 }
 0x136   :  { %v324_v15 = vpop.f32.mrf.mxu0  ;;  %4191 = vmatmul.mubr.f32.gmra.mxu1 %v320_v10 }
 0x137   :  { %v325_v16 = vadd.f32 %v3817_v49, %v324_v15 }
 0x139   :  { %4193 = vmatprep.mubr.f32.mxu1 %v325_v16 }
 0x13a   :  { %4194 = vmatmul.mubr.f32.gmra.mxu1 %v330_v14 }
 0x13b   :  { %2163 = vmatprep.mubr.f32.mxu1 %v6725_v17 }
 0x1de   :  { %v4174_v21 = vpop.f32.mrf.mxu1 }
 0x1df   :  { %v4984_v29 = vadd.f32 %v4174_v21, %v3818_v24 }
 0x1e0   :  { %v422_v25 = vpop.f32.mrf.mxu1 }
 0x1e1   :  { %v4978_v26 = vadd.f32 %v3818_v24, %v422_v25  ;;  %v534_v36 = vmul.f32 %v4984_v29, %v4982_v27 }
 0x1e2   :  { %v4177_v28 = vpop.f32.mrf.mxu1 }
 0x1e3   :  { %v533_v30 = vmul.f32 %v4978_v26, %v4982_v27  ;;  %v4990_v34 = vadd.f32 %v4177_v28, %v3818_v24 }
 0x1e4   :  { %v432_v31 = vpop.f32.mrf.mxu1 }
 0x1e5   :  { %v4988_v32 = vadd.f32 %v3818_v24, %v432_v31  ;;  %549 = vadd.xlane.f32.xlu0 %v533_v30  ;;  %v536_v41 = vmul.f32 %v4990_v34, %v4982_v27 }
 0x1e6   :  { %v4180_v33 = vpop.f32.mrf.mxu1 }
 0x1e7   :  { %v535_v35 = vmul.f32 %v4988_v32, %v4982_v27  ;;  %v4996_v38 = vadd.f32 %v4180_v33, %v3818_v24 }
 0x1e8   :  { %v442_v37 = vpop.f32.mrf.mxu1 }
 0x1e9   :  { %v4998_v39 = vadd.f32 %v3818_v24, %v442_v37  ;;  %553 = vadd.xlane.f32.xlu1 %v535_v35  ;;  %551 = vadd.xlane.f32.xlu0 %v534_v36  ;;  %v538_v46 = vmul.f32 %v4996_v38, %v4982_v27 }
 0x1ea   :  { %v4183_v40 = vpop.f32.mrf.mxu1 }
 0x1eb   :  { %v537_v42 = vmul.f32 %v4998_v39, %v4982_v27  ;;  %v5004_v44 = vadd.f32 %v4183_v40, %v3818_v24 }
 0x1ec   :  { %v452_v43 = vpop.f32.mrf.mxu1 }
 0x1ed   :  { %v5006_v45 = vadd.f32 %v3818_v24, %v452_v43  ;;  %555 = vadd.xlane.f32.xlu1 %v536_v41  ;;  %557 = vadd.xlane.f32.xlu0 %v537_v42  ;;  %v540_v52 = vmul.f32 %v5004_v44, %v4982_v27 }
 0x1ee   :  { %v4186_v47 = vpop.f32.mrf.mxu1 }
 0x1ef   :  { %v539_v48 = vmul.f32 %v5006_v45, %v4982_v27  ;;  %v5012_v50 = vadd.f32 %v4186_v47, %v3818_v24 }
 0x1f0   :  { %v462_v49 = vpop.f32.mrf.mxu1 }
 0x1f1   :  { %v5014_v51 = vadd.f32 %v3818_v24, %v462_v49  ;;  %559 = vadd.xlane.f32.xlu1 %v538_v46  ;;  %561 = vadd.xlane.f32.xlu0 %v539_v48  ;;  %v542_v58 = vmul.f32 %v5012_v50, %v4982_v27 }
 0x1f2   :  { %v4189_v53 = vpop.f32.mrf.mxu1 }
 0x1f3   :  { %v541_v54 = vmul.f32 %v5014_v51, %v4982_v27  ;;  %v5020_v56 = vadd.f32 %v4189_v53, %v3818_v24 }
 0x1f4   :  { %v472_v55 = vpop.f32.mrf.mxu1 }
 0x1f5   :  { %v5022_v57 = vadd.f32 %v3818_v24, %v472_v55  ;;  %563 = vadd.xlane.f32.xlu1 %v540_v52  ;;  %565 = vadd.xlane.f32.xlu0 %v541_v54  ;;  %v544_v0 = vmul.f32 %v5020_v56, %v4982_v27 }
 0x1f6   :  { %v4192_v59 = vpop.f32.mrf.mxu1 }
 0x1f7   :  { %v543_v60 = vmul.f32 %v5022_v57, %v4982_v27  ;;  %v5028_v62 = vadd.f32 %v4192_v59, %v3818_v24 }
 0x1f8   :  { %v482_v61 = vpop.f32.mrf.mxu1 }
 0x1f9   :  { %v5030_v63 = vadd.f32 %v3818_v24, %v482_v61  ;;  %567 = vadd.xlane.f32.xlu1 %v542_v58  ;;  %569 = vadd.xlane.f32.xlu0 %v543_v60  ;;  %v546_v6 = vmul.f32 %v5028_v62, %v4982_v27 }
 0x1fa   :  { %v4195_v1 = vpop.f32.mrf.mxu1 }
 0x1fb   :  { %v545_v2 = vmul.f32 %v5030_v63, %v4982_v27  ;;  %v5036_v4 = vadd.f32 %v4195_v1, %v3818_v24 }
 0x1fc   :  { %v492_v3 = vpop.f32.mrf.mxu1 }
 0x1fd   :  { %v5038_v5 = vadd.f32 %v3818_v24, %v492_v3  ;;  %571 = vadd.xlane.f32.xlu1 %v544_v0  ;;  %573 = vadd.xlane.f32.xlu0 %v545_v2  ;;  %v548_v8 = vmul.f32 %v5036_v4, %v4982_v27 }
 0x1ff   :  { %v547_v7 = vmul.f32 %v5038_v5, %v4982_v27 }
 0x201   :  { %575 = vadd.xlane.f32.xlu1 %v546_v6  ;;  %577 = vadd.xlane.f32.xlu0 %v547_v7 }
 0x205   :  { %579 = vadd.xlane.f32.xlu1 %v548_v8 }
 0x26e   :  { %v550_v9 = vpop.xlane.xlu0 %549 }
 0x26f   :  { %v581_v10 = vrot.slane %v550_v9, 4 }
 0x271   :  { %v582_v11 = vadd.f32 %v581_v10, %v550_v9 }
 0x272   :  { %v554_v12 = vpop.xlane.xlu1 %553  ;;  %v552_v13 = vpop.xlane.xlu0 %551 }
 0x273   :  { %v583_v14 = vrot.slane %v582_v11, 2  ;;  %v593_v15 = vrot.slane %v554_v12, 4  ;;  %v587_v16 = vrot.slane %v552_v13, 4 }
 0x275   :  { %v584_v18 = vadd.f32 %v583_v14, %v582_v11  ;;  %v594_v20 = vadd.f32 %v593_v15, %v554_v12  ;;  %v588_v21 = vadd.f32 %v587_v16, %v552_v13 }
 0x276   :  { %v556_v24 = vpop.xlane.xlu1 %555  ;;  %v558_v25 = vpop.xlane.xlu0 %557 }
 0x277   :  { %v585_v28 = vrot.slane %v584_v18, 1  ;;  %v595_v30 = vrot.slane %v594_v20, 2  ;;  %v589_v31 = vrot.slane %v588_v21, 2  ;;  %v599_v33 = vrot.slane %v556_v24, 4 }
 0x278   :  { %v605_v35 = vrot.slane %v558_v25, 4 }
 0x279   :  { %v586_v36 = vadd.f32 %v585_v28, %v584_v18  ;;  %v596_v37 = vadd.f32 %v595_v30, %v594_v20  ;;  %v590_v40 = vadd.f32 %v589_v31, %v588_v21  ;;  %v600_v41 = vadd.f32 %v599_v33, %v556_v24 }
 0x27a   :  { %v606_v42 = vadd.f32 %v605_v35, %v558_v25  ;;  %v560_v43 = vpop.xlane.xlu1 %559  ;;  %v562_v46 = vpop.xlane.xlu0 %561 }
 0x27b   :  { %v597_v47 = vrot.slane %v596_v37, 1  ;;  %v591_v48 = vrot.slane %v590_v40, 1  ;;  %v601_v49 = vrot.slane %v600_v41, 2  ;;  %v611_v52 = vrot.slane %v560_v43, 4 }
 0x27c   :  { %v607_v53 = vrot.slane %v606_v42, 2  ;;  %v617_v54 = vrot.slane %v562_v46, 4  ;;  %v677_v55 = vmul.f32 0.015625, %v586_v36 }
 0x27d   :  { %v598_v58 = vadd.f32 %v597_v47, %v596_v37  ;;  %v602_v59 = vadd.f32 %v601_v49, %v600_v41  ;;  %v612_v60 = vadd.f32 %v611_v52, %v560_v43  ;;  %v592_v61 = vadd.f32 %v591_v48, %v590_v40 }
 0x27e   :  { %v608_v0 = vadd.f32 %v607_v53, %v606_v42  ;;  %v618_v1 = vadd.f32 %v617_v54, %v562_v46  ;;  %v564_v2 = vpop.xlane.xlu1 %563  ;;  %v566_v3 = vpop.xlane.xlu0 %565  ;;  %v5047_v6 = vsub.f32 %v4978_v26, %v677_v55 }
 0x27f   :  { %v603_v7 = vrot.slane %v602_v59, 1  ;;  %v613_v8 = vrot.slane %v612_v60, 2  ;;  %v623_v9 = vrot.slane %v564_v2, 4  ;;  %v629_v10 = vrot.slane %v566_v3, 4 }
 0x280   :  { %v609_v11 = vrot.slane %v608_v0, 1  ;;  %v619_v12 = vrot.slane %v618_v1, 2  ;;  %v709_v13 = vmul.f32 %v5047_v6, %v4982_v27  ;;  %v679_v14 = vmul.f32 0.015625, %v598_v58 }
 0x281   :  { %v604_v15 = vadd.f32 %v603_v7, %v602_v59  ;;  %v614_v16 = vadd.f32 %v613_v8, %v612_v60  ;;  %v624_v18 = vadd.f32 %v623_v9, %v564_v2  ;;  %v630_v20 = vadd.f32 %v629_v10, %v566_v3 }
 0x282   :  { %v610_v21 = vadd.f32 %v609_v11, %v608_v0  ;;  %v620_v24 = vadd.f32 %v619_v12, %v618_v1  ;;  %v568_v25 = vpop.xlane.xlu1 %567  ;;  %v570_v28 = vpop.xlane.xlu0 %569  ;;  %v725_v26 = vmul.f32 %v709_v13, %v709_v13  ;;  %v5052_v30 = vsub.f32 %v4988_v32, %v679_v14 }
 0x283   :  { %v615_v31 = vrot.slane %v614_v16, 1  ;;  %v625_v33 = vrot.slane %v624_v18, 2  ;;  %v631_v35 = vrot.slane %v630_v20, 2  ;;  %v635_v36 = vrot.slane %v568_v25, 4 }
 0x284   :  { %v621_v37 = vrot.slane %v620_v24, 1  ;;  %v641_v40 = vrot.slane %v570_v28, 4  ;;  %741 = vadd.xlane.f32.xlu0 %v725_v26  ;;  %v711_v41 = vmul.f32 %v5052_v30, %v4982_v27  ;;  %v678_v42 = vmul.f32 0.015625, %v592_v61 }
 0x285   :  { %v616_v43 = vadd.f32 %v615_v31, %v614_v16  ;;  %v626_v46 = vadd.f32 %v625_v33, %v624_v18  ;;  %v632_v47 = vadd.f32 %v631_v35, %v630_v20  ;;  %v636_v48 = vadd.f32 %v635_v36, %v568_v25 }
 0x286   :  { %v622_v49 = vadd.f32 %v621_v37, %v620_v24  ;;  %v642_v52 = vadd.f32 %v641_v40, %v570_v28  ;;  %v572_v53 = vpop.xlane.xlu1 %571  ;;  %v574_v32 = vpop.xlane.xlu0 %573  ;;  %v727_v54 = vmul.f32 %v711_v41, %v711_v41  ;;  %v5057_v55 = vsub.f32 %v4984_v29, %v678_v42 }
 0x287   :  { %v627_v58 = vrot.slane %v626_v46, 1  ;;  %v633_v59 = vrot.slane %v632_v47, 1  ;;  %v637_v60 = vrot.slane %v636_v48, 2  ;;  %v647_v0 = vrot.slane %v572_v53, 4 }
 0x288   :  { %v643_v1 = vrot.slane %v642_v52, 2  ;;  %v653_v2 = vrot.slane %v574_v32, 4  ;;  %745 = vadd.xlane.f32.xlu0 %v727_v54  ;;  %v710_v61 = vmul.f32 %v5057_v55, %v4982_v27  ;;  %v680_v3 = vmul.f32 0.015625, %v604_v15 }
 0x289   :  { %v628_v7 = vadd.f32 %v627_v58, %v626_v46  ;;  %v634_v8 = vadd.f32 %v633_v59, %v632_v47  ;;  %v638_v9 = vadd.f32 %v637_v60, %v636_v48  ;;  %v648_v10 = vadd.f32 %v647_v0, %v572_v53 }
 0x28a   :  { %v644_v11 = vadd.f32 %v643_v1, %v642_v52  ;;  %v654_v12 = vadd.f32 %v653_v2, %v574_v32  ;;  %v726_v13 = vmul.f32 %v710_v61, %v710_v61  ;;  %v576_v29 = vpop.xlane.xlu1 %575  ;;  %v578_v14 = vpop.xlane.xlu0 %577  ;;  %v5062_v16 = vsub.f32 %v4990_v34, %v680_v3 }
 0x28b   :  { %v639_v18 = vrot.slane %v638_v9, 1  ;;  %v649_v20 = vrot.slane %v648_v10, 2  ;;  %v659_v24 = vrot.slane %v576_v29, 4  ;;  %v665_v25 = vrot.slane %v578_v14, 4 }
 0x28c   :  { %v645_v28 = vrot.slane %v644_v11, 1  ;;  %v655_v26 = vrot.slane %v654_v12, 2  ;;  %743 = vadd.xlane.f32.xlu1 %v726_v13  ;;  %v712_v15 = vmul.f32 %v5062_v16, %v4982_v27  ;;  %v681_v31 = vmul.f32 0.015625, %v610_v21 }
 0x28d   :  { %v640_v33 = vadd.f32 %v639_v18, %v638_v9  ;;  %v650_v35 = vadd.f32 %v649_v20, %v648_v10  ;;  %v660_v36 = vadd.f32 %v659_v24, %v576_v29  ;;  %v666_v37 = vadd.f32 %v665_v25, %v578_v14 }
 0x28e   :  { %v646_v40 = vadd.f32 %v645_v28, %v644_v11  ;;  %v656_v41 = vadd.f32 %v655_v26, %v654_v12  ;;  %v728_v42 = vmul.f32 %v712_v15, %v712_v15  ;;  %v5067_v34 = vsub.f32 %v4998_v39, %v681_v31  ;;  %v580_v46 = vpop.xlane.xlu1 %579 }
 0x28f   :  { %v651_v47 = vrot.slane %v650_v35, 1  ;;  %v661_v48 = vrot.slane %v660_v36, 2  ;;  %v667_v52 = vrot.slane %v666_v37, 2  ;;  %v671_v53 = vrot.slane %v580_v46, 4 }
 0x290   :  { %v657_v32 = vrot.slane %v656_v41, 1  ;;  %747 = vadd.xlane.f32.xlu1 %v728_v42  ;;  %v713_v21 = vmul.f32 %v5067_v34, %v4982_v27  ;;  %v682_v54 = vmul.f32 0.015625, %v616_v43  ;;  %v683_v58 = vmul.f32 0.015625, %v622_v49 }
 0x291   :  { %v652_v59 = vadd.f32 %v651_v47, %v650_v35  ;;  %v662_v60 = vadd.f32 %v661_v48, %v660_v36  ;;  %v668_v0 = vadd.f32 %v667_v52, %v666_v37  ;;  %v672_v1 = vadd.f32 %v671_v53, %v580_v46 }
 0x292   :  { %v658_v2 = vadd.f32 %v657_v32, %v656_v41  ;;  %v729_v61 = vmul.f32 %v713_v21, %v713_v21  ;;  %v5072_v39 = vsub.f32 %v4996_v38, %v682_v54  ;;  %v5075_v3 = vsub.f32 %v5006_v45, %v683_v58 }
 0x293   :  { %v663_v9 = vrot.slane %v662_v60, 1  ;;  %v669_v10 = vrot.slane %v668_v0, 1  ;;  %v673_v11 = vrot.slane %v672_v1, 2  ;;  %v684_v12 = vmul.f32 0.015625, %v628_v7 }
 0x294   :  { %749 = vadd.xlane.f32.xlu0 %v729_v61  ;;  %v714_v43 = vmul.f32 %v5072_v39, %v4982_v27  ;;  %v715_v49 = vmul.f32 %v5075_v3, %v4982_v27  ;;  %v685_v13 = vmul.f32 0.015625, %v634_v8  ;;  %v686_v29 = vmul.f32 0.015625, %v640_v33 }
 0x295   :  { %v664_v14 = vadd.f32 %v663_v9, %v662_v60  ;;  %v670_v18 = vadd.f32 %v669_v10, %v668_v0  ;;  %v674_v38 = vadd.f32 %v673_v11, %v672_v1  ;;  %v5082_v20 = vsub.f32 %v5004_v44, %v684_v12  ;;  %v1184_v9 = vld [vmem:[%s4791_s8 + $0x58] sm:$0xff]  ;;  %v1183_v10 = vld [vmem:[%s4791_s8 + $0x50] sm:$0xff]  ;;  %v1182_v11 = vld [vmem:[%s4791_s8 + $0x48] sm:$0xff] }
 0x296   :  { %v730_v45 = vmul.f32 %v714_v43, %v714_v43  ;;  %v731_v24 = vmul.f32 %v715_v49, %v715_v49  ;;  %v5085_v25 = vsub.f32 %v5014_v51, %v685_v13  ;;  %v5088_v7 = vsub.f32 %v5012_v50, %v686_v29  ;;  %v1181_v12 = vld [vmem:[%s4791_s8 + $0x40] sm:$0xff]  ;;  %v1180_v43 = vld [vmem:[%s4791_s8 + $0x38] sm:$0xff]  ;;  %v1179_v49 = vld [vmem:[%s4791_s8 + $0x30] sm:$0xff] }
 0x297   :  { %v675_v28 = vrot.slane %v674_v38, 1  ;;  %v716_v26 = vmul.f32 %v5082_v20, %v4982_v27  ;;  %v687_v8 = vmul.f32 0.015625, %v646_v40  ;;  %v688_v15 = vmul.f32 0.015625, %v652_v59  ;;  %v1188_v59 = vld [vmem:[%s4791_s8 + $0x78] sm:$0xff]  ;;  %v1178_v13 = vld [vmem:[%s4791_s8 + $0x28] sm:$0xff]  ;;  %v1177_v29 = vld [vmem:[%s4791_s8 + $0x20] sm:$0xff] }
 0x298   :  { %751 = vadd.xlane.f32.xlu1 %v730_v45  ;;  %753 = vadd.xlane.f32.xlu0 %v731_v24  ;;  %v717_v44 = vmul.f32 %v5085_v25, %v4982_v27  ;;  %v718_v31 = vmul.f32 %v5088_v7, %v4982_v27  ;;  %v689_v33 = vmul.f32 0.015625, %v658_v2  ;;  %v690_v51 = vmul.f32 0.015625, %v664_v14  ;;  %v1186_v2 = vld [vmem:[%s4791_s8 + $0x68] sm:$0xff]  ;;  %v1176_v14 = vld [vmem:[%s4791_s8 + $0x18] sm:$0xff]  ;;  %v1173_v45 = vld [vmem:[%s4791_s8] sm:$0xff] }
 0x299   :  { %v676_v35 = vadd.f32 %v675_v28, %v674_v38  ;;  %v732_v36 = vmul.f32 %v716_v26, %v716_v26  ;;  %v5097_v50 = vsub.f32 %v5022_v57, %v687_v8  ;;  %v5100_v37 = vsub.f32 %v5020_v56, %v688_v15  ;;  %4196 = vmatprep.subr.mxu0 %v1188_v59  ;;  %v1174_v38 = vld [vmem:[%s4791_s8 + $0x8] sm:$0xff] }
 0x29a   :  { %v733_v40 = vmul.f32 %v717_v44, %v717_v44  ;;  %v5103_v41 = vsub.f32 %v5030_v63, %v689_v33  ;;  %v5110_v47 = vsub.f32 %v5028_v62, %v690_v51  ;;  %v691_v48 = vmul.f32 0.015625, %v670_v18  ;;  %4197 = vmatpush3.msra.mxu0 %v1188_v59  ;;  %v1175_v18 = vld [vmem:[%s4791_s8 + $0x10] sm:$0xff] }
 0x29b   :  { %v719_v42 = vmul.f32 %v5097_v50, %v4982_v27  ;;  %v720_v46 = vmul.f32 %v5100_v37, %v4982_v27  ;;  %v734_v56 = vmul.f32 %v718_v31, %v718_v31  ;;  %v692_v63 = vmul.f32 0.015625, %v676_v35 }
 0x29c   :  { %755 = vadd.xlane.f32.xlu1 %v732_v36  ;;  %757 = vadd.xlane.f32.xlu0 %v733_v40  ;;  %v721_v57 = vmul.f32 %v5103_v41, %v4982_v27  ;;  %v5115_v53 = vsub.f32 %v5038_v5, %v691_v48  ;;  %v722_v21 = vmul.f32 %v5110_v47, %v4982_v27  ;;  %v1187_v5 = vld [vmem:[%s4791_s8 + $0x70] sm:$0xff] }
 0x29d   :  { %v735_v52 = vmul.f32 %v719_v42, %v719_v42  ;;  %v736_v32 = vmul.f32 %v720_v46, %v720_v46  ;;  %v5122_v58 = vsub.f32 %v5036_v4, %v692_v63  ;;  %4198 = vmatprep.subr.mxu0 %v1187_v5  ;;  %v1185_v4 = vld [vmem:[%s4791_s8 + $0x60] sm:$0xff] }
 0x29e   :  { %v737_v62 = vmul.f32 %v721_v57, %v721_v57  ;;  %v723_v54 = vmul.f32 %v5115_v53, %v4982_v27  ;;  %v738_v60 = vmul.f32 %v722_v21, %v722_v21  ;;  %4199 = vmatpush3.msra.mxu0 %v1187_v5 }
 0x29f   :  { %v724_v1 = vmul.f32 %v5122_v58, %v4982_v27  ;;  %4200 = vmatprep.subr.mxu0 %v1186_v2 }
 0x2a0   :  { %759 = vadd.xlane.f32.xlu1 %v734_v56  ;;  %761 = vadd.xlane.f32.xlu0 %v735_v52  ;;  %v739_v0 = vmul.f32 %v723_v54, %v723_v54 }
 0x2a1   :  { %4201 = vmatpush3.msra.mxu0 %v1186_v2  ;;  %v740_v61 = vmul.f32 %v724_v1, %v724_v1 }
 0x2a2   :  { %4202 = vmatprep.subr.mxu0 %v1185_v4 }
 0x2a3   :  { %4203 = vmatpush3.msra.mxu0 %v1185_v4 }
 0x2a4   :  { %763 = vadd.xlane.f32.xlu1 %v736_v32  ;;  %765 = vadd.xlane.f32.xlu0 %v737_v62 }
 0x2a5   :  { %4204 = vmatprep.subr.mxu0 %v1184_v9 }
 0x2a6   :  { %4205 = vmatpush3.msra.mxu0 %v1184_v9 }
 0x2a7   :  { %4206 = vmatprep.subr.mxu0 %v1183_v10 }
 0x2a8   :  { %767 = vadd.xlane.f32.xlu1 %v738_v60  ;;  %769 = vadd.xlane.f32.xlu0 %v739_v0 }
 0x2a9   :  { %4207 = vmatpush3.msra.mxu0 %v1183_v10 }
 0x2aa   :  { %4208 = vmatprep.subr.mxu0 %v1182_v11 }
 0x2ab   :  { %4209 = vmatpush3.msra.mxu0 %v1182_v11 }
 0x2ac   :  { %771 = vadd.xlane.f32.xlu1 %v740_v61  ;;  %4210 = vmatprep.subr.mxu0 %v1181_v12 }
 0x2ad   :  { %4211 = vmatpush3.msra.mxu0 %v1181_v12 }
 0x2ae   :  { %4212 = vmatprep.subr.mxu0 %v1180_v43 }
 0x2af   :  { %4213 = vmatpush3.msra.mxu0 %v1180_v43 }
 0x2b0   :  { %4214 = vmatprep.subr.mxu0 %v1179_v49 }
 0x2b1   :  { %4215 = vmatpush3.msra.mxu0 %v1179_v49 }
 0x2b2   :  { %4216 = vmatprep.subr.mxu0 %v1178_v13 }
 0x2b3   :  { %4217 = vmatpush3.msra.mxu0 %v1178_v13 }
 0x2b4   :  { %4218 = vmatprep.subr.mxu0 %v1177_v29 }
 0x2b5   :  { %4219 = vmatpush3.msra.mxu0 %v1177_v29 }
 0x2b6   :  { %4220 = vmatprep.subr.mxu0 %v1176_v14 }
 0x2b7   :  { %4221 = vmatpush3.msra.mxu0 %v1176_v14 }
 0x2b8   :  { %4222 = vmatprep.subr.mxu0 %v1175_v18 }
 0x2b9   :  { %4223 = vmatpush3.msra.mxu0 %v1175_v18 }
 0x2ba   :  { %4224 = vmatprep.subr.mxu0 %v1174_v38 }
 0x2bb   :  { %4225 = vmatpush3.msra.mxu0 %v1174_v38 }
 0x2bc   :  { %4226 = vmatprep.subr.mxu0 %v1173_v45 }
 0x2bd   :  { %4227 = vmatpush3.msra.mxu0 %v1173_v45 }
 0x30d   :  { %v742_v24 = vpop.xlane.xlu0 %741 }
 0x30e   :  { %v773_v28 = vrot.slane %v742_v24, 4 }
 0x310   :  { %v774_v26 = vadd.f32 %v773_v28, %v742_v24 }
 0x311   :  { %v746_v8 = vpop.xlane.xlu0 %745 }
 0x312   :  { %v775_v15 = vrot.slane %v774_v26, 2  ;;  %v785_v44 = vrot.slane %v746_v8, 4 }
 0x314   :  { %v776_v31 = vadd.f32 %v775_v15, %v774_v26  ;;  %v786_v33 = vadd.f32 %v785_v44, %v746_v8 }
 0x315   :  { %v744_v51 = vpop.xlane.xlu1 %743 }
 0x316   :  { %v777_v35 = vrot.slane %v776_v31, 1  ;;  %v779_v36 = vrot.slane %v744_v51, 4  ;;  %v787_v40 = vrot.slane %v786_v33, 2 }
 0x318   :  { %v778_v42 = vadd.f32 %v777_v35, %v776_v31  ;;  %v780_v46 = vadd.f32 %v779_v36, %v744_v51  ;;  %v788_v48 = vadd.f32 %v787_v40, %v786_v33 }
 0x319   :  { %v748_v56 = vpop.xlane.xlu1 %747 }
 0x31a   :  { %v869_v57 = vmul.f32 0.015625, %v778_v42  ;;  %v781_v63 = vrot.slane %v780_v46, 2  ;;  %v789_v52 = vrot.slane %v788_v48, 1  ;;  %v791_v32 = vrot.slane %v748_v56, 4 }
 0x31c   :  { %v885_v21 = vadd.f32 1e-05, %v869_v57  ;;  %v782_v62 = vadd.f32 %v781_v63, %v780_v46  ;;  %v790_v54 = vadd.f32 %v789_v52, %v788_v48  ;;  %v792_v59 = vadd.f32 %v791_v32, %v748_v56 }
 0x31d   :  { %v750_v5 = vpop.xlane.xlu0 %749 }
 0x31e   :  { %4536 = vrsqrt.f32 %v885_v21  ;;  %v783_v60 = vrot.slane %v782_v62, 1  ;;  %v793_v0 = vrot.slane %v792_v59, 2  ;;  %v797_v1 = vrot.slane %v750_v5, 4 }
 0x31f   :  { %v871_v4 = vmul.f32 0.015625, %v790_v54 }
 0x320   :  { %v784_v2 = vadd.f32 %v783_v60, %v782_v62  ;;  %v794_v61 = vadd.f32 %v793_v0, %v792_v59  ;;  %v798_v9 = vadd.f32 %v797_v1, %v750_v5 }
 0x321   :  { %v752_v10 = vpop.xlane.xlu1 %751  ;;  %v754_v11 = vpop.xlane.xlu0 %753  ;;  %v887_v14 = vadd.f32 1e-05, %v871_v4 }
 0x322   :  { %v870_v12 = vmul.f32 0.015625, %v784_v2  ;;  %v795_v43 = vrot.slane %v794_v61, 1  ;;  %v803_v49 = vrot.slane %v752_v10, 4  ;;  %v799_v13 = vrot.slane %v798_v9, 2 }
 0x323   :  { %v809_v29 = vrot.slane %v754_v11, 4  ;;  %4538 = vrsqrt.f32 %v887_v14 }
 0x324   :  { %v796_v18 = vadd.f32 %v795_v43, %v794_v61  ;;  %v804_v38 = vadd.f32 %v803_v49, %v752_v10  ;;  %v886_v45 = vadd.f32 1e-05, %v870_v12  ;;  %v800_v24 = vadd.f32 %v799_v13, %v798_v9 }
 0x325   :  { %v810_v28 = vadd.f32 %v809_v29, %v754_v11  ;;  %v756_v26 = vpop.xlane.xlu1 %755  ;;  %v758_v8 = vpop.xlane.xlu0 %757 }
 0x326   :  { %v872_v15 = vmul.f32 0.015625, %v796_v18  ;;  %v805_v44 = vrot.slane %v804_v38, 2  ;;  %v815_v31 = vrot.slane %v756_v26, 4  ;;  %v801_v33 = vrot.slane %v800_v24, 1 }
 0x327   :  { %v811_v51 = vrot.slane %v810_v28, 2  ;;  %v821_v35 = vrot.slane %v758_v8, 4  ;;  %4540 = vrsqrt.f32 %v886_v45 }
 0x328   :  { %v888_v36 = vadd.f32 1e-05, %v872_v15  ;;  %v806_v40 = vadd.f32 %v805_v44, %v804_v38  ;;  %v816_v42 = vadd.f32 %v815_v31, %v756_v26  ;;  %v802_v46 = vadd.f32 %v801_v33, %v800_v24 }
 0x329   :  { %v812_v48 = vadd.f32 %v811_v51, %v810_v28  ;;  %v822_v56 = vadd.f32 %v821_v35, %v758_v8  ;;  %v760_v57 = vpop.xlane.xlu1 %759  ;;  %v762_v63 = vpop.xlane.xlu0 %761 }
 0x32a   :  { %4542 = vrsqrt.f32 %v888_v36  ;;  %v807_v52 = vrot.slane %v806_v40, 1  ;;  %v817_v32 = vrot.slane %v816_v42, 2  ;;  %v827_v21 = vrot.slane %v760_v57, 4 }
 0x32b   :  { %v4537_v62 = vpop.eup %4536  ;;  %v873_v54 = vmul.f32 0.015625, %v802_v46  ;;  %v813_v59 = vrot.slane %v812_v48, 1  ;;  %v823_v5 = vrot.slane %v822_v56, 2  ;;  %v833_v60 = vrot.slane %v762_v63, 4 }
 0x32c   :  { %v808_v0 = vadd.f32 %v807_v52, %v806_v40  ;;  %v818_v1 = vadd.f32 %v817_v32, %v816_v42  ;;  %v828_v2 = vadd.f32 %v827_v21, %v760_v57  ;;  %v917_v4 = vmul.f32 %v4537_v62, %v5047_v6 }
 0x32d   :  { %v889_v61 = vadd.f32 1e-05, %v873_v54  ;;  %v814_v9 = vadd.f32 %v813_v59, %v812_v48  ;;  %v824_v10 = vadd.f32 %v823_v5, %v822_v56  ;;  %v834_v11 = vadd.f32 %v833_v60, %v762_v63  ;;  %v764_v12 = vpop.xlane.xlu1 %763  ;;  %v766_v43 = vpop.xlane.xlu0 %765 }
 0x32e   :  { %v874_v49 = vmul.f32 0.015625, %v808_v0  ;;  %v819_v13 = vrot.slane %v818_v1, 1  ;;  %v829_v29 = vrot.slane %v828_v2, 2  ;;  %v839_v14 = vrot.slane %v764_v12, 4 }
 0x32f   :  { %4544 = vrsqrt.f32 %v889_v61  ;;  %v875_v18 = vmul.f32 0.015625, %v814_v9  ;;  %v825_v38 = vrot.slane %v824_v10, 1  ;;  %v835_v45 = vrot.slane %v834_v11, 2  ;;  %v3819_v61 = vld [vmem:[%s4781_s29] ss:$0 sm:$0xff] }
 0x330   :  { %v890_v24 = vadd.f32 1e-05, %v874_v49  ;;  %v820_v28 = vadd.f32 %v819_v13, %v818_v1  ;;  %v830_v26 = vadd.f32 %v829_v29, %v828_v2  ;;  %v840_v8 = vadd.f32 %v839_v14, %v764_v12  ;;  %v4539_v32 = vpop.eup %4538  ;;  %v3835_v14 = vld [vmem:[%s4786_s3] ss:$0 sm:$0xff] }
 0x331   :  { %v891_v15 = vadd.f32 1e-05, %v875_v18  ;;  %v826_v6 = vadd.f32 %v825_v38, %v824_v10  ;;  %v836_v44 = vadd.f32 %v835_v45, %v834_v11  ;;  %v845_v31 = vrot.slane %v766_v43, 4  ;;  %v768_v33 = vpop.xlane.xlu1 %767  ;;  %v770_v40 = vpop.xlane.xlu0 %769 }
 0x332   :  { %4546 = vrsqrt.f32 %v890_v24  ;;  %v876_v51 = vmul.f32 0.015625, %v820_v28  ;;  %v831_v35 = vrot.slane %v830_v26, 1  ;;  %v841_v36 = vrot.slane %v840_v8, 2 }
 0x333   :  { %4548 = vrsqrt.f32 %v891_v15  ;;  %v877_v42 = vmul.f32 0.015625, %v826_v6  ;;  %v837_v46 = vrot.slane %v836_v44, 1  ;;  %v846_v48 = vadd.f32 %v845_v31, %v766_v43  ;;  %v3820_v31 = vld [vmem:[%s4781_s29 + $0x1] ss:$0 sm:$0xff] }
 0x334   :  { %v892_v56 = vadd.f32 1e-05, %v876_v51  ;;  %v832_v57 = vadd.f32 %v831_v35, %v830_v26  ;;  %v842_v63 = vadd.f32 %v841_v36, %v840_v8  ;;  %v851_v52 = vrot.slane %v768_v33, 4  ;;  %v4541_v60 = vpop.eup %4540 }
 0x335   :  { %v893_v21 = vadd.f32 1e-05, %v877_v42  ;;  %v838_v62 = vadd.f32 %v837_v46, %v836_v44  ;;  %v847_v54 = vrot.slane %v846_v48, 2  ;;  %v857_v59 = vrot.slane %v770_v40, 4  ;;  %v772_v5 = vpop.xlane.xlu1 %771  ;;  %v3821_v42 = vld [vmem:[%s4781_s29 + $0x2] ss:$0 sm:$0xff] }
 0x336   :  { %4550 = vrsqrt.f32 %v892_v56  ;;  %v878_v0 = vmul.f32 0.015625, %v832_v57  ;;  %v843_v1 = vrot.slane %v842_v63, 1  ;;  %v852_v2 = vadd.f32 %v851_v52, %v768_v33  ;;  %v3836_v56 = vld [vmem:[%s4786_s3 + $0x1] ss:$0 sm:$0xff] }
 0x337   :  { %v4543_v9 = vpop.eup %4542  ;;  %4552 = vrsqrt.f32 %v893_v21  ;;  %v879_v10 = vmul.f32 0.015625, %v838_v62  ;;  %v848_v11 = vadd.f32 %v847_v54, %v846_v48  ;;  %v858_v12 = vadd.f32 %v857_v59, %v770_v40  ;;  %v3837_v62 = vld [vmem:[%s4786_s3 + $0x2] ss:$0 sm:$0xff]  ;;  %v3822_v54 = vld [vmem:[%s4781_s29 + $0x3] ss:$0 sm:$0xff] }
 0x338   :  { %v894_v43 = vadd.f32 1e-05, %v878_v0  ;;  %v844_v49 = vadd.f32 %v843_v1, %v842_v63  ;;  %v853_v13 = vrot.slane %v852_v2, 2  ;;  %v863_v29 = vrot.slane %v772_v5, 4  ;;  %v3823_v1 = vld [vmem:[%s4781_s29 + $0x4] ss:$0 sm:$0xff] }
 0x339   :  { %v895_v18 = vadd.f32 1e-05, %v879_v10  ;;  %v849_v38 = vrot.slane %v848_v11, 1  ;;  %v859_v45 = vrot.slane %v858_v12, 2  ;;  %v1029_v24 = vmul.f32 %v3819_v61, %v917_v4  ;;  %v3838_v10 = vld [vmem:[%s4786_s3 + $0x3] ss:$0 sm:$0xff] }
 0x33a   :  { %4554 = vrsqrt.f32 %v894_v43  ;;  %v880_v28 = vmul.f32 0.015625, %v844_v49  ;;  %v854_v26 = vadd.f32 %v853_v13, %v852_v2  ;;  %v864_v8 = vadd.f32 %v863_v29, %v772_v5  ;;  %v3839_v13 = vld [vmem:[%s4786_s3 + $0x4] ss:$0 sm:$0xff] }
 0x33b   :  { %4556 = vrsqrt.f32 %v895_v18  ;;  %v850_v15 = vadd.f32 %v849_v38, %v848_v11  ;;  %v860_v6 = vadd.f32 %v859_v45, %v858_v12  ;;  %v1141_v44 = vadd.f32 %v3835_v14, %v1029_v24 }
 0x33c   :  { %v4545_v33 = vpop.eup %4544  ;;  %v896_v51 = vadd.f32 1e-05, %v880_v28  ;;  %v855_v35 = vrot.slane %v854_v26, 1  ;;  %v865_v36 = vrot.slane %v864_v8, 2  ;;  %v918_v40 = vmul.f32 %v4541_v60, %v5057_v55 }
 0x33d   :  { %v881_v4 = vmul.f32 0.015625, %v850_v15  ;;  %v861_v46 = vrot.slane %v860_v6, 1  ;;  %v1157_v48 = vmax.f32 %v1141_v44, 0.0  ;;  %v919_v57 = vmul.f32 %v4539_v32, %v5052_v30  ;;  %v3840_v44 = vld [vmem:[%s4786_s3 + $0x5] ss:$0 sm:$0xff] }
 0x33e   :  { %4558 = vrsqrt.f32 %v896_v51  ;;  %v856_v63 = vadd.f32 %v855_v35, %v854_v26  ;;  %v866_v52 = vadd.f32 %v865_v36, %v864_v8  ;;  %v1030_v21 = vmul.f32 %v3820_v31, %v918_v40  ;;  %v3825_v26 = vld [vmem:[%s4781_s29 + $0x6] ss:$0 sm:$0xff]  ;;  %v3827_v40 = vld [vmem:[%s4781_s29 + $0x8] ss:$0 sm:$0xff] }
 0x33f   :  { %v4547_v59 = vpop.eup %4546  ;;  %v897_v5 = vadd.f32 1e-05, %v881_v4  ;;  %v862_v0 = vadd.f32 %v861_v46, %v860_v6  ;;  %4228 = vmatprep.mubr.f32.mxu0 %v1157_v48  ;;  %v1031_v55 = vmul.f32 %v3821_v42, %v919_v57  ;;  %v920_v60 = vmul.f32 %v4543_v9, %v5062_v16  ;;  %v3824_v9 = vld [vmem:[%s4781_s29 + $0x5] ss:$0 sm:$0xff]  ;;  %v3841_v36 = vld [vmem:[%s4786_s3 + $0x6] ss:$0 sm:$0xff] }
 0x340   :  { %v4549_v2 = vpop.eup %4548  ;;  %v882_v61 = vmul.f32 0.015625, %v856_v63  ;;  %v867_v30 = vrot.slane %v866_v52, 1  ;;  %v1142_v32 = vadd.f32 %v3836_v56, %v1030_v21  ;;  %v921_v11 = vmul.f32 %v4545_v33, %v5067_v34  ;;  %v3826_v33 = vld [vmem:[%s4781_s29 + $0x7] ss:$0 sm:$0xff]  ;;  %v3828_v21 = vld [vmem:[%s4781_s29 + $0x9] ss:$0 sm:$0xff] }
 0x341   :  { %4560 = vrsqrt.f32 %v897_v5  ;;  %v883_v12 = vmul.f32 0.015625, %v862_v0  ;;  %v1143_v43 = vadd.f32 %v3837_v62, %v1031_v55  ;;  %v1032_v49 = vmul.f32 %v3822_v54, %v920_v60  ;;  %v3842_v48 = vld [vmem:[%s4786_s3 + $0x7] ss:$0 sm:$0xff]  ;;  %v3829_v5 = vld [vmem:[%s4781_s29 + $0xa] ss:$0 sm:$0xff] }
 0x342   :  { %v898_v29 = vadd.f32 1e-05, %v882_v61  ;;  %v868_v14 = vadd.f32 %v867_v30, %v866_v52  ;;  %v1158_v18 = vmax.f32 %v1142_v32, 0.0  ;;  %v1033_v16 = vmul.f32 %v3823_v1, %v921_v11  ;;  %v3843_v52 = vld [vmem:[%s4786_s3 + $0x8] ss:$0 sm:$0xff] }
 0x343   :  { %v4551_v38 = vpop.eup %4550  ;;  %v899_v45 = vadd.f32 1e-05, %v883_v12  ;;  %v1159_v24 = vmax.f32 %v1143_v43, 0.0  ;;  %v1144_v28 = vadd.f32 %v3838_v10, %v1032_v49  ;;  %v922_v34 = vmul.f32 %v4547_v59, %v5072_v39  ;;  %v3845_v30 = vld [vmem:[%s4786_s3 + $0xa] ss:$0 sm:$0xff] }
 0x344   :  { %v4553_v8 = vpop.eup %4552  ;;  %4562 = vrsqrt.f32 %v898_v29  ;;  %v884_v15 = vmul.f32 0.015625, %v868_v14  ;;  %4229 = vmatmul.mubr.f32.vlgmr.msra.gmra.mxu0 %v1158_v18  ;;  %v1145_v6 = vadd.f32 %v3839_v13, %v1033_v16  ;;  %v923_v31 = vmul.f32 %v4549_v2, %v5075_v3  ;;  %v3830_v11 = vld [vmem:[%s4781_s29 + $0xb] ss:$0 sm:$0xff]  ;;  %v3831_v18 = vld [vmem:[%s4781_s29 + $0xc] ss:$0 sm:$0xff] }
 0x345   :  { %4564 = vrsqrt.f32 %v899_v45  ;;  %4231 = vmatprep.mubr.f32.mxu0 %v1159_v24  ;;  %v1160_v51 = vmax.f32 %v1144_v28, 0.0  ;;  %v1034_v35 = vmul.f32 %v3824_v9, %v922_v34  ;;  %v924_v39 = vmul.f32 %v4551_v38, %v5082_v20  ;;  %v3846_v29 = vld [vmem:[%s4786_s3 + $0xb] ss:$0 sm:$0xff]  ;;  %v3847_v45 = vld [vmem:[%s4786_s3 + $0xc] ss:$0 sm:$0xff] }
 0x346   :  { %v900_v42 = vadd.f32 1e-05, %v884_v15  ;;  %v1161_v4 = vmax.f32 %v1145_v6, 0.0  ;;  %v1035_v46 = vmul.f32 %v3825_v26, %v923_v31  ;;  %v925_v56 = vmul.f32 %v4553_v8, %v5085_v25  ;;  %v3844_v25 = vld [vmem:[%s4786_s3 + $0x9] ss:$0 sm:$0xff] }
 0x347   :  { %v4555_v3 = vpop.eup %4554  ;;  %v1146_v57 = vadd.f32 %v3840_v44, %v1034_v35  ;;  %v1036_v63 = vmul.f32 %v3826_v33, %v924_v39  ;;  %v3832_v34 = vld [vmem:[%s4781_s29 + $0xd] ss:$0 sm:$0xff]  ;;  %v3833_v15 = vld [vmem:[%s4781_s29 + $0xe] ss:$0 sm:$0xff] }
 0x348   :  { %v4557_v62 = vpop.eup %4556  ;;  %4566 = vrsqrt.f32 %v900_v42  ;;  %4232 = vmatmul.mubr.f32.gmra.mxu0 %v1160_v51  ;;  %v1147_v20 = vadd.f32 %v3841_v36, %v1035_v46  ;;  %v1037_v54 = vmul.f32 %v3827_v40, %v925_v56  ;;  %v926_v59 = vmul.f32 %v4555_v3, %v5088_v7  ;;  %v3848_v44 = vld [vmem:[%s4786_s3 + $0xd] ss:$0 sm:$0xff]  ;;  %v3849_v51 = vld [vmem:[%s4786_s3 + $0xe] ss:$0 sm:$0xff]  ;;  %v3834_v40 = vld [vmem:[%s4781_s29 + $0xf] ss:$0 sm:$0xff] }
 0x349   :  { %4234 = vmatprep.mubr.f32.mxu0 %v1161_v4  ;;  %v1162_v0 = vmax.f32 %v1146_v57, 0.0  ;;  %v1148_v55 = vadd.f32 %v3842_v48, %v1036_v63  ;;  %v927_v60 = vmul.f32 %v4557_v62, %v5097_v50  ;;  %v3850_v46 = vld [vmem:[%s4786_s3 + $0xf] ss:$0 sm:$0xff]  ;;  %v3851_v63 = vld [vmem:[%s4796_s14] ss:$0 sm:$0xff] }
 0x34a   :  { %v1163_v1 = vmax.f32 %v1147_v20, 0.0  ;;  %v1149_v2 = vadd.f32 %v3843_v52, %v1037_v54  ;;  %v1038_v61 = vmul.f32 %v3828_v21, %v926_v59 }
 0x34b   :  { %v4559_v32 = vpop.eup %4558  ;;  %v1039_v10 = vmul.f32 %v3829_v5, %v927_v60  ;;  %v1164_v12 = vmax.f32 %v1148_v55, 0.0 }
 0x34c   :  { %4235 = vmatmul.mubr.f32.gmra.mxu0 %v1162_v0  ;;  %v1150_v7 = vadd.f32 %v3844_v25, %v1038_v61  ;;  %v928_v43 = vmul.f32 %v4559_v32, %v5100_v37  ;;  %v1165_v49 = vmax.f32 %v1149_v2, 0.0 }
 0x34d   :  { %4237 = vmatprep.mubr.f32.mxu0 %v1163_v1  ;;  %v1151_v13 = vadd.f32 %v3845_v30, %v1039_v10 }
 0x34e   :  { %v4561_v50 = vpop.eup %4560  ;;  %v1040_v14 = vmul.f32 %v3830_v11, %v928_v43  ;;  %v1166_v9 = vmax.f32 %v1150_v7, 0.0 }
 0x34f   :  { %v929_v16 = vmul.f32 %v4561_v50, %v5103_v41  ;;  %v1167_v37 = vmax.f32 %v1151_v13, 0.0 }
 0x350   :  { %4238 = vmatmul.mubr.f32.gmra.mxu0 %v1164_v12  ;;  %v1152_v38 = vadd.f32 %v3846_v29, %v1040_v14 }
 0x351   :  { %v4563_v24 = vpop.eup %4562  ;;  %4240 = vmatprep.mubr.f32.mxu0 %v1165_v49  ;;  %v1041_v28 = vmul.f32 %v3831_v18, %v929_v16 }
 0x352   :  { %v4565_v26 = vpop.eup %4564  ;;  %v930_v8 = vmul.f32 %v4563_v24, %v5110_v47  ;;  %v1168_v31 = vmax.f32 %v1152_v38, 0.0 }
 0x353   :  { %v1153_v6 = vadd.f32 %v3847_v45, %v1041_v28  ;;  %v931_v41 = vmul.f32 %v4565_v26, %v5115_v53 }
 0x354   :  { %4241 = vmatmul.mubr.f32.gmra.mxu0 %v1166_v9  ;;  %v1042_v33 = vmul.f32 %v3832_v34, %v930_v8 }
 0x355   :  { %v4567_v35 = vpop.eup %4566  ;;  %4243 = vmatprep.mubr.f32.mxu0 %v1167_v37  ;;  %v1169_v36 = vmax.f32 %v1153_v6, 0.0  ;;  %v1043_v39 = vmul.f32 %v3833_v15, %v931_v41 }
 0x356   :  { %v1154_v42 = vadd.f32 %v3848_v44, %v1042_v33  ;;  %v932_v4 = vmul.f32 %v4567_v35, %v5122_v58 }
 0x357   :  { %v1155_v47 = vadd.f32 %v3849_v51, %v1043_v39 }
 0x358   :  { %4244 = vmatmul.mubr.f32.gmra.mxu0 %v1168_v31  ;;  %v1170_v48 = vmax.f32 %v1154_v42, 0.0  ;;  %v1044_v56 = vmul.f32 %v3834_v40, %v932_v4 }
 0x359   :  { %4246 = vmatprep.mubr.f32.mxu0 %v1169_v36  ;;  %v1171_v53 = vmax.f32 %v1155_v47, 0.0 }
 0x35a   :  { %v1156_v3 = vadd.f32 %v3850_v46, %v1044_v56 }
 0x35c   :  { %4247 = vmatmul.mubr.f32.gmra.mxu0 %v1170_v48  ;;  %v1172_v57 = vmax.f32 %v1156_v3, 0.0 }
 0x35d   :  { %4249 = vmatprep.mubr.f32.mxu0 %v1171_v53 }
 0x360   :  { %4250 = vmatmul.mubr.f32.gmra.mxu0 %v1172_v57 }
 0x361   :  { %2324 = vmatprep.mubr.f32.mxu0 %v6725_v17 }
 0x404   :  { %v4230_v52 = vpop.f32.mrf.mxu0 }
 0x405   :  { %v5192_v21 = vadd.f32 %v4230_v52, %v3851_v63 }
 0x406   :  { %v1262_v62 = vpop.f32.mrf.mxu0 }
 0x407   :  { %v5194_v58 = vadd.f32 %v3851_v63, %v1262_v62  ;;  %v1374_v20 = vmul.f32 %v5192_v21, %v4982_v27 }
 0x408   :  { %v4233_v54 = vpop.f32.mrf.mxu0 }
 0x409   :  { %v5198_v59 = vadd.f32 %v4233_v54, %v3851_v63  ;;  %1391 = vadd.xlane.f32.xlu1 %v1374_v20  ;;  %v1373_v5 = vmul.f32 %v5194_v58, %v4982_v27 }
 0x40a   :  { %v1272_v0 = vpop.f32.mrf.mxu0 }
 0x40b   :  { %v5202_v55 = vadd.f32 %v3851_v63, %v1272_v0  ;;  %1389 = vadd.xlane.f32.xlu0 %v1373_v5  ;;  %v1376_v25 = vmul.f32 %v5198_v59, %v4982_v27 }
 0x40c   :  { %v4236_v60 = vpop.f32.mrf.mxu0 }
 0x40d   :  { %v5206_v1 = vadd.f32 %v4236_v60, %v3851_v63  ;;  %1395 = vadd.xlane.f32.xlu1 %v1376_v25  ;;  %v1375_v2 = vmul.f32 %v5202_v55, %v4982_v27 }
 0x40e   :  { %v1282_v61 = vpop.f32.mrf.mxu0 }
 0x40f   :  { %v5210_v30 = vadd.f32 %v3851_v63, %v1282_v61  ;;  %1393 = vadd.xlane.f32.xlu0 %v1375_v2  ;;  %v1378_v32 = vmul.f32 %v5206_v1, %v4982_v27 }
 0x410   :  { %v4239_v10 = vpop.f32.mrf.mxu0 }
 0x411   :  { %v5214_v11 = vadd.f32 %v4239_v10, %v3851_v63  ;;  %1399 = vadd.xlane.f32.xlu1 %v1378_v32  ;;  %v1377_v12 = vmul.f32 %v5210_v30, %v4982_v27 }
 0x412   :  { %v1292_v7 = vpop.f32.mrf.mxu0 }
 0x413   :  { %v5218_v43 = vadd.f32 %v3851_v63, %v1292_v7  ;;  %1397 = vadd.xlane.f32.xlu0 %v1377_v12  ;;  %v1380_v49 = vmul.f32 %v5214_v11, %v4982_v27 }
 0x414   :  { %v4242_v13 = vpop.f32.mrf.mxu0 }
 0x415   :  { %v5222_v29 = vadd.f32 %v4242_v13, %v3851_v63  ;;  %1403 = vadd.xlane.f32.xlu1 %v1380_v49  ;;  %v1379_v50 = vmul.f32 %v5218_v43, %v4982_v27 }
 0x416   :  { %v1302_v14 = vpop.f32.mrf.mxu0 }
 0x417   :  { %v5226_v18 = vadd.f32 %v3851_v63, %v1302_v14  ;;  %1401 = vadd.xlane.f32.xlu0 %v1379_v50  ;;  %v1382_v16 = vmul.f32 %v5222_v29, %v4982_v27 }
 0x418   :  { %v4245_v9 = vpop.f32.mrf.mxu0 }
 0x419   :  { %v5230_v38 = vadd.f32 %v4245_v9, %v3851_v63  ;;  %1407 = vadd.xlane.f32.xlu1 %v1382_v16  ;;  %v1381_v45 = vmul.f32 %v5226_v18, %v4982_v27 }
 0x41a   :  { %v1312_v24 = vpop.f32.mrf.mxu0 }
 0x41b   :  { %v5234_v37 = vadd.f32 %v3851_v63, %v1312_v24  ;;  %1405 = vadd.xlane.f32.xlu0 %v1381_v45  ;;  %v1384_v28 = vmul.f32 %v5230_v38, %v4982_v27 }
 0x41c   :  { %v4248_v34 = vpop.f32.mrf.mxu0 }
 0x41d   :  { %v5238_v26 = vadd.f32 %v4248_v34, %v3851_v63  ;;  %1411 = vadd.xlane.f32.xlu1 %v1384_v28  ;;  %v1383_v8 = vmul.f32 %v5234_v37, %v4982_v27 }
 0x41e   :  { %v1322_v15 = vpop.f32.mrf.mxu0 }
 0x41f   :  { %v5242_v6 = vadd.f32 %v3851_v63, %v1322_v15  ;;  %1409 = vadd.xlane.f32.xlu0 %v1383_v8  ;;  %v1386_v44 = vmul.f32 %v5238_v26, %v4982_v27 }
 0x420   :  { %v4251_v41 = vpop.f32.mrf.mxu0 }
 0x421   :  { %v5246_v31 = vadd.f32 %v4251_v41, %v3851_v63  ;;  %1415 = vadd.xlane.f32.xlu1 %v1386_v44  ;;  %v1385_v33 = vmul.f32 %v5242_v6, %v4982_v27 }
 0x422   :  { %v1332_v51 = vpop.f32.mrf.mxu0 }
 0x423   :  { %v5250_v35 = vadd.f32 %v3851_v63, %v1332_v51  ;;  %1413 = vadd.xlane.f32.xlu0 %v1385_v33  ;;  %v1388_v36 = vmul.f32 %v5246_v31, %v4982_v27 }
 0x425   :  { %1419 = vadd.xlane.f32.xlu1 %v1388_v36  ;;  %v1387_v39 = vmul.f32 %v5250_v35, %v4982_v27 }
 0x427   :  { %1417 = vadd.xlane.f32.xlu0 %v1387_v39 }
 0x492   :  { %v1392_v40 = vpop.xlane.xlu1 %1391 }
 0x493   :  { %v1427_v42 = vrot.slane %v1392_v40, 4 }
 0x494   :  { %v1390_v4 = vpop.xlane.xlu0 %1389 }
 0x495   :  { %v1428_v47 = vadd.f32 %v1427_v42, %v1392_v40  ;;  %v1421_v46 = vrot.slane %v1390_v4, 4 }
 0x496   :  { %v1396_v48 = vpop.xlane.xlu1 %1395 }
 0x497   :  { %v1429_v56 = vrot.slane %v1428_v47, 2  ;;  %v1422_v53 = vadd.f32 %v1421_v46, %v1390_v4  ;;  %v1439_v3 = vrot.slane %v1396_v48, 4 }
 0x498   :  { %v1394_v57 = vpop.xlane.xlu0 %1393 }
 0x499   :  { %v1430_v63 = vadd.f32 %v1429_v56, %v1428_v47  ;;  %v1423_v52 = vrot.slane %v1422_v53, 2  ;;  %v1440_v62 = vadd.f32 %v1439_v3, %v1396_v48  ;;  %v1433_v20 = vrot.slane %v1394_v57, 4 }
 0x49a   :  { %v1400_v54 = vpop.xlane.xlu1 %1399 }
 0x49b   :  { %v1431_v5 = vrot.slane %v1430_v63, 1  ;;  %v1424_v0 = vadd.f32 %v1423_v52, %v1422_v53  ;;  %v1441_v25 = vrot.slane %v1440_v62, 2  ;;  %v1434_v60 = vadd.f32 %v1433_v20, %v1394_v57 }
 0x49c   :  { %v1451_v2 = vrot.slane %v1400_v54, 4  ;;  %v1398_v61 = vpop.xlane.xlu0 %1397 }
 0x49d   :  { %v1432_v32 = vadd.f32 %v1431_v5, %v1430_v63  ;;  %v1425_v10 = vrot.slane %v1424_v0, 1  ;;  %v1442_v12 = vadd.f32 %v1441_v25, %v1440_v62  ;;  %v1435_v7 = vrot.slane %v1434_v60, 2 }
 0x49e   :  { %v1452_v49 = vadd.f32 %v1451_v2, %v1400_v54  ;;  %v1445_v13 = vrot.slane %v1398_v61, 4  ;;  %v1404_v50 = vpop.xlane.xlu1 %1403 }
 0x49f   :  { %v1426_v14 = vadd.f32 %v1425_v10, %v1424_v0  ;;  %v1443_v16 = vrot.slane %v1442_v12, 1  ;;  %v1436_v9 = vadd.f32 %v1435_v7, %v1434_v60  ;;  %v1463_v45 = vrot.slane %v1404_v50, 4 }
 0x4a0   :  { %v1453_v24 = vrot.slane %v1452_v49, 2  ;;  %v1446_v28 = vadd.f32 %v1445_v13, %v1398_v61  ;;  %v1402_v34 = vpop.xlane.xlu0 %1401  ;;  %v1518_v8 = vmul.f32 0.015625, %v1432_v32 }
 0x4a1   :  { %v1444_v15 = vadd.f32 %v1443_v16, %v1442_v12  ;;  %v1437_v44 = vrot.slane %v1436_v9, 1  ;;  %v1464_v41 = vadd.f32 %v1463_v45, %v1404_v50  ;;  %v1457_v33 = vrot.slane %v1402_v34, 4 }
 0x4a2   :  { %v1454_v51 = vadd.f32 %v1453_v24, %v1452_v49  ;;  %v1447_v36 = vrot.slane %v1446_v28, 2  ;;  %v1408_v39 = vpop.xlane.xlu1 %1407  ;;  %v5257_v40 = vsub.f32 %v5192_v21, %v1518_v8  ;;  %v1517_v42 = vmul.f32 0.015625, %v1426_v14 }
 0x4a3   :  { %v1438_v4 = vadd.f32 %v1437_v44, %v1436_v9  ;;  %v1465_v47 = vrot.slane %v1464_v41, 2  ;;  %v1458_v46 = vadd.f32 %v1457_v33, %v1402_v34  ;;  %v1475_v48 = vrot.slane %v1408_v39, 4 }
 0x4a4   :  { %v1455_v56 = vrot.slane %v1454_v51, 1  ;;  %v1448_v53 = vadd.f32 %v1447_v36, %v1446_v28  ;;  %v1406_v3 = vpop.xlane.xlu0 %1405  ;;  %v1550_v57 = vmul.f32 %v5257_v40, %v4982_v27  ;;  %v5262_v63 = vsub.f32 %v5194_v58, %v1517_v42 }
 0x4a5   :  { %v1466_v52 = vadd.f32 %v1465_v47, %v1464_v41  ;;  %v1459_v62 = vrot.slane %v1458_v46, 2  ;;  %v1476_v20 = vadd.f32 %v1475_v48, %v1408_v39  ;;  %v1469_v54 = vrot.slane %v1406_v3, 4 }
 0x4a6   :  { %v1456_v21 = vadd.f32 %v1455_v56, %v1454_v51  ;;  %v1449_v5 = vrot.slane %v1448_v53, 1  ;;  %v1412_v0 = vpop.xlane.xlu1 %1411  ;;  %v1566_v25 = vmul.f32 %v1550_v57, %v1550_v57  ;;  %v1549_v60 = vmul.f32 %v5262_v63, %v4982_v27 }
 0x4a7   :  { %v1467_v2 = vrot.slane %v1466_v52, 1  ;;  %v1460_v61 = vadd.f32 %v1459_v62, %v1458_v46  ;;  %v1477_v32 = vrot.slane %v1476_v20, 2  ;;  %v1470_v10 = vadd.f32 %v1469_v54, %v1406_v3 }
 0x4a8   :  { %v1450_v12 = vadd.f32 %v1449_v5, %v1448_v53  ;;  %v1487_v7 = vrot.slane %v1412_v0, 4  ;;  %1583 = vadd.xlane.f32.xlu1 %v1566_v25  ;;  %v1410_v58 = vpop.xlane.xlu0 %1409  ;;  %v1565_v49 = vmul.f32 %v1549_v60, %v1549_v60  ;;  %v1520_v13 = vmul.f32 0.015625, %v1444_v15 }
 0x4a9   :  { %v1468_v50 = vadd.f32 %v1467_v2, %v1466_v52  ;;  %v1461_v14 = vrot.slane %v1460_v61, 1  ;;  %v1478_v16 = vadd.f32 %v1477_v32, %v1476_v20  ;;  %v1471_v9 = vrot.slane %v1470_v10, 2 }
 0x4aa   :  { %v1488_v45 = vadd.f32 %v1487_v7, %v1412_v0  ;;  %v1481_v24 = vrot.slane %v1410_v58, 4  ;;  %1581 = vadd.xlane.f32.xlu0 %v1565_v49  ;;  %v1416_v28 = vpop.xlane.xlu1 %1415  ;;  %v5267_v34 = vsub.f32 %v5198_v59, %v1520_v13  ;;  %v1519_v8 = vmul.f32 0.015625, %v1438_v4 }
 0x4ab   :  { %v1462_v44 = vadd.f32 %v1461_v14, %v1460_v61  ;;  %v1479_v41 = vrot.slane %v1478_v16, 1  ;;  %v1472_v33 = vadd.f32 %v1471_v9, %v1470_v10  ;;  %v1499_v51 = vrot.slane %v1416_v28, 4 }
 0x4ac   :  { %v1489_v36 = vrot.slane %v1488_v45, 2  ;;  %v1482_v39 = vadd.f32 %v1481_v24, %v1410_v58  ;;  %v1552_v15 = vmul.f32 %v5267_v34, %v4982_v27  ;;  %v1414_v42 = vpop.xlane.xlu0 %1413  ;;  %v5272_v47 = vsub.f32 %v5202_v55, %v1519_v8 }
 0x4ad   :  { %v1480_v46 = vadd.f32 %v1479_v41, %v1478_v16  ;;  %v1473_v48 = vrot.slane %v1472_v33, 1  ;;  %v1500_v56 = vadd.f32 %v1499_v51, %v1416_v28  ;;  %v1493_v53 = vrot.slane %v1414_v42, 4 }
 0x4ae   :  { %v1490_v59 = vadd.f32 %v1489_v36, %v1488_v45  ;;  %v1483_v3 = vrot.slane %v1482_v39, 2  ;;  %v1568_v4 = vmul.f32 %v1552_v15, %v1552_v15  ;;  %v1551_v57 = vmul.f32 %v5272_v47, %v4982_v27  ;;  %v1420_v52 = vpop.xlane.xlu1 %1419 }
 0x4af   :  { %v1474_v62 = vadd.f32 %v1473_v48, %v1472_v33  ;;  %v1501_v20 = vrot.slane %v1500_v56, 2  ;;  %v1494_v54 = vadd.f32 %v1493_v53, %v1414_v42  ;;  %v1511_v5 = vrot.slane %v1420_v52, 4 }
 0x4b0   :  { %v1491_v0 = vrot.slane %v1490_v59, 1  ;;  %v1484_v25 = vadd.f32 %v1483_v3, %v1482_v39  ;;  %1587 = vadd.xlane.f32.xlu1 %v1568_v4  ;;  %v1567_v55 = vmul.f32 %v1551_v57, %v1551_v57  ;;  %v1522_v60 = vmul.f32 0.015625, %v1456_v21  ;;  %v1418_v2 = vpop.xlane.xlu0 %1417 }
 0x4b1   :  { %v1502_v61 = vadd.f32 %v1501_v20, %v1500_v56  ;;  %v1495_v32 = vrot.slane %v1494_v54, 2  ;;  %v1512_v10 = vadd.f32 %v1511_v5, %v1420_v52  ;;  %v1505_v7 = vrot.slane %v1418_v2, 4 }
 0x4b2   :  { %v1492_v58 = vadd.f32 %v1491_v0, %v1490_v59  ;;  %v1485_v49 = vrot.slane %v1484_v25, 1  ;;  %1585 = vadd.xlane.f32.xlu0 %v1567_v55  ;;  %v5277_v13 = vsub.f32 %v5206_v1, %v1522_v60  ;;  %v1521_v14 = vmul.f32 0.015625, %v1450_v12 }
 0x4b3   :  { %v1503_v16 = vrot.slane %v1502_v61, 1  ;;  %v1496_v9 = vadd.f32 %v1495_v32, %v1494_v54  ;;  %v1513_v45 = vrot.slane %v1512_v10, 2  ;;  %v1506_v24 = vadd.f32 %v1505_v7, %v1418_v2 }
 0x4b4   :  { %v1486_v28 = vadd.f32 %v1485_v49, %v1484_v25  ;;  %v1554_v21 = vmul.f32 %v5277_v13, %v4982_v27  ;;  %v5282_v8 = vsub.f32 %v5210_v30, %v1521_v14  ;;  %v1524_v41 = vmul.f32 0.015625, %v1468_v50 }
 0x4b5   :  { %v1504_v33 = vadd.f32 %v1503_v16, %v1502_v61  ;;  %v1497_v51 = vrot.slane %v1496_v9, 1  ;;  %v1514_v36 = vadd.f32 %v1513_v45, %v1512_v10  ;;  %v1507_v39 = vrot.slane %v1506_v24, 2  ;;  %v2074_v16 = vld [vmem:[%s4811_s30 + $0x1e8] sm:$0xff] }
 0x4b6   :  { %v1570_v15 = vmul.f32 %v1554_v21, %v1554_v21  ;;  %v1553_v1 = vmul.f32 %v5282_v8, %v4982_v27  ;;  %v5287_v12 = vsub.f32 %v5214_v11, %v1524_v41  ;;  %v1523_v42 = vmul.f32 0.015625, %v1462_v44  ;;  %2099 = vmatprep.subr.mxu1 %v2074_v16  ;;  %v2038_v16 = vld [vmem:[%s4811_s30 + $0xc8] sm:$0xff] }
 0x4b7   :  { %v1498_v48 = vadd.f32 %v1497_v51, %v1496_v9  ;;  %v1515_v56 = vrot.slane %v1514_v36, 1  ;;  %v1508_v53 = vadd.f32 %v1507_v39, %v1506_v24  ;;  %v1526_v59 = vmul.f32 0.015625, %v1480_v46  ;;  %v5334_v24 = vld [vmem:[%s4811_s30 + $0x1f8] sm:$0xff]  ;;  %v2069_v51 = vld [vmem:[%s4811_s30 + $0x1c0] sm:$0xff] }
 0x4b8   :  { %1591 = vadd.xlane.f32.xlu1 %v1570_v15  ;;  %v1569_v30 = vmul.f32 %v1553_v1, %v1553_v1  ;;  %v1556_v50 = vmul.f32 %v5287_v12, %v4982_v27  ;;  %v5292_v3 = vsub.f32 %v5218_v43, %v1523_v42  ;;  %v1525_v4 = vmul.f32 0.015625, %v1474_v62  ;;  %2260 = vmatprep.subr.mxu0 %v5334_v24  ;;  %v2066_v1 = vld [vmem:[%s4811_s30 + $0x1a8] sm:$0xff]  ;;  %v5356_v42 = vld [vmem:[%s4811_s30 + $0x1b8] sm:$0xff] }
 0x4b9   :  { %v1516_v57 = vadd.f32 %v1515_v56, %v1514_v36  ;;  %v1509_v52 = vrot.slane %v1508_v53, 1  ;;  %v5295_v20 = vsub.f32 %v5222_v29, %v1526_v59  ;;  %v1528_v11 = vmul.f32 0.015625, %v1492_v58  ;;  %v5350_v36 = vld [vmem:[%s4811_s30 + $0x1d0] sm:$0xff] }
 0x4ba   :  { %1589 = vadd.xlane.f32.xlu0 %v1569_v30  ;;  %v1572_v44 = vmul.f32 %v1556_v50, %v1556_v50  ;;  %v1555_v46 = vmul.f32 %v5292_v3, %v4982_v27  ;;  %v5300_v54 = vsub.f32 %v5226_v18, %v1525_v4  ;;  %v1527_v5 = vmul.f32 0.015625, %v1486_v28  ;;  %v2073_v28 = vld [vmem:[%s4811_s30 + $0x1e0] sm:$0xff]  ;;  %v5363_v59 = vld [vmem:[%s4811_s30 + $0x1b0] sm:$0xff]  ;;  %v5368_v30 = vld [vmem:[%s4811_s30 + $0x198] sm:$0xff] }
 0x4bb   :  { %v1510_v0 = vadd.f32 %v1509_v52, %v1508_v53  ;;  %v1558_v43 = vmul.f32 %v5295_v20, %v4982_v27  ;;  %v5305_v62 = vsub.f32 %v5230_v38, %v1528_v11  ;;  %v1530_v25 = vmul.f32 0.015625, %v1504_v33  ;;  %2100 = vmatpush1.msra.mxu1 %v2073_v28  ;;  %v2070_v33 = vld [vmem:[%s4811_s30 + $0x1c8] sm:$0xff]  ;;  %v2057_v52 = vld [vmem:[%s4811_s30 + $0x160] sm:$0xff]  ;;  %v5378_v11 = vld [vmem:[%s4811_s30 + $0x178] sm:$0xff] }
 0x4bc   :  { %1595 = vadd.xlane.f32.xlu1 %v1572_v44  ;;  %v1571_v29 = vmul.f32 %v1555_v46, %v1555_v46  ;;  %v1557_v55 = vmul.f32 %v5300_v54, %v4982_v27  ;;  %v5310_v60 = vsub.f32 %v5234_v37, %v1527_v5  ;;  %v1529_v18 = vmul.f32 0.015625, %v1498_v48  ;;  %2101 = vmatprep.subr.mxu1 %v2070_v33  ;;  %v2065_v48 = vld [vmem:[%s4811_s30 + $0x1a0] sm:$0xff]  ;;  %v2062_v53 = vld [vmem:[%s4811_s30 + $0x188] sm:$0xff]  ;;  %v5383_v46 = vld [vmem:[%s4811_s30 + $0x170] sm:$0xff] }
 0x4bd   :  { %6773 = vst [vmem:[#allocation25_spill] sm:$0xff] %v5305_v62  ;;  %v1574_v2 = vmul.f32 %v1558_v43, %v1558_v43  ;;  %v1560_v61 = vmul.f32 %v5305_v62, %v4982_v27  ;;  %v5315_v32 = vsub.f32 %v5238_v26, %v1530_v25  ;;  %v1532_v38 = vmul.f32 0.015625, %v1516_v57  ;;  %2102 = vmatpush1.msra.mxu1 %v2069_v51  ;;  %v2058_v4 = vld [vmem:[%s4811_s30 + $0x168] sm:$0xff]  ;;  %v5372_v57 = vld [vmem:[%s4811_s30 + $0x190] sm:$0xff]  ;;  %v2053_v5 = vld [vmem:[%s4811_s30 + $0x140] sm:$0xff] }
 0x4be   :  { %1593 = vadd.xlane.f32.xlu0 %v1571_v29  ;;  %v1573_v10 = vmul.f32 %v1557_v55, %v1557_v55  ;;  %v1559_v7 = vmul.f32 %v5310_v60, %v4982_v27  ;;  %v5320_v37 = vsub.f32 %v5242_v6, %v1529_v18  ;;  %v1531_v58 = vmul.f32 0.015625, %v1510_v0  ;;  %2103 = vmatprep.subr.mxu1 %v2066_v1  ;;  %v2054_v44 = vld [vmem:[%s4811_s30 + $0x148] sm:$0xff]  ;;  %v5387_v0 = vld [vmem:[%s4811_s30 + $0x158] sm:$0xff]  ;;  %v5392_v25 = vld [vmem:[%s4811_s30 + $0x150] sm:$0xff] }
 0x4bf   :  { %6774 = vst [vmem:[#allocation26_spill] sm:$0xff] %v5315_v32  ;;  %v1576_v49 = vmul.f32 %v1560_v61, %v1560_v61  ;;  %v1562_v14 = vmul.f32 %v5315_v32, %v4982_v27  ;;  %v5325_v26 = vsub.f32 %v5246_v31, %v1532_v38  ;;  %v5339_v31 = vld [vmem:[%s4811_s30 + $0x1f0] sm:$0xff]  ;;  %2104 = vmatpush1.msra.mxu1 %v2065_v48  ;;  %v2050_v43 = vld [vmem:[%s4811_s30 + $0x128] sm:$0xff]  ;;  %v2049_v29 = vld [vmem:[%s4811_s30 + $0x120] sm:$0xff] }
 0x4c0   :  { %6775 = vst [vmem:[#allocation27_spill] sm:$0xff] %v5320_v37  ;;  %1599 = vadd.xlane.f32.xlu1 %v1574_v2  ;;  %v1575_v9 = vmul.f32 %v1559_v7, %v1559_v7  ;;  %v1561_v45 = vmul.f32 %v5320_v37, %v4982_v27  ;;  %v5331_v6 = vsub.f32 %v5250_v35, %v1531_v58  ;;  %v5345_v35 = vld [vmem:[%s4811_s30 + $0x1d8] sm:$0xff]  ;;  %v2046_v18 = vld [vmem:[%s4811_s30 + $0x108] sm:$0xff]  ;;  %v5402_v2 = vld [vmem:[%s4811_s30 + $0x130] sm:$0xff] }
 0x4c1   :  { %6776 = vst [vmem:[#allocation28_spill] sm:$0xff] %v5325_v26  ;;  %v1578_v21 = vmul.f32 %v1562_v14, %v1562_v14  ;;  %v1564_v41 = vmul.f32 %v5325_v26, %v4982_v27  ;;  %2261 = vmatpush1.msra.mxu0 %v5339_v31  ;;  %2105 = vmatprep.subr.mxu1 %v2062_v53  ;;  %v5397_v55 = vld [vmem:[%s4811_s30 + $0x138] sm:$0xff]  ;;  %v2045_v61 = vld [vmem:[%s4811_s30 + $0x100] sm:$0xff]  ;;  %v5412_v7 = vld [vmem:[%s4811_s30 + $0x110] sm:$0xff] }
 0x4c2   :  { %1597 = vadd.xlane.f32.xlu0 %v1573_v10  ;;  %6777 = vst [vmem:[#allocation29_spill] sm:$0xff] %v5331_v6  ;;  %v1577_v39 = vmul.f32 %v1561_v45, %v1561_v45  ;;  %v1563_v15 = vmul.f32 %v5331_v6, %v4982_v27  ;;  %2262 = vmatprep.subr.mxu0 %v5345_v35  ;;  %v2061_v27 = vld [vmem:[%s4811_s30 + $0x180] sm:$0xff]  ;;  %v5407_v38 = vld [vmem:[%s4811_s30 + $0x118] sm:$0xff]  ;;  %v2042_v10 = vld [vmem:[%s4811_s30 + $0xe8] sm:$0xff] }
 0x4c3   :  { %v1580_v56 = vmul.f32 %v1564_v41, %v1564_v41  ;;  %2263 = vmatpush1.msra.mxu0 %v5350_v36  ;;  %2106 = vmatpush1.msra.mxu1 %v2061_v27  ;;  %v5416_v58 = vld [vmem:[%s4811_s30 + $0xf8] sm:$0xff]  ;;  %v5421_v14 = vld [vmem:[%s4811_s30 + $0xf0] sm:$0xff]  ;;  %v2037_v45 = vld [vmem:[%s4811_s30 + $0xc0] sm:$0xff] }
 0x4c4   :  { %1603 = vadd.xlane.f32.xlu1 %v1576_v49  ;;  %2264 = vmatprep.subr.mxu0 %v5356_v42  ;;  %v1579_v50 = vmul.f32 %v1563_v15, %v1563_v15  ;;  %v2041_v49 = vld [vmem:[%s4811_s30 + $0xe0] sm:$0xff]  ;;  %v5431_v28 = vld [vmem:[%s4811_s30 + $0xd0] sm:$0xff]  ;;  %v5436_v41 = vld [vmem:[%s4811_s30 + $0xb8] sm:$0xff] }
 0x4c5   :  { %2265 = vmatpush1.msra.mxu0 %v5363_v59  ;;  %2107 = vmatprep.subr.mxu1 %v2058_v4  ;;  %6779 = vst [vmem:[#allocation31_spill] sm:$0xff] %v5431_v28  ;;  %6780 = vst [vmem:[#allocation32_spill] sm:$0xff] %v5436_v41  ;;  %v2033_v33 = vld [vmem:[%s4811_s30 + $0xa0] sm:$0xff]  ;;  %v5441_v51 = vld [vmem:[%s4811_s30 + $0xb0] sm:$0xff] }
 0x4c6   :  { %1601 = vadd.xlane.f32.xlu0 %v1575_v9  ;;  %2266 = vmatprep.subr.mxu0 %v5368_v30  ;;  %v5426_v9 = vld [vmem:[%s4811_s30 + $0xd8] sm:$0xff]  ;;  %6781 = vst [vmem:[#allocation33_spill] sm:$0xff] %v5441_v51  ;;  %v2029_v1 = vld [vmem:[%s4811_s30 + $0x80] sm:$0xff]  ;;  %v5451_v48 = vld [vmem:[%s4811_s30 + $0x90] sm:$0xff] }
 0x4c7   :  { %2267 = vmatpush1.msra.mxu0 %v5372_v57  ;;  %2108 = vmatpush1.msra.mxu1 %v2057_v52  ;;  %6778 = vst [vmem:[#allocation30_spill] sm:$0xff] %v5426_v9  ;;  %v5446_v15 = vld [vmem:[%s4811_s30 + $0x98] sm:$0xff]  ;;  %6783 = vst [vmem:[#allocation35_spill] sm:$0xff] %v5451_v48  ;;  %v2025_v27 = vld [vmem:[%s4811_s30 + $0x60] sm:$0xff] }
 0x4c8   :  { %1607 = vadd.xlane.f32.xlu1 %v1578_v21  ;;  %2268 = vmatprep.subr.mxu0 %v5378_v11  ;;  %v2034_v21 = vld [vmem:[%s4811_s30 + $0xa8] sm:$0xff]  ;;  %6782 = vst [vmem:[#allocation34_spill] sm:$0xff] %v5446_v15  ;;  %v5456_v53 = vld [vmem:[%s4811_s30 + $0x78] sm:$0xff] }
 0x4c9   :  { %2109 = vmatprep.subr.mxu1 %v2054_v44  ;;  %2269 = vmatpush1.msra.mxu0 %v5383_v46  ;;  %6784 = vst [vmem:[#allocation36_spill] sm:$0xff] %v5456_v53  ;;  %v2022_v4 = vld [vmem:[%s4811_s30 + $0x48] sm:$0xff]  ;;  %v5466_v52 = vld [vmem:[%s4811_s30 + $0x58] sm:$0xff]  ;;  %v2021_v44 = vld [vmem:[%s4811_s30 + $0x40] sm:$0xff] }
 0x4ca   :  { %1605 = vadd.xlane.f32.xlu0 %v1577_v39  ;;  %2110 = vmatpush1.msra.mxu1 %v2053_v5  ;;  %v2030_v39 = vld [vmem:[%s4811_s30 + $0x88] sm:$0xff]  ;;  %6786 = vst [vmem:[#allocation38_spill] sm:$0xff] %v5466_v52  ;;  %v5471_v5 = vld [vmem:[%s4811_s30 + $0x50] sm:$0xff] }
 0x4cb   :  { %2270 = vmatprep.subr.mxu0 %v5387_v0  ;;  %2111 = vmatprep.subr.mxu1 %v2050_v43  ;;  %6787 = vst [vmem:[#allocation39_spill] sm:$0xff] %v5471_v5  ;;  %v2018_v43 = vld [vmem:[%s4811_s30 + $0x28] sm:$0xff] }
 0x4cc   :  { %1611 = vadd.xlane.f32.xlu1 %v1580_v56  ;;  %2271 = vmatpush1.msra.mxu0 %v5392_v25  ;;  %v2026_v56 = vld [vmem:[%s4811_s30 + $0x68] sm:$0xff] }
 0x4cd   :  { %2112 = vmatpush1.msra.mxu1 %v2049_v29  ;;  %2272 = vmatprep.subr.mxu0 %v5397_v55  ;;  %v5476_v29 = vld [vmem:[%s4811_s30 + $0x38] sm:$0xff] }
 0x4ce   :  { %1609 = vadd.xlane.f32.xlu0 %v1579_v50  ;;  %2113 = vmatprep.subr.mxu1 %v2046_v18  ;;  %v5461_v50 = vld [vmem:[%s4811_s30 + $0x70] sm:$0xff]  ;;  %6788 = vst [vmem:[#allocation40_spill] sm:$0xff] %v5476_v29  ;;  %v2017_v18 = vld [vmem:[%s4811_s30 + $0x20] sm:$0xff] }
 0x4cf   :  { %2273 = vmatpush1.msra.mxu0 %v5402_v2  ;;  %2114 = vmatpush1.msra.mxu1 %v2045_v61  ;;  %6785 = vst [vmem:[#allocation37_spill] sm:$0xff] %v5461_v50  ;;  %v5481_v61 = vld [vmem:[%s4811_s30 + $0x30] sm:$0xff] }
 0x4d0   :  { %2274 = vmatprep.subr.mxu0 %v5407_v38  ;;  %2115 = vmatprep.subr.mxu1 %v2042_v10  ;;  %6789 = vst [vmem:[#allocation41_spill] sm:$0xff] %v5481_v61  ;;  %v2014_v10 = vld [vmem:[%s4811_s30 + $0x8] sm:$0xff] }
 0x4d1   :  { %2275 = vmatpush1.msra.mxu0 %v5412_v7  ;;  %2116 = vmatpush1.msra.mxu1 %v2041_v49  ;;  %v5486_v49 = vld [vmem:[%s4811_s30 + $0x18] sm:$0xff] }
 0x4d2   :  { %2276 = vmatprep.subr.mxu0 %v5416_v58  ;;  %2117 = vmatprep.subr.mxu1 %v2038_v16  ;;  %6790 = vst [vmem:[#allocation42_spill] sm:$0xff] %v5486_v49  ;;  %v2013_v16 = vld [vmem:[%s4811_s30] sm:$0xff] }
 0x4d3   :  { %2277 = vmatpush1.msra.mxu0 %v5421_v14  ;;  %2118 = vmatpush1.msra.mxu1 %v2037_v45  ;;  %v5491_v45 = vld [vmem:[%s4811_s30 + $0x10] sm:$0xff] }
 0x4d4   :  { %2278 = vmatprep.subr.mxu0 %v5426_v9  ;;  %2119 = vmatprep.subr.mxu1 %v2034_v21  ;;  %6791 = vst [vmem:[#allocation43_spill] sm:$0xff] %v5491_v45 }
 0x4d5   :  { %2279 = vmatpush1.msra.mxu0 %v5431_v28  ;;  %2120 = vmatpush1.msra.mxu1 %v2033_v33 }
 0x4d6   :  { %2280 = vmatprep.subr.mxu0 %v5436_v41  ;;  %2121 = vmatprep.subr.mxu1 %v2030_v39 }
 0x4d7   :  { %2281 = vmatpush1.msra.mxu0 %v5441_v51  ;;  %2122 = vmatpush1.msra.mxu1 %v2029_v1 }
 0x4d8   :  { %2282 = vmatprep.subr.mxu0 %v5446_v15  ;;  %2123 = vmatprep.subr.mxu1 %v2026_v56 }
 0x4d9   :  { %2283 = vmatpush1.msra.mxu0 %v5451_v48  ;;  %2124 = vmatpush1.msra.mxu1 %v2025_v27 }
 0x4da   :  { %2284 = vmatprep.subr.mxu0 %v5456_v53  ;;  %2125 = vmatprep.subr.mxu1 %v2022_v4 }
 0x4db   :  { %2285 = vmatpush1.msra.mxu0 %v5461_v50  ;;  %2126 = vmatpush1.msra.mxu1 %v2021_v44 }
 0x4dc   :  { %2286 = vmatprep.subr.mxu0 %v5466_v52  ;;  %2127 = vmatprep.subr.mxu1 %v2018_v43 }
 0x4dd   :  { %2287 = vmatpush1.msra.mxu0 %v5471_v5  ;;  %2128 = vmatpush1.msra.mxu1 %v2017_v18 }
 0x4de   :  { %2288 = vmatprep.subr.mxu0 %v5476_v29  ;;  %2129 = vmatprep.subr.mxu1 %v2014_v10 }
 0x4df   :  { %2289 = vmatpush1.msra.mxu0 %v5481_v61  ;;  %2130 = vmatpush1.msra.mxu1 %v2013_v16 }
 0x4e0   :  { %2290 = vmatprep.subr.mxu0 %v5486_v49  ;;  %4427 = vmatprep.subr.mxu1 %v5334_v24 }
 0x4e1   :  { %2291 = vmatpush1.msra.mxu0 %v5491_v45 }
 0x531   :  { %v1584_v21 = vpop.xlane.xlu1 %1583 }
 0x532   :  { %v1619_v33 = vrot.slane %v1584_v21, 4 }
 0x533   :  { %v1582_v39 = vpop.xlane.xlu0 %1581 }
 0x534   :  { %v1620_v1 = vadd.f32 %v1619_v33, %v1584_v21  ;;  %v1613_v56 = vrot.slane %v1582_v39, 4 }
 0x536   :  { %v1621_v27 = vrot.slane %v1620_v1, 2  ;;  %v1614_v4 = vadd.f32 %v1613_v56, %v1582_v39 }
 0x538   :  { %v1615_v44 = vrot.slane %v1614_v4, 2  ;;  %v1622_v43 = vadd.f32 %v1621_v27, %v1620_v1 }
 0x539   :  { %v1588_v18 = vpop.xlane.xlu1 %1587 }
 0x53a   :  { %v1616_v10 = vadd.f32 %v1615_v44, %v1614_v4  ;;  %v1631_v17 = vrot.slane %v1588_v18, 4  ;;  %v1623_v19 = vrot.slane %v1622_v43, 1 }
 0x53b   :  { %v1586_v22 = vpop.xlane.xlu0 %1585 }
 0x53c   :  { %v1632_v16 = vadd.f32 %v1631_v17, %v1588_v18  ;;  %v1625_v23 = vrot.slane %v1586_v22, 4  ;;  %v1617_v49 = vrot.slane %v1616_v10, 1  ;;  %v1624_v5 = vadd.f32 %v1623_v19, %v1622_v43 }
 0x53e   :  { %v1633_v24 = vrot.slane %v1632_v16, 2  ;;  %v1626_v61 = vadd.f32 %v1625_v23, %v1586_v22  ;;  %v1618_v26 = vadd.f32 %v1617_v49, %v1616_v10  ;;  %v1710_v4 = vmul.f32 0.015625, %v1624_v5 }
 0x540   :  { %v1634_v45 = vadd.f32 %v1633_v24, %v1632_v16  ;;  %v1627_v29 = vrot.slane %v1626_v61, 2  ;;  %v1709_v44 = vmul.f32 0.015625, %v1618_v26  ;;  %v1726_v24 = vadd.f32 1e-05, %v1710_v4 }
 0x541   :  { %v1592_v21 = vpop.xlane.xlu1 %1591 }
 0x542   :  { %v1635_v33 = vrot.slane %v1634_v45, 1  ;;  %v1628_v52 = vadd.f32 %v1627_v29, %v1626_v61  ;;  %v1643_v39 = vrot.slane %v1592_v21, 4  ;;  %v1725_v43 = vadd.f32 1e-05, %v1709_v44 }
 0x543   :  { %v1590_v56 = vpop.xlane.xlu0 %1589 }
 0x544   :  { %v1629_v1 = vrot.slane %v1628_v52, 1  ;;  %v1637_v27 = vrot.slane %v1590_v56, 4  ;;  %v1644_v50 = vadd.f32 %v1643_v39, %v1592_v21  ;;  %v1636_v18 = vadd.f32 %v1635_v33, %v1634_v45 }
 0x545   :  { %v1596_v17 = vpop.xlane.xlu1 %1595  ;;  %4568 = vrsqrt.f32 %v1725_v43 }
 0x546   :  { %v1630_v53 = vadd.f32 %v1629_v1, %v1628_v52  ;;  %v1638_v6 = vadd.f32 %v1637_v27, %v1590_v56  ;;  %v1655_v48 = vrot.slane %v1596_v17, 4  ;;  %v1645_v22 = vrot.slane %v1644_v50, 2 }
 0x547   :  { %v1594_v23 = vpop.xlane.xlu0 %1593  ;;  %v1712_v15 = vmul.f32 0.015625, %v1636_v18  ;;  %4570 = vrsqrt.f32 %v1726_v24 }
 0x548   :  { %v1711_v16 = vmul.f32 0.015625, %v1630_v53  ;;  %v1639_v19 = vrot.slane %v1638_v6, 2  ;;  %v1656_v49 = vadd.f32 %v1655_v48, %v1596_v17  ;;  %v1646_v10 = vadd.f32 %v1645_v22, %v1644_v50 }
 0x549   :  { %v1649_v29 = vrot.slane %v1594_v23, 4  ;;  %v1600_v61 = vpop.xlane.xlu1 %1599  ;;  %v1728_v50 = vadd.f32 1e-05, %v1712_v15 }
 0x54a   :  { %v1640_v32 = vadd.f32 %v1639_v19, %v1638_v6  ;;  %v1657_v5 = vrot.slane %v1656_v49, 2  ;;  %v1727_v26 = vadd.f32 1e-05, %v1711_v16  ;;  %v1647_v21 = vrot.slane %v1646_v10, 1 }
 0x54b   :  { %v1650_v39 = vadd.f32 %v1649_v29, %v1594_v23  ;;  %v1667_v45 = vrot.slane %v1600_v61, 4  ;;  %v1598_v52 = vpop.xlane.xlu0 %1597 }
 0x54c   :  { %v1641_v33 = vrot.slane %v1640_v32, 1  ;;  %v1658_v56 = vadd.f32 %v1657_v5, %v1656_v49  ;;  %v1661_v1 = vrot.slane %v1598_v52, 4  ;;  %4572 = vrsqrt.f32 %v1727_v26 }
 0x54d   :  { %v1651_v53 = vrot.slane %v1650_v39, 2  ;;  %v1668_v27 = vadd.f32 %v1667_v45, %v1600_v61  ;;  %v1604_v48 = vpop.xlane.xlu1 %1603  ;;  %v1648_v4 = vadd.f32 %v1647_v21, %v1646_v10  ;;  %4574 = vrsqrt.f32 %v1728_v50 }
 0x54e   :  { %v1642_v44 = vadd.f32 %v1641_v33, %v1640_v32  ;;  %v1662_v17 = vadd.f32 %v1661_v1, %v1598_v52  ;;  %v1659_v16 = vrot.slane %v1658_v56, 1  ;;  %v1679_v19 = vrot.slane %v1604_v48, 4 }
 0x54f   :  { %v1652_v6 = vadd.f32 %v1651_v53, %v1650_v39  ;;  %v1602_v18 = vpop.xlane.xlu0 %1601  ;;  %v1669_v51 = vrot.slane %v1668_v27, 2  ;;  %v1714_v5 = vmul.f32 0.015625, %v1648_v4 }
 0x550   :  { %v1713_v22 = vmul.f32 0.015625, %v1642_v44  ;;  %v1663_v23 = vrot.slane %v1662_v17, 2  ;;  %v1673_v49 = vrot.slane %v1602_v18, 4  ;;  %v1660_v32 = vadd.f32 %v1659_v16, %v1658_v56 }
 0x551   :  { %v1653_v29 = vrot.slane %v1652_v6, 1  ;;  %v1680_v52 = vadd.f32 %v1679_v19, %v1604_v48  ;;  %v1670_v26 = vadd.f32 %v1669_v51, %v1668_v27  ;;  %v1608_v39 = vpop.xlane.xlu1 %1607  ;;  %v1730_v1 = vadd.f32 1e-05, %v1714_v5  ;;  %v3852_v19 = vld [vmem:[%s4801_s19] ss:$0 sm:$0xff] }
 0x552   :  { %v1664_v43 = vadd.f32 %v1663_v23, %v1662_v17  ;;  %v1729_v61 = vadd.f32 1e-05, %v1713_v22  ;;  %v1674_v24 = vadd.f32 %v1673_v49, %v1602_v18  ;;  %v1716_v44 = vmul.f32 0.015625, %v1660_v32 }
 0x553   :  { %v1654_v45 = vadd.f32 %v1653_v29, %v1652_v6  ;;  %v1606_v15 = vpop.xlane.xlu0 %1605  ;;  %v1681_v41 = vrot.slane %v1680_v52, 2  ;;  %v1671_v50 = vrot.slane %v1670_v26, 1  ;;  %v1691_v4 = vrot.slane %v1608_v39, 4  ;;  %v4569_v6 = vpop.eup %4568 }
 0x554   :  { %v1665_v10 = vrot.slane %v1664_v43, 1  ;;  %v1675_v21 = vrot.slane %v1674_v24, 2  ;;  %v1685_v33 = vrot.slane %v1606_v15, 4  ;;  %4576 = vrsqrt.f32 %v1729_v61  ;;  %v4571_v56 = vpop.eup %4570  ;;  %v3853_v61 = vld [vmem:[%s4801_s19 + $0x1] ss:$0 sm:$0xff] }
 0x555   :  { %v1715_v53 = vmul.f32 0.015625, %v1654_v45  ;;  %4578 = vrsqrt.f32 %v1730_v1  ;;  %v1732_v16 = vadd.f32 1e-05, %v1716_v44  ;;  %v1682_v23 = vadd.f32 %v1681_v41, %v1680_v52  ;;  %v3869_v52 = vld [vmem:[%s4806_s24 + $0x1] ss:$0 sm:$0xff] }
 0x556   :  { %v1666_v17 = vadd.f32 %v1665_v10, %v1664_v43  ;;  %v1676_v18 = vadd.f32 %v1675_v21, %v1674_v24  ;;  %v1686_v22 = vadd.f32 %v1685_v33, %v1606_v15  ;;  %v1672_v29 = vadd.f32 %v1671_v50, %v1670_v26  ;;  %v1612_v15 = vpop.xlane.xlu1 %1611  ;;  %v3868_v10 = vld [vmem:[%s4806_s24] ss:$0 sm:$0xff] }
 0x557   :  { %v1731_v51 = vadd.f32 1e-05, %v1715_v53  ;;  %v1610_v27 = vpop.xlane.xlu0 %1609  ;;  %v1692_v5 = vadd.f32 %v1691_v4, %v1608_v39  ;;  %v1757_v43 = vmul.f32 %v4569_v6, %v5262_v63  ;;  %v1758_v21 = vmul.f32 %v4571_v56, %v5257_v40  ;;  %v3854_v39 = vld [vmem:[%s4801_s19 + $0x2] ss:$0 sm:$0xff] }
 0x558   :  { %v1717_v49 = vmul.f32 0.015625, %v1666_v17  ;;  %v1677_v45 = vrot.slane %v1676_v18, 1  ;;  %v1687_v24 = vrot.slane %v1686_v22, 2  ;;  %v1697_v32 = vrot.slane %v1610_v27, 4 }
 0x559   :  { %v4573_v48 = vpop.eup %4572  ;;  %4580 = vrsqrt.f32 %v1731_v51  ;;  %v1869_v1 = vmul.f32 %v3852_v19, %v1757_v43  ;;  %v1683_v41 = vrot.slane %v1682_v23, 1  ;;  %v1870_v26 = vmul.f32 %v3853_v61, %v1758_v21  ;;  %v3870_v61 = vld [vmem:[%s4806_s24 + $0x2] ss:$0 sm:$0xff]  ;;  %v3855_v21 = vld [vmem:[%s4801_s19 + $0x3] ss:$0 sm:$0xff] }
 0x55a   :  { %v4575_v33 = vpop.eup %4574  ;;  %4582 = vrsqrt.f32 %v1732_v16  ;;  %v1759_v63 = vmul.f32 %v4573_v48, %v5272_v47  ;;  %v1718_v53 = vmul.f32 0.015625, %v1672_v29  ;;  %v1693_v44 = vrot.slane %v1692_v5, 2 }
 0x55b   :  { %v1703_v50 = vrot.slane %v1612_v15, 4  ;;  %v1981_v17 = vadd.f32 %v3868_v10, %v1869_v1  ;;  %v1733_v4 = vadd.f32 1e-05, %v1717_v49  ;;  %v1678_v6 = vadd.f32 %v1677_v45, %v1676_v18  ;;  %v3871_v45 = vld [vmem:[%s4806_s24 + $0x3] ss:$0 sm:$0xff] }
 0x55c   :  { %v1688_v37 = vadd.f32 %v1687_v24, %v1686_v22  ;;  %v1698_v40 = vadd.f32 %v1697_v32, %v1610_v27  ;;  %v1982_v51 = vadd.f32 %v3869_v52, %v1870_v26  ;;  %v1871_v19 = vmul.f32 %v3854_v39, %v1759_v63  ;;  %v3856_v24 = vld [vmem:[%s4801_s19 + $0x4] ss:$0 sm:$0xff]  ;;  %v3857_v52 = vld [vmem:[%s4801_s19 + $0x5] ss:$0 sm:$0xff] }
 0x55d   :  { %v1997_v56 = vmax.f32 %v1981_v17, 0.0  ;;  %v1760_v16 = vmul.f32 %v4575_v33, %v5267_v34  ;;  %v1734_v28 = vadd.f32 1e-05, %v1718_v53  ;;  %v1684_v9 = vadd.f32 %v1683_v41, %v1682_v23  ;;  %v3872_v41 = vld [vmem:[%s4806_s24 + $0x4] ss:$0 sm:$0xff] }
 0x55e   :  { %v1694_v62 = vadd.f32 %v1693_v44, %v1692_v5  ;;  %v1704_v47 = vadd.f32 %v1703_v50, %v1612_v15  ;;  %4584 = vrsqrt.f32 %v1733_v4  ;;  %v1719_v18 = vmul.f32 0.015625, %v1678_v6  ;;  %v3873_v50 = vld [vmem:[%s4806_s24 + $0x5] ss:$0 sm:$0xff]  ;;  %v3858_v17 = vld [vmem:[%s4801_s19 + $0x6] ss:$0 sm:$0xff] }
 0x55f   :  { %2164 = vmatmul.mubr.f32.vlgmr.msra.gmra.mxu1 %v1997_v56  ;;  %2325 = vmatmul.mubr.f32.vlgmr.msra.gmra.mxu0 %v1997_v56  ;;  %v1689_v22 = vrot.slane %v1688_v37, 1  ;;  %v1699_v27 = vrot.slane %v1698_v40, 2  ;;  %v6792_v48 = vmov 0.0   ;;  %v1998_v34 = vmax.f32 %v1982_v51, 0.0 }
 0x560   :  { %4443 = vmatpush1.msra.mxu1 %v5339_v31  ;;  %2169 = vmatprep.mubr.f32.mxu1 %v6792_v48  ;;  %v1983_v23 = vadd.f32 %v3870_v61, %v1871_v19  ;;  %v1872_v29 = vmul.f32 %v3855_v21, %v1760_v16  ;;  %4586 = vrsqrt.f32 %v1734_v28  ;;  %v1720_v15 = vmul.f32 0.015625, %v1684_v9  ;;  %v3874_v19 = vld [vmem:[%s4806_s24 + $0x6] ss:$0 sm:$0xff]  ;;  %v3859_v16 = vld [vmem:[%s4801_s19 + $0x7] ss:$0 sm:$0xff] }
 0x561   :  { %v4577_v43 = vpop.eup %4576  ;;  %4428 = vmatprep.subr.mxu1 %v5345_v35  ;;  %2330 = vmatprep.mubr.f32.mxu0 %v6792_v48  ;;  %v1705_v32 = vrot.slane %v1704_v47, 2  ;;  %v1735_v31 = vadd.f32 1e-05, %v1719_v18  ;;  %v1695_v35 = vrot.slane %v1694_v62, 1  ;;  %v1690_v10 = vadd.f32 %v1689_v22, %v1688_v37  ;;  %v3875_v22 = vld [vmem:[%s4806_s24 + $0x7] ss:$0 sm:$0xff] }
 0x562   :  { %v1761_v49 = vmul.f32 %v4577_v43, %v5282_v8  ;;  %v4579_v5 = vpop.eup %4578  ;;  %4444 = vmatpush1.msra.mxu1 %v5350_v36  ;;  %v1700_v33 = vadd.f32 %v1699_v27, %v1698_v40  ;;  %v1999_v8 = vmax.f32 %v1983_v23, 0.0  ;;  %v1984_v36 = vadd.f32 %v3871_v45, %v1872_v29  ;;  %v3860_v27 = vld [vmem:[%s4801_s19 + $0x8] ss:$0 sm:$0xff]  ;;  %v3861_v45 = vld [vmem:[%s4801_s19 + $0x9] ss:$0 sm:$0xff] }
 0x563   :  { %2170 = vmatmul.mubr.f32.gmra.mxu1 %v1998_v34  ;;  %2331 = vmatmul.mubr.f32.gmra.mxu0 %v1998_v34  ;;  %v1762_v28 = vmul.f32 %v4579_v5, %v5277_v13  ;;  %v1736_v26 = vadd.f32 1e-05, %v1720_v15  ;;  %v1706_v39 = vadd.f32 %v1705_v32, %v1704_v47  ;;  %4588 = vrsqrt.f32 %v1735_v31  ;;  %v3876_v5 = vld [vmem:[%s4806_s24 + $0x8] ss:$0 sm:$0xff]  ;;  %v3877_v31 = vld [vmem:[%s4806_s24 + $0x9] ss:$0 sm:$0xff] }
 0x564   :  { %2175 = vmatprep.mubr.f32.mxu1 %v6792_v48  ;;  %4429 = vmatprep.subr.mxu1 %v5356_v42  ;;  %v1873_v9 = vmul.f32 %v3856_v24, %v1761_v49  ;;  %v1696_v42 = vadd.f32 %v1695_v35, %v1694_v62  ;;  %v1721_v63 = vmul.f32 0.015625, %v1690_v10  ;;  %v2000_v13 = vmax.f32 %v1984_v36, 0.0  ;;  %v3862_v35 = vld [vmem:[%s4801_s19 + $0xa] ss:$0 sm:$0xff] }
 0x565   :  { %2336 = vmatprep.mubr.f32.mxu0 %v6792_v48  ;;  %4445 = vmatpush1.msra.mxu1 %v5363_v59  ;;  %v1701_v59 = vrot.slane %v1700_v33, 1  ;;  %v1874_v53 = vmul.f32 %v3857_v52, %v1762_v28  ;;  %4590 = vrsqrt.f32 %v1736_v26  ;;  %v1707_v6 = vrot.slane %v1706_v39, 1  ;;  %v3863_v28 = vld [vmem:[%s4801_s19 + $0xb] ss:$0 sm:$0xff] }
 0x566   :  { %v4581_v1 = vpop.eup %4580  ;;  %4430 = vmatprep.subr.mxu1 %v5368_v30  ;;  %v1985_v30 = vadd.f32 %v3872_v41, %v1873_v9  ;;  %v1722_v62 = vmul.f32 0.015625, %v1696_v42  ;;  %v1737_v4 = vadd.f32 1e-05, %v1721_v63  ;;  %v3878_v9 = vld [vmem:[%s4806_s24 + $0xa] ss:$0 sm:$0xff]  ;;  %v6797_v42 = vld [vmem:[#allocation32_spill] sm:$0xff] }
 0x567   :  { %v4583_v37 = vpop.eup %4582  ;;  %2176 = vmatmul.mubr.f32.gmra.mxu1 %v1999_v8  ;;  %2337 = vmatmul.mubr.f32.gmra.mxu0 %v1999_v8  ;;  %v1763_v44 = vmul.f32 %v4581_v1, %v5292_v3  ;;  %v1702_v40 = vadd.f32 %v1701_v59, %v1700_v33  ;;  %v1986_v3 = vadd.f32 %v3873_v50, %v1874_v53  ;;  %v6795_v52 = vld [vmem:[#allocation31_spill] sm:$0xff]  ;;  %v6798_v53 = vld [vmem:[#allocation33_spill] sm:$0xff] }
 0x568   :  { %2181 = vmatprep.mubr.f32.mxu1 %v6792_v48  ;;  %2342 = vmatprep.mubr.f32.mxu0 %v6792_v48  ;;  %v2001_v56 = vmax.f32 %v1985_v30, 0.0  ;;  %v1764_v51 = vmul.f32 %v4583_v37, %v5287_v12  ;;  %v1738_v61 = vadd.f32 1e-05, %v1722_v62  ;;  %4592 = vrsqrt.f32 %v1737_v4  ;;  %v6796_v26 = vld [vmem:[#allocation27_spill] sm:$0xff]  ;;  %v6800_v4 = vld [vmem:[#allocation34_spill] sm:$0xff] }
 0x569   :  { %4446 = vmatpush1.msra.mxu1 %v5372_v57  ;;  %v1708_v21 = vadd.f32 %v1707_v6, %v1706_v39  ;;  %v1723_v47 = vmul.f32 0.015625, %v1702_v40  ;;  %v3879_v63 = vld [vmem:[%s4806_s24 + $0xb] ss:$0 sm:$0xff]  ;;  %v3864_v59 = vld [vmem:[%s4801_s19 + $0xc] ss:$0 sm:$0xff] }
 0x56a   :  { %4431 = vmatprep.subr.mxu1 %v5378_v11  ;;  %v1875_v11 = vmul.f32 %v3858_v17, %v1763_v44  ;;  %4594 = vrsqrt.f32 %v1738_v61  ;;  %v6799_v17 = vld [vmem:[#allocation26_spill] sm:$0xff]  ;;  %v3880_v6 = vld [vmem:[%s4806_s24 + $0xc] ss:$0 sm:$0xff]  ;;  %v3865_v40 = vld [vmem:[%s4801_s19 + $0xd] ss:$0 sm:$0xff] }
 0x56b   :  { %2182 = vmatmul.mubr.f32.gmra.mxu1 %v2000_v13  ;;  %2343 = vmatmul.mubr.f32.gmra.mxu0 %v2000_v13  ;;  %v4585_v57 = vpop.eup %4584  ;;  %v1724_v34 = vmul.f32 0.015625, %v1708_v21  ;;  %v1739_v23 = vadd.f32 1e-05, %v1723_v47  ;;  %v3881_v61 = vld [vmem:[%s4806_s24 + $0xd] ss:$0 sm:$0xff]  ;;  %v6804_v47 = vld [vmem:[#allocation37_spill] sm:$0xff] }
 0x56c   :  { %2187 = vmatprep.mubr.f32.mxu1 %v6792_v48  ;;  %2348 = vmatprep.mubr.f32.mxu0 %v6792_v48  ;;  %v1987_v12 = vadd.f32 %v3874_v19, %v1875_v11  ;;  %v1765_v18 = vmul.f32 %v4585_v57, %v5300_v54  ;;  %v6802_v19 = vld [vmem:[#allocation29_spill] sm:$0xff]  ;;  %v3866_v21 = vld [vmem:[%s4801_s19 + $0xe] ss:$0 sm:$0xff] }
 0x56d   :  { %4447 = vmatpush1.msra.mxu1 %v5383_v46  ;;  %v4587_v43 = vpop.eup %4586  ;;  %v2002_v46 = vmax.f32 %v1986_v3, 0.0  ;;  %v1740_v15 = vadd.f32 1e-05, %v1724_v34  ;;  %4596 = vrsqrt.f32 %v1739_v23  ;;  %v6801_v3 = vld [vmem:[#allocation35_spill] sm:$0xff] }
 0x56e   :  { %4432 = vmatprep.subr.mxu1 %v5387_v0  ;;  %v1876_v0 = vmul.f32 %v3859_v16, %v1764_v51  ;;  %v2003_v29 = vmax.f32 %v1987_v12, 0.0  ;;  %v1877_v49 = vmul.f32 %v3860_v27, %v1765_v18  ;;  %v6805_v12 = vld [vmem:[#allocation38_spill] sm:$0xff]  ;;  %v6807_v34 = vld [vmem:[#allocation39_spill] sm:$0xff] }
 0x56f   :  { %2188 = vmatmul.mubr.f32.gmra.mxu1 %v2001_v56  ;;  %2349 = vmatmul.mubr.f32.gmra.mxu0 %v2001_v56  ;;  %4598 = vrsqrt.f32 %v1740_v15  ;;  %v3882_v23 = vld [vmem:[%s4806_s24 + $0xe] ss:$0 sm:$0xff] }
 0x570   :  { %2193 = vmatprep.mubr.f32.mxu1 %v6792_v48  ;;  %2354 = vmatprep.mubr.f32.mxu0 %v6792_v48  ;;  %v1988_v54 = vadd.f32 %v3875_v22, %v1876_v0  ;;  %v1989_v32 = vadd.f32 %v3876_v5, %v1877_v49  ;;  %v6806_v22 = vld [vmem:[#allocation28_spill] sm:$0xff]  ;;  %v6810_v5 = vld [vmem:[#allocation42_spill] sm:$0xff]  ;;  %v6811_v15 = vld [vmem:[#allocation43_spill] sm:$0xff] }
 0x571   :  { %4448 = vmatpush1.msra.mxu1 %v5392_v25  ;;  %v4589_v25 = vpop.eup %4588 }
 0x572   :  { %4433 = vmatprep.subr.mxu1 %v5397_v55  ;;  %v1766_v55 = vmul.f32 %v4587_v43, %v5295_v20  ;;  %v4591_v24 = vpop.eup %4590  ;;  %v2005_v33 = vmax.f32 %v1989_v32, 0.0  ;;  %v6803_v43 = vld [vmem:[#allocation36_spill] sm:$0xff] }
 0x573   :  { %2194 = vmatmul.mubr.f32.gmra.mxu1 %v2002_v46  ;;  %2355 = vmatmul.mubr.f32.gmra.mxu0 %v2002_v46 }
 0x574   :  { %2199 = vmatprep.mubr.f32.mxu1 %v6792_v48  ;;  %2360 = vmatprep.mubr.f32.mxu0 %v6792_v48  ;;  %v1878_v20 = vmul.f32 %v3861_v45, %v1766_v55 }
 0x575   :  { %4449 = vmatpush1.msra.mxu1 %v5402_v2  ;;  %v2004_v2 = vmax.f32 %v1988_v54, 0.0  ;;  %v4593_v10 = vpop.eup %4592  ;;  %v6809_v54 = vld [vmem:[#allocation41_spill] sm:$0xff] }
 0x576   :  { %4434 = vmatprep.subr.mxu1 %v5407_v38  ;;  %v1767_v38 = vmul.f32 %v4589_v25, %v5310_v60  ;;  %v6793_v60 = vld [vmem:[#allocation25_spill] sm:$0xff]  ;;  %v1769_v39 = vmul.f32 %v4593_v10, %v6796_v26  ;;  %v3867_v25 = vld [vmem:[%s4801_s19 + $0xf] ss:$0 sm:$0xff]  ;;  %v5661_v26 = vld [vmem:[%s4816_s6 + $0x90] sm:$0xff] }
 0x577   :  { %2200 = vmatmul.mubr.f32.gmra.mxu1 %v2003_v29  ;;  %2361 = vmatmul.mubr.f32.gmra.mxu0 %v2003_v29  ;;  %v1768_v36 = vmul.f32 %v4591_v24, %v6793_v60  ;;  %v4595_v1 = vpop.eup %4594  ;;  %v6808_v29 = vld [vmem:[#allocation40_spill] sm:$0xff]  ;;  %v3883_v24 = vld [vmem:[%s4806_s24 + $0xf] ss:$0 sm:$0xff]  ;;  %v5631_v60 = vld [vmem:[%s4816_s6 + $0x40] sm:$0xff]  ;;  %6828 = vst [vmem:[#allocation41_spill] sm:$0xff] %v5661_v26 }
 0x578   :  { %2205 = vmatprep.mubr.f32.mxu1 %v6792_v48  ;;  %2366 = vmatprep.mubr.f32.mxu0 %v6792_v48  ;;  %v1879_v8 = vmul.f32 %v3862_v35, %v1767_v38  ;;  %v1881_v50 = vmul.f32 %v3864_v59, %v1769_v39  ;;  %v1770_v62 = vmul.f32 %v4595_v1, %v6799_v17  ;;  %v5607_v38 = vld [vmem:[%s4816_s6] sm:$0xff]  ;;  %v5613_v35 = vld [vmem:[%s4816_s6 + $0x10] sm:$0xff]  ;;  %v5616_v10 = vld [vmem:[%s4816_s6 + $0x18] sm:$0xff] }
 0x579   :  { %4450 = vmatpush1.msra.mxu1 %v5412_v7  ;;  %v1990_v7 = vadd.f32 %v3877_v31, %v1878_v20  ;;  %v1880_v37 = vmul.f32 %v3863_v28, %v1768_v36  ;;  %6812 = vst [vmem:[#allocation25_spill] sm:$0xff] %v5607_v38  ;;  %v5610_v31 = vld [vmem:[%s4816_s6 + $0x8] sm:$0xff]  ;;  %6814 = vst [vmem:[#allocation31_spill] sm:$0xff] %v5613_v35  ;;  %v5643_v28 = vld [vmem:[%s4816_s6 + $0x60] sm:$0xff] }
 0x57a   :  { %4435 = vmatprep.subr.mxu1 %v5416_v58  ;;  %v6794_v58 = vld [vmem:[#allocation30_spill] sm:$0xff]  ;;  %v4597_v13 = vpop.eup %4596  ;;  %v1993_v11 = vadd.f32 %v3880_v6, %v1881_v50  ;;  %v1882_v51 = vmul.f32 %v3865_v40, %v1770_v62  ;;  %6815 = vst [vmem:[#allocation27_spill] sm:$0xff] %v5616_v10  ;;  %6820 = vst [vmem:[#allocation35_spill] sm:$0xff] %v5631_v60  ;;  %v5664_v39 = vld [vmem:[%s4816_s6 + $0x98] sm:$0xff] }
 0x57b   :  { %2206 = vmatmul.mubr.f32.gmra.mxu1 %v2004_v2  ;;  %2367 = vmatmul.mubr.f32.gmra.mxu0 %v2004_v2  ;;  %v2006_v41 = vmax.f32 %v1990_v7, 0.0  ;;  %v1992_v44 = vadd.f32 %v3879_v63, %v1880_v37  ;;  %v1771_v16 = vmul.f32 %v4597_v13, %v6802_v19  ;;  %6813 = vst [vmem:[#allocation30_spill] sm:$0xff] %v5610_v31  ;;  %v5622_v7 = vld [vmem:[%s4816_s6 + $0x28] sm:$0xff]  ;;  %6824 = vst [vmem:[#allocation38_spill] sm:$0xff] %v5643_v28  ;;  %v5673_v59 = vld [vmem:[%s4816_s6 + $0xb0] sm:$0xff] }
 0x57c   :  { %2211 = vmatprep.mubr.f32.mxu1 %v6792_v48  ;;  %2372 = vmatprep.mubr.f32.mxu0 %v6792_v48  ;;  %v4599_v57 = vpop.eup %4598  ;;  %v2009_v46 = vmax.f32 %v1993_v11, 0.0  ;;  %v1994_v0 = vadd.f32 %v3881_v61, %v1882_v51  ;;  %6817 = vst [vmem:[#allocation33_spill] sm:$0xff] %v5622_v7  ;;  %v5634_v36 = vld [vmem:[%s4816_s6 + $0x48] sm:$0xff]  ;;  %6829 = vst [vmem:[#allocation42_spill] sm:$0xff] %v5664_v39  ;;  %v5676_v13 = vld [vmem:[%s4816_s6 + $0xb8] sm:$0xff] }
 0x57d   :  { %4451 = vmatpush1.msra.mxu1 %v5421_v14  ;;  %v1991_v14 = vadd.f32 %v3878_v9, %v1879_v8  ;;  %v2008_v56 = vmax.f32 %v1992_v44, 0.0  ;;  %v1883_v18 = vmul.f32 %v3866_v21, %v1771_v16  ;;  %v1772_v27 = vmul.f32 %v4599_v57, %v6806_v22  ;;  %v5628_v8 = vld [vmem:[%s4816_s6 + $0x38] sm:$0xff]  ;;  %6821 = vst [vmem:[#allocation29_spill] sm:$0xff] %v5634_v36  ;;  %v5646_v1 = vld [vmem:[%s4816_s6 + $0x68] sm:$0xff]  ;;  %v5685_v44 = vld [vmem:[%s4816_s6 + $0xd0] sm:$0xff] }
 0x57e   :  { %4436 = vmatprep.subr.mxu1 %v6794_v58  ;;  %v2010_v49 = vmax.f32 %v1994_v0, 0.0  ;;  %6819 = vst [vmem:[#allocation34_spill] sm:$0xff] %v5628_v8  ;;  %v5637_v58 = vld [vmem:[%s4816_s6 + $0x50] sm:$0xff]  ;;  %v5640_v9 = vld [vmem:[%s4816_s6 + $0x58] sm:$0xff]  ;;  %6825 = vst [vmem:[#allocation28_spill] sm:$0xff] %v5646_v1 }
 0x57f   :  { %2212 = vmatmul.mubr.f32.gmra.mxu1 %v2005_v33  ;;  %2373 = vmatmul.mubr.f32.gmra.mxu0 %v2005_v33  ;;  %v2007_v30 = vmax.f32 %v1991_v14, 0.0  ;;  %v1995_v55 = vadd.f32 %v3882_v23, %v1883_v18  ;;  %v1884_v45 = vmul.f32 %v3867_v25, %v1772_v27  ;;  %v5619_v33 = vld [vmem:[%s4816_s6 + $0x20] sm:$0xff]  ;;  %6822 = vst [vmem:[#allocation36_spill] sm:$0xff] %v5637_v58  ;;  %6823 = vst [vmem:[#allocation37_spill] sm:$0xff] %v5640_v9  ;;  %v5658_v37 = vld [vmem:[%s4816_s6 + $0x88] sm:$0xff] }
 0x580   :  { %2217 = vmatprep.mubr.f32.mxu1 %v6792_v48  ;;  %2378 = vmatprep.mubr.f32.mxu0 %v6792_v48  ;;  %6816 = vst [vmem:[#allocation32_spill] sm:$0xff] %v5619_v33  ;;  %v5655_v14 = vld [vmem:[%s4816_s6 + $0x80] sm:$0xff]  ;;  %v5670_v63 = vld [vmem:[%s4816_s6 + $0xa8] sm:$0xff]  ;;  %6830 = vst [vmem:[#allocation43_spill] sm:$0xff] %v5676_v13 }
 0x581   :  { %4452 = vmatpush1.msra.mxu1 %v6795_v52  ;;  %v2011_v2 = vmax.f32 %v1995_v55, 0.0  ;;  %v1996_v32 = vadd.f32 %v3883_v24, %v1884_v45  ;;  %v5652_v52 = vld [vmem:[%s4816_s6 + $0x78] sm:$0xff]  ;;  %v5691_v17 = vld [vmem:[%s4816_s6 + $0xe0] sm:$0xff]  ;;  %v5694_v62 = vld [vmem:[%s4816_s6 + $0xe8] sm:$0xff] }
 0x582   :  { %4437 = vmatprep.subr.mxu1 %v6797_v42  ;;  %6827 = vst [vmem:[#allocation40_spill] sm:$0xff] %v5652_v52  ;;  %v5667_v42 = vld [vmem:[%s4816_s6 + $0xa0] sm:$0xff]  ;;  %v5688_v50 = vld [vmem:[%s4816_s6 + $0xd8] sm:$0xff]  ;;  %v5706_v57 = vld [vmem:[%s4816_s6 + $0x108] sm:$0xff] }
 0x583   :  { %2218 = vmatmul.mubr.f32.gmra.mxu1 %v2006_v41  ;;  %2379 = vmatmul.mubr.f32.gmra.mxu0 %v2006_v41  ;;  %v2012_v20 = vmax.f32 %v1996_v32, 0.0  ;;  %v5649_v41 = vld [vmem:[%s4816_s6 + $0x70] sm:$0xff]  ;;  %v5700_v6 = vld [vmem:[%s4816_s6 + $0xf8] sm:$0xff]  ;;  %v5703_v40 = vld [vmem:[%s4816_s6 + $0x100] sm:$0xff] }
 0x584   :  { %2223 = vmatprep.mubr.f32.mxu1 %v6792_v48  ;;  %2384 = vmatprep.mubr.f32.mxu0 %v6792_v48  ;;  %6826 = vst [vmem:[#allocation39_spill] sm:$0xff] %v5649_v41  ;;  %6832 = vst [vmem:[#allocation45_spill] sm:$0xff] %v5700_v6  ;;  %v5715_v11 = vld [vmem:[%s4816_s6 + $0x120] sm:$0xff]  ;;  %v5718_v51 = vld [vmem:[%s4816_s6 + $0x128] sm:$0xff] }
 0x585   :  { %4453 = vmatpush1.msra.mxu1 %v6798_v53  ;;  %v5682_v53 = vld [vmem:[%s4816_s6 + $0xc8] sm:$0xff]  ;;  %6834 = vst [vmem:[#allocation47_spill] sm:$0xff] %v5715_v11  ;;  %v5721_v19 = vld [vmem:[%s4816_s6 + $0x130] sm:$0xff]  ;;  %v5724_v16 = vld [vmem:[%s4816_s6 + $0x138] sm:$0xff] }
 0x586   :  { %4438 = vmatprep.subr.mxu1 %v6800_v4  ;;  %v5697_v4 = vld [vmem:[%s4816_s6 + $0xf0] sm:$0xff]  ;;  %v5730_v61 = vld [vmem:[%s4816_s6 + $0x148] sm:$0xff]  ;;  %v5748_v18 = vld [vmem:[%s4816_s6 + $0x178] sm:$0xff] }
 0x587   :  { %2224 = vmatmul.mubr.f32.gmra.mxu1 %v2007_v30  ;;  %2385 = vmatmul.mubr.f32.gmra.mxu0 %v2007_v30  ;;  %v5679_v30 = vld [vmem:[%s4816_s6 + $0xc0] sm:$0xff]  ;;  %6831 = vst [vmem:[#allocation44_spill] sm:$0xff] %v5697_v4  ;;  %v5733_v21 = vld [vmem:[%s4816_s6 + $0x150] sm:$0xff]  ;;  %v5754_v27 = vld [vmem:[%s4816_s6 + $0x188] sm:$0xff] }
 0x588   :  { %2229 = vmatprep.mubr.f32.mxu1 %v6792_v48  ;;  %2390 = vmatprep.mubr.f32.mxu0 %v6792_v48  ;;  %v5745_v0 = vld [vmem:[%s4816_s6 + $0x170] sm:$0xff]  ;;  %v5751_v22 = vld [vmem:[%s4816_s6 + $0x180] sm:$0xff]  ;;  %v5760_v23 = vld [vmem:[%s4816_s6 + $0x198] sm:$0xff] }
 0x589   :  { %4454 = vmatpush1.msra.mxu1 %v6801_v3  ;;  %v5712_v3 = vld [vmem:[%s4816_s6 + $0x118] sm:$0xff]  ;;  %6836 = vst [vmem:[#allocation49_spill] sm:$0xff] %v5745_v0  ;;  %v5763_v25 = vld [vmem:[%s4816_s6 + $0x1a0] sm:$0xff]  ;;  %v5781_v45 = vld [vmem:[%s4816_s6 + $0x1d0] sm:$0xff] }
 0x58a   :  { %4439 = vmatprep.subr.mxu1 %v6803_v43  ;;  %6833 = vst [vmem:[#allocation46_spill] sm:$0xff] %v5712_v3  ;;  %v5727_v43 = vld [vmem:[%s4816_s6 + $0x140] sm:$0xff]  ;;  %v5784_v24 = vld [vmem:[%s4816_s6 + $0x1d8] sm:$0xff]  ;;  %v5793_v32 = vld [vmem:[%s4816_s6 + $0x1f0] sm:$0xff] }
 0x58b   :  { %2230 = vmatmul.mubr.f32.gmra.mxu1 %v2008_v56  ;;  %2391 = vmatmul.mubr.f32.gmra.mxu0 %v2008_v56  ;;  %v5709_v56 = vld [vmem:[%s4816_s6 + $0x110] sm:$0xff]  ;;  %v5775_v55 = vld [vmem:[%s4816_s6 + $0x1c0] sm:$0xff]  ;;  %v5802_v10 = vld [vmem:[%s4826_s20 + $0x8] sm:$0xff] }
 0x58c   :  { %2235 = vmatprep.mubr.f32.mxu1 %v6792_v48  ;;  %4455 = vmatpush1.msra.mxu1 %v6804_v47  ;;  %v5736_v47 = vld [vmem:[%s4816_s6 + $0x158] sm:$0xff]  ;;  %v5799_v35 = vld [vmem:[%s4826_s20] sm:$0xff]  ;;  %6840 = vst [vmem:[#allocation53_spill] sm:$0xff] %v5802_v10  ;;  %v5805_v38 = vld [vmem:[%s4826_s20 + $0x10] sm:$0xff] }
 0x58d   :  { %4440 = vmatprep.subr.mxu1 %v6805_v12  ;;  %v5742_v12 = vld [vmem:[%s4816_s6 + $0x168] sm:$0xff]  ;;  %6839 = vst [vmem:[#allocation52_spill] sm:$0xff] %v5799_v35  ;;  %6841 = vst [vmem:[#allocation54_spill] sm:$0xff] %v5805_v38  ;;  %v5811_v31 = vld [vmem:[%s4826_s20 + $0x20] sm:$0xff] }
 0x58e   :  { %4456 = vmatpush1.msra.mxu1 %v6807_v34  ;;  %6835 = vst [vmem:[#allocation48_spill] sm:$0xff] %v5742_v12  ;;  %v5757_v34 = vld [vmem:[%s4816_s6 + $0x190] sm:$0xff]  ;;  %6843 = vst [vmem:[#allocation56_spill] sm:$0xff] %v5811_v31  ;;  %v5814_v8 = vld [vmem:[%s4826_s20 + $0x28] sm:$0xff] }
 0x58f   :  { %2236 = vmatmul.mubr.f32.gmra.mxu1 %v2009_v46  ;;  %4441 = vmatprep.subr.mxu1 %v6808_v29  ;;  %v5766_v29 = vld [vmem:[%s4816_s6 + $0x1a8] sm:$0xff]  ;;  %6844 = vst [vmem:[#allocation57_spill] sm:$0xff] %v5814_v8  ;;  %v5817_v33 = vld [vmem:[%s4826_s20 + $0x30] sm:$0xff]  ;;  %v5820_v35 = vld [vmem:[%s4826_s20 + $0x38] sm:$0xff] }
 0x590   :  { %2241 = vmatprep.mubr.f32.mxu1 %v6792_v48  ;;  %4457 = vmatpush1.msra.mxu1 %v6809_v54  ;;  %v5769_v54 = vld [vmem:[%s4816_s6 + $0x1b0] sm:$0xff]  ;;  %6845 = vst [vmem:[#allocation58_spill] sm:$0xff] %v5817_v33  ;;  %6846 = vst [vmem:[#allocation59_spill] sm:$0xff] %v5820_v35  ;;  %v5823_v10 = vld [vmem:[%s4826_s20 + $0x40] sm:$0xff] }
 0x591   :  { %4442 = vmatprep.subr.mxu1 %v6810_v5  ;;  %v5778_v5 = vld [vmem:[%s4816_s6 + $0x1c8] sm:$0xff]  ;;  %6847 = vst [vmem:[#allocation60_spill] sm:$0xff] %v5823_v10  ;;  %v5832_v31 = vld [vmem:[%s4826_s20 + $0x58] sm:$0xff]  ;;  %v5835_v8 = vld [vmem:[%s4826_s20 + $0x60] sm:$0xff] }
 0x592   :  { %4458 = vmatpush1.msra.mxu1 %v6811_v15  ;;  %6837 = vst [vmem:[#allocation50_spill] sm:$0xff] %v5778_v5  ;;  %v5787_v15 = vld [vmem:[%s4816_s6 + $0x1e0] sm:$0xff]  ;;  %v5826_v38 = vld [vmem:[%s4826_s20 + $0x48] sm:$0xff]  ;;  %6850 = vst [vmem:[#allocation63_spill] sm:$0xff] %v5832_v31 }
 0x593   :  { %2242 = vmatmul.mubr.f32.gmra.mxu1 %v2010_v49  ;;  %6848 = vst [vmem:[#allocation61_spill] sm:$0xff] %v5826_v38  ;;  %6851 = vst [vmem:[#allocation64_spill] sm:$0xff] %v5835_v8  ;;  %v5838_v33 = vld [vmem:[%s4826_s20 + $0x68] sm:$0xff]  ;;  %v5841_v35 = vld [vmem:[%s4826_s20 + $0x70] sm:$0xff] }
 0x594   :  { %2247 = vmatprep.mubr.f32.mxu1 %v6792_v48  ;;  %6852 = vst [vmem:[#allocation65_spill] sm:$0xff] %v5838_v33  ;;  %6853 = vst [vmem:[#allocation66_spill] sm:$0xff] %v5841_v35  ;;  %v5844_v10 = vld [vmem:[%s4826_s20 + $0x78] sm:$0xff]  ;;  %v5847_v38 = vld [vmem:[%s4826_s20 + $0x80] sm:$0xff] }
 0x595   :  { %6854 = vst [vmem:[#allocation67_spill] sm:$0xff] %v5844_v10  ;;  %6855 = vst [vmem:[#allocation68_spill] sm:$0xff] %v5847_v38  ;;  %v5853_v31 = vld [vmem:[%s4826_s20 + $0x90] sm:$0xff]  ;;  %v5856_v8 = vld [vmem:[%s4826_s20 + $0x98] sm:$0xff] }
 0x596   :  { %6857 = vst [vmem:[#allocation70_spill] sm:$0xff] %v5853_v31  ;;  %6858 = vst [vmem:[#allocation71_spill] sm:$0xff] %v5856_v8  ;;  %v5859_v33 = vld [vmem:[%s4826_s20 + $0xa0] sm:$0xff]  ;;  %v5862_v35 = vld [vmem:[%s4826_s20 + $0xa8] sm:$0xff] }
 0x597   :  { %2248 = vmatmul.mubr.f32.gmra.mxu1 %v2011_v2  ;;  %6859 = vst [vmem:[#allocation72_spill] sm:$0xff] %v5859_v33  ;;  %6860 = vst [vmem:[#allocation73_spill] sm:$0xff] %v5862_v35  ;;  %v5865_v10 = vld [vmem:[%s4826_s20 + $0xb0] sm:$0xff]  ;;  %v5868_v38 = vld [vmem:[%s4826_s20 + $0xb8] sm:$0xff] }
 0x598   :  { %2253 = vmatprep.mubr.f32.mxu1 %v6792_v48  ;;  %6861 = vst [vmem:[#allocation74_spill] sm:$0xff] %v5865_v10  ;;  %6862 = vst [vmem:[#allocation75_spill] sm:$0xff] %v5868_v38  ;;  %v5874_v31 = vld [vmem:[%s4826_s20 + $0xc8] sm:$0xff]  ;;  %v5877_v8 = vld [vmem:[%s4826_s20 + $0xd0] sm:$0xff] }
 0x599   :  { %6864 = vst [vmem:[#allocation77_spill] sm:$0xff] %v5874_v31  ;;  %6865 = vst [vmem:[#allocation78_spill] sm:$0xff] %v5877_v8  ;;  %v5880_v33 = vld [vmem:[%s4826_s20 + $0xd8] sm:$0xff]  ;;  %v5883_v35 = vld [vmem:[%s4826_s20 + $0xe0] sm:$0xff] }
 0x59a   :  { %6866 = vst [vmem:[#allocation79_spill] sm:$0xff] %v5880_v33  ;;  %6867 = vst [vmem:[#allocation80_spill] sm:$0xff] %v5883_v35  ;;  %v5886_v10 = vld [vmem:[%s4826_s20 + $0xe8] sm:$0xff]  ;;  %v5889_v38 = vld [vmem:[%s4826_s20 + $0xf0] sm:$0xff] }
 0x59b   :  { %2254 = vmatmul.mubr.f32.gmra.mxu1 %v2012_v20  ;;  %6868 = vst [vmem:[#allocation81_spill] sm:$0xff] %v5886_v10  ;;  %6869 = vst [vmem:[#allocation82_spill] sm:$0xff] %v5889_v38  ;;  %v5895_v31 = vld [vmem:[%s4826_s20 + $0x100] sm:$0xff]  ;;  %v5898_v8 = vld [vmem:[%s4826_s20 + $0x108] sm:$0xff] }
 0x59c   :  { %2396 = vmatprep.mubr.f32.mxu1 %v6792_v48  ;;  %6871 = vst [vmem:[#allocation84_spill] sm:$0xff] %v5895_v31  ;;  %6872 = vst [vmem:[#allocation85_spill] sm:$0xff] %v5898_v8  ;;  %v5901_v33 = vld [vmem:[%s4826_s20 + $0x110] sm:$0xff]  ;;  %v5904_v35 = vld [vmem:[%s4826_s20 + $0x118] sm:$0xff] }
 0x59d   :  { %6873 = vst [vmem:[#allocation86_spill] sm:$0xff] %v5901_v33  ;;  %6874 = vst [vmem:[#allocation87_spill] sm:$0xff] %v5904_v35  ;;  %v5907_v10 = vld [vmem:[%s4826_s20 + $0x120] sm:$0xff]  ;;  %v5910_v38 = vld [vmem:[%s4826_s20 + $0x128] sm:$0xff] }
 0x59e   :  { %6875 = vst [vmem:[#allocation88_spill] sm:$0xff] %v5907_v10  ;;  %6876 = vst [vmem:[#allocation89_spill] sm:$0xff] %v5910_v38  ;;  %v5916_v31 = vld [vmem:[%s4826_s20 + $0x138] sm:$0xff]  ;;  %v5919_v8 = vld [vmem:[%s4826_s20 + $0x140] sm:$0xff] }
 0x59f   :  { %2397 = vmatmul.mubr.f32.vlgmr.msra.gmra.mxu1 %v2009_v46  ;;  %v5739_v46 = vld [vmem:[%s4816_s6 + $0x160] sm:$0xff]  ;;  %6879 = vst [vmem:[#allocation91_spill] sm:$0xff] %v5916_v31  ;;  %6880 = vst [vmem:[#allocation92_spill] sm:$0xff] %v5919_v8  ;;  %v5922_v33 = vld [vmem:[%s4826_s20 + $0x148] sm:$0xff] }
 0x5a0   :  { %2402 = vmatprep.mubr.f32.mxu1 %v6792_v48  ;;  %6881 = vst [vmem:[#allocation93_spill] sm:$0xff] %v5922_v33  ;;  %v5925_v58 = vld [vmem:[%s4826_s20 + $0x150] sm:$0xff]  ;;  %v5928_v35 = vld [vmem:[%s4826_s20 + $0x158] sm:$0xff]  ;;  %v5931_v10 = vld [vmem:[%s4826_s20 + $0x160] sm:$0xff] }
 0x5a1   :  { %6882 = vst [vmem:[#allocation94_spill] sm:$0xff] %v5925_v58  ;;  %6883 = vst [vmem:[#allocation95_spill] sm:$0xff] %v5928_v35  ;;  %v5934_v38 = vld [vmem:[%s4826_s20 + $0x168] sm:$0xff]  ;;  %v5940_v31 = vld [vmem:[%s4826_s20 + $0x178] sm:$0xff] }
 0x5a2   :  { %6884 = vst [vmem:[#allocation96_spill] sm:$0xff] %v5931_v10  ;;  %6885 = vst [vmem:[#allocation97_spill] sm:$0xff] %v5934_v38  ;;  %v5943_v8 = vld [vmem:[%s4826_s20 + $0x180] sm:$0xff]  ;;  %v5946_v33 = vld [vmem:[%s4826_s20 + $0x188] sm:$0xff] }
 0x5a3   :  { %2403 = vmatmul.mubr.f32.gmra.mxu1 %v2010_v49  ;;  %v5772_v49 = vld [vmem:[%s4816_s6 + $0x1b8] sm:$0xff]  ;;  %6887 = vst [vmem:[#allocation99_spill] sm:$0xff] %v5940_v31  ;;  %6888 = vst [vmem:[#allocation100_spill] sm:$0xff] %v5943_v8  ;;  %v5949_v58 = vld [vmem:[%s4826_s20 + $0x190] sm:$0xff] }
 0x5a4   :  { %2408 = vmatprep.mubr.f32.mxu1 %v6792_v48  ;;  %6889 = vst [vmem:[#allocation101_spill] sm:$0xff] %v5946_v33  ;;  %6890 = vst [vmem:[#allocation102_spill] sm:$0xff] %v5949_v58  ;;  %v5952_v35 = vld [vmem:[%s4826_s20 + $0x198] sm:$0xff]  ;;  %v5955_v10 = vld [vmem:[%s4826_s20 + $0x1a0] sm:$0xff] }
 0x5a5   :  { %6891 = vst [vmem:[#allocation103_spill] sm:$0xff] %v5952_v35  ;;  %6892 = vst [vmem:[#allocation104_spill] sm:$0xff] %v5955_v10  ;;  %v2077_v38 = vld [vmem:[%s6877_s0] sm:$0xf]  ;;  %v5962_v31 = vld [vmem:[%s4826_s20 + $0x1b0] sm:$0xff] }
 0x5a6   :  { %6895 = vst [vmem:[#allocation106_spill] sm:$0xff] %v5962_v31  ;;  %v5965_v8 = vld [vmem:[%s4826_s20 + $0x1b8] sm:$0xff]  ;;  %v6897_v7 = vld [vmem:[#allocation22_spill] sm:$0xff]  ;;  %v5976_v9 = vld [vmem:[%s4826_s20 + $0x1d0] sm:$0xff] }
 0x5a7   :  { %2409 = vmatmul.mubr.f32.gmra.mxu1 %v2011_v2  ;;  %v5790_v2 = vld [vmem:[%s4816_s6 + $0x1e8] sm:$0xff]  ;;  %6896 = vst [vmem:[#allocation107_spill] sm:$0xff] %v5965_v8  ;;  %v5970_v35 = vld [vmem:[%s4826_s20 + $0x1c0] sm:$0xff]  ;;  %6900 = vst [vmem:[#allocation110_spill] sm:$0xff] %v5976_v9  ;;  %v6911_v33 = vsub.s32 2, %v6897_v7  ;;  %v6918_v41 = vsub.s32 1, %v6897_v7 }
 0x5a8   :  { %2414 = vmatprep.mubr.f32.mxu1 %v6792_v48  ;;  %v5625_v48 = vld [vmem:[%s4816_s6 + $0x30] sm:$0xff]  ;;  %6838 = vst [vmem:[#allocation51_spill] sm:$0xff] %v5790_v2  ;;  %6898 = vst [vmem:[#allocation108_spill] sm:$0xff] %v5970_v35  ;;  %v5973_v10 = vld [vmem:[%s4826_s20 + $0x1c8] sm:$0xff]  ;;  %v6919_v36 = vsub.s32 3, %v6897_v7 }
 0x5a9   :  { %6818 = vst [vmem:[#allocation26_spill] sm:$0xff] %v5625_v48  ;;  %v5808_v48 = vld [vmem:[%s4826_s20 + $0x18] sm:$0xff]  ;;  %6899 = vst [vmem:[#allocation109_spill] sm:$0xff] %v5973_v10  ;;  %v5982_v31 = vld [vmem:[%s4826_s20 + $0x1e0] sm:$0xff] }
 0x5aa   :  { %6842 = vst [vmem:[#allocation55_spill] sm:$0xff] %v5808_v48  ;;  %v5829_v48 = vld [vmem:[%s4826_s20 + $0x50] sm:$0xff]  ;;  %6902 = vst [vmem:[#allocation112_spill] sm:$0xff] %v5982_v31  ;;  %v5985_v8 = vld [vmem:[%s4826_s20 + $0x1e8] sm:$0xff] }
 0x5ab   :  { %2415 = vmatmul.mubr.f32.gmra.mxu1 %v2012_v20  ;;  %v5796_v20 = vld [vmem:[%s4816_s6 + $0x1f8] sm:$0xff]  ;;  %6849 = vst [vmem:[#allocation62_spill] sm:$0xff] %v5829_v48  ;;  %v5850_v48 = vld [vmem:[%s4826_s20 + $0x88] sm:$0xff]  ;;  %6903 = vst [vmem:[#allocation113_spill] sm:$0xff] %v5985_v8  ;;  %v6910_v8 = vsub.s32 0, %v6897_v7 }
 0x5ac   :  { %6856 = vst [vmem:[#allocation69_spill] sm:$0xff] %v5850_v48  ;;  %v5871_v48 = vld [vmem:[%s4826_s20 + $0xc0] sm:$0xff]  ;;  %v5990_v35 = vld [vmem:[%s4826_s20 + $0x1f0] sm:$0xff]  ;;  %v5993_v10 = vld [vmem:[%s4826_s20 + $0x1f8] sm:$0xff] }
 0x5ad   :  { %6863 = vst [vmem:[#allocation76_spill] sm:$0xff] %v5871_v48  ;;  %v5892_v48 = vld [vmem:[%s4826_s20 + $0xf8] sm:$0xff]  ;;  %6904 = vst [vmem:[#allocation114_spill] sm:$0xff] %v5990_v35  ;;  %v5996_v9 = vld [vmem:[%s6893_s5] sm:$0xff]  ;;  %v6009_v58 = vrot.slane %v2077_v38, %v6910_v8  ;;  %v6013_v35 = vrot.slane %v2077_v38, %v6911_v33  ;;  %v6035_v33 = vrot.slane %v2077_v38, %v6918_v41 }
 0x5ae   :  { %6870 = vst [vmem:[#allocation83_spill] sm:$0xff] %v5892_v48  ;;  %v5913_v48 = vld [vmem:[%s4826_s20 + $0x130] sm:$0xff]  ;;  %6905 = vst [vmem:[#allocation115_spill] sm:$0xff] %v5993_v10  ;;  %v6005_v60 = vld [vmem:[%s6893_s5 + $0x18] sm:$0xff] }
 0x5af   :  { %6878 = vst [vmem:[#allocation90_spill] sm:$0xff] %v5913_v48  ;;  %v5937_v48 = vld [vmem:[%s4826_s20 + $0x170] sm:$0xff]  ;;  %6906 = vst [vmem:[#allocation116_spill] sm:$0xff] %v5996_v9  ;;  %v6016_v10 = vld [vmem:[%s6893_s5 + $0x20] sm:$0xff] }
 0x5b0   :  { %6886 = vst [vmem:[#allocation98_spill] sm:$0xff] %v5937_v48  ;;  %v5959_v48 = vld [vmem:[%s4826_s20 + $0x1a8] sm:$0xff]  ;;  %v6002_v31 = vld [vmem:[%s6893_s5 + $0x10] sm:$0xff]  ;;  %6909 = vst [vmem:[#allocation119_spill] sm:$0xff] %v6005_v60 }
 0x5b1   :  { %6894 = vst [vmem:[#allocation105_spill] sm:$0xff] %v5959_v48  ;;  %v5979_v48 = vld [vmem:[%s4826_s20 + $0x1d8] sm:$0xff]  ;;  %6908 = vst [vmem:[#allocation118_spill] sm:$0xff] %v6002_v31  ;;  %v6019_v9 = vld [vmem:[%s6893_s5 + $0x28] sm:$0xff] }
 0x5b2   :  { %6901 = vst [vmem:[#allocation111_spill] sm:$0xff] %v5979_v48  ;;  %v5999_v48 = vld [vmem:[%s6893_s5 + $0x8] sm:$0xff]  ;;  %6912 = vst [vmem:[#allocation120_spill] sm:$0xff] %v6016_v10  ;;  %v6025_v31 = vld [vmem:[%s6893_s5 + $0x38] sm:$0xff]  ;;  %v6039_v10 = vrot.slane %v2077_v38, %v6919_v36 }
 0x5b3   :  { %6907 = vst [vmem:[#allocation117_spill] sm:$0xff] %v5999_v48  ;;  %6913 = vst [vmem:[#allocation121_spill] sm:$0xff] %v6019_v9  ;;  %v6022_v48 = vld [vmem:[%s6893_s5 + $0x30] sm:$0xff]  ;;  %v6028_v60 = vld [vmem:[%s6893_s5 + $0x40] sm:$0xff] }
 0x5b4   :  { %6914 = vst [vmem:[#allocation122_spill] sm:$0xff] %v6022_v48  ;;  %6915 = vst [vmem:[#allocation123_spill] sm:$0xff] %v6025_v31  ;;  %v6031_v8 = vld [vmem:[%s6893_s5 + $0x48] sm:$0xff]  ;;  %v6042_v9 = vld [vmem:[%s6893_s5 + $0x50] sm:$0xff] }
 0x5b5   :  { %6916 = vst [vmem:[#allocation124_spill] sm:$0xff] %v6028_v60  ;;  %6917 = vst [vmem:[#allocation125_spill] sm:$0xff] %v6031_v8  ;;  %v6045_v48 = vld [vmem:[%s6893_s5 + $0x58] sm:$0xff]  ;;  %v6048_v31 = vld [vmem:[%s6893_s5 + $0x60] sm:$0xff] }
 0x5b6   :  { %6920 = vst [vmem:[#allocation126_spill] sm:$0xff] %v6042_v9  ;;  %6921 = vst [vmem:[#allocation127_spill] sm:$0xff] %v6045_v48  ;;  %v6051_v8 = vld [vmem:[%s6893_s5 + $0x68] sm:$0xff]  ;;  %v6054_v28 = vld [vmem:[%s6893_s5 + $0x70] sm:$0xff] }
 0x5b7   :  { %6922 = vst [vmem:[#allocation128_spill] sm:$0xff] %v6048_v31  ;;  %6923 = vst [vmem:[#allocation129_spill] sm:$0xff] %v6051_v8  ;;  %v6057_v41 = vld [vmem:[%s6893_s5 + $0x78] sm:$0xff]  ;;  %v6062_v36 = vld [vmem:[%s6893_s5 + $0x80] sm:$0xff] }
 0x5b8   :  { %6924 = vst [vmem:[#allocation130_spill] sm:$0xff] %v6054_v28  ;;  %6925 = vst [vmem:[#allocation131_spill] sm:$0xff] %v6057_v41  ;;  %v6065_v9 = vld [vmem:[%s6893_s5 + $0x88] sm:$0xff]  ;;  %v6068_v48 = vld [vmem:[%s6893_s5 + $0x90] sm:$0xff] }
 0x5b9   :  { %6926 = vst [vmem:[#allocation132_spill] sm:$0xff] %v6062_v36  ;;  %6927 = vst [vmem:[#allocation133_spill] sm:$0xff] %v6065_v9  ;;  %v6071_v8 = vld [vmem:[%s6893_s5 + $0x98] sm:$0xff]  ;;  %v6074_v41 = vld [vmem:[%s6893_s5 + $0xa0] sm:$0xff] }
 0x5ba   :  { %6928 = vst [vmem:[#allocation134_spill] sm:$0xff] %v6068_v48  ;;  %6929 = vst [vmem:[#allocation135_spill] sm:$0xff] %v6071_v8  ;;  %v6077_v26 = vld [vmem:[%s6893_s5 + $0xa8] sm:$0xff]  ;;  %v6082_v48 = vld [vmem:[%s6893_s5 + $0xb0] sm:$0xff] }
 0x5bb   :  { %6930 = vst [vmem:[#allocation136_spill] sm:$0xff] %v6074_v41  ;;  %6931 = vst [vmem:[#allocation137_spill] sm:$0xff] %v6077_v26  ;;  %v6085_v36 = vld [vmem:[%s6893_s5 + $0xb8] sm:$0xff]  ;;  %v6088_v9 = vld [vmem:[%s6893_s5 + $0xc0] sm:$0xff] }
 0x5bc   :  { %6932 = vst [vmem:[#allocation138_spill] sm:$0xff] %v6082_v48  ;;  %6933 = vst [vmem:[#allocation139_spill] sm:$0xff] %v6085_v36  ;;  %v6097_v26 = vld [vmem:[%s6893_s5 + $0xd8] sm:$0xff]  ;;  %v6102_v48 = vld [vmem:[%s6893_s5 + $0xe0] sm:$0xff] }
 0x5bd   :  { %6934 = vst [vmem:[#allocation140_spill] sm:$0xff] %v6088_v9  ;;  %6937 = vst [vmem:[#allocation143_spill] sm:$0xff] %v6097_v26  ;;  %v6105_v36 = vld [vmem:[%s6893_s5 + $0xe8] sm:$0xff]  ;;  %v6108_v9 = vld [vmem:[%s6893_s5 + $0xf0] sm:$0xff] }
 0x5be   :  { %6938 = vst [vmem:[#allocation144_spill] sm:$0xff] %v6102_v48  ;;  %6939 = vst [vmem:[#allocation145_spill] sm:$0xff] %v6105_v36  ;;  %v6125_v48 = vld [vmem:[%s6893_s5 + $0x118] sm:$0xff]  ;;  %v6128_v36 = vld [vmem:[%s6893_s5 + $0x120] sm:$0xff] }
 0x5bf   :  { %6940 = vst [vmem:[#allocation146_spill] sm:$0xff] %v6108_v9  ;;  %v6122_v9 = vld [vmem:[%s6893_s5 + $0x110] sm:$0xff]  ;;  %6945 = vst [vmem:[#allocation151_spill] sm:$0xff] %v6125_v48  ;;  %v6145_v48 = vld [vmem:[%s6893_s5 + $0x148] sm:$0xff] }
 0x5c0   :  { %6944 = vst [vmem:[#allocation150_spill] sm:$0xff] %v6122_v9  ;;  %6946 = vst [vmem:[#allocation152_spill] sm:$0xff] %v6128_v36  ;;  %v6142_v9 = vld [vmem:[%s6893_s5 + $0x140] sm:$0xff]  ;;  %v6148_v36 = vld [vmem:[%s6893_s5 + $0x150] sm:$0xff] }
 0x5c1   :  { %6950 = vst [vmem:[#allocation156_spill] sm:$0xff] %v6142_v9  ;;  %6951 = vst [vmem:[#allocation157_spill] sm:$0xff] %v6145_v48  ;;  %v6165_v9 = vld [vmem:[%s6893_s5 + $0x178] sm:$0xff]  ;;  %v6168_v48 = vld [vmem:[%s6893_s5 + $0x180] sm:$0xff] }
 0x5c2   :  { %6952 = vst [vmem:[#allocation158_spill] sm:$0xff] %v6148_v36  ;;  %v6162_v36 = vld [vmem:[%s6893_s5 + $0x170] sm:$0xff]  ;;  %6957 = vst [vmem:[#allocation163_spill] sm:$0xff] %v6165_v9  ;;  %v6185_v9 = vld [vmem:[%s6893_s5 + $0x1a8] sm:$0xff] }
 0x5c3   :  { %6956 = vst [vmem:[#allocation162_spill] sm:$0xff] %v6162_v36  ;;  %6958 = vst [vmem:[#allocation164_spill] sm:$0xff] %v6168_v48  ;;  %v6182_v36 = vld [vmem:[%s6893_s5 + $0x1a0] sm:$0xff]  ;;  %v6188_v48 = vld [vmem:[%s6893_s5 + $0x1b0] sm:$0xff] }
 0x5c4   :  { %6962 = vst [vmem:[#allocation168_spill] sm:$0xff] %v6182_v36  ;;  %6963 = vst [vmem:[#allocation169_spill] sm:$0xff] %v6185_v9  ;;  %v6202_v36 = vld [vmem:[%s6893_s5 + $0x1d0] sm:$0xff]  ;;  %v6208_v9 = vld [vmem:[%s6893_s5 + $0x1e0] sm:$0xff] }
 0x5c5   :  { %6964 = vst [vmem:[#allocation170_spill] sm:$0xff] %v6188_v48  ;;  %6969 = vst [vmem:[#allocation174_spill] sm:$0xff] %v6202_v36  ;;  %v6205_v48 = vld [vmem:[%s6893_s5 + $0x1d8] sm:$0xff] }
 0x5c6   :  { %6970 = vst [vmem:[#allocation175_spill] sm:$0xff] %v6205_v48  ;;  %6971 = vst [vmem:[#allocation176_spill] sm:$0xff] %v6208_v9 }
 0x61f   :  { %v2165_v60 = vpop.f32.mrf.mxu1  ;;  %v2326_v52 = vpop.f32.mrf.mxu0 }
 0x620   :  { %v2166_v38 = vadd.f32 %v2165_v60, %v6009_v58  ;;  %v2327_v7 = vadd.f32 %v2326_v52, %v6013_v35 }
 0x621   :  { %v2167_v31 = vpop.f32.mrf.mxu1  ;;  %v2328_v28 = vpop.f32.mrf.mxu0 }
 0x622   :  { %2421 = vst [vmem:[#allocation2] sm:$0xff] %v2166_v38  ;;  %2423 = vst [vmem:[#allocation2 + $0x10] sm:$0xff] %v2327_v7  ;;  %v2168_v60 = vadd.f32 %v2167_v31, %v6035_v33  ;;  %v2329_v52 = vadd.f32 %v2328_v28, %v6039_v10  ;;  %v6091_v38 = vld [vmem:[%s6893_s5 + $0xc8] sm:$0xff]  ;;  %v6094_v7 = vld [vmem:[%s6893_s5 + $0xd0] sm:$0xff] }
 0x623   :  { %v2171_v8 = vpop.f32.mrf.mxu1  ;;  %v2332_v41 = vpop.f32.mrf.mxu0  ;;  %6935 = vst [vmem:[#allocation141_spill] sm:$0xff] %v6091_v38  ;;  %6936 = vst [vmem:[#allocation142_spill] sm:$0xff] %v6094_v7  ;;  %v6117_v38 = vld [vmem:[%s6893_s5 + $0x108] sm:$0xff] }
 0x624   :  { %2422 = vst [vmem:[#allocation2 + $0x8] sm:$0xff] %v2168_v60  ;;  %2424 = vst [vmem:[#allocation2 + $0x18] sm:$0xff] %v2329_v52  ;;  %v2172_v31 = vadd.f32 %v2171_v8, %v6009_v58  ;;  %v2333_v28 = vadd.f32 %v2332_v41, %v6013_v35  ;;  %v6111_v60 = vld [vmem:[%s6893_s5 + $0xf8] sm:$0xff]  ;;  %v6114_v52 = vld [vmem:[%s6893_s5 + $0x100] sm:$0xff] }
 0x625   :  { %v2173_v7 = vpop.f32.mrf.mxu1  ;;  %v2334_v26 = vpop.f32.mrf.mxu0  ;;  %6941 = vst [vmem:[#allocation147_spill] sm:$0xff] %v6111_v60  ;;  %6942 = vst [vmem:[#allocation148_spill] sm:$0xff] %v6114_v52 }
 0x626   :  { %6943 = vst [vmem:[#allocation149_spill] sm:$0xff] %v6117_v38  ;;  %2425 = vst [vmem:[#allocation2 + $0x20] sm:$0xff] %v2172_v31  ;;  %v2174_v8 = vadd.f32 %v2173_v7, %v6035_v33  ;;  %v2335_v41 = vadd.f32 %v2334_v26, %v6039_v10  ;;  %v6131_v31 = vld [vmem:[%s6893_s5 + $0x128] sm:$0xff]  ;;  %v6137_v38 = vld [vmem:[%s6893_s5 + $0x138] sm:$0xff] }
 0x627   :  { %2427 = vst [vmem:[#allocation2 + $0x30] sm:$0xff] %v2333_v28  ;;  %v2177_v60 = vpop.f32.mrf.mxu1  ;;  %v2338_v52 = vpop.f32.mrf.mxu0  ;;  %6947 = vst [vmem:[#allocation153_spill] sm:$0xff] %v6131_v31  ;;  %v6134_v28 = vld [vmem:[%s6893_s5 + $0x130] sm:$0xff]  ;;  %v6157_v31 = vld [vmem:[%s6893_s5 + $0x168] sm:$0xff] }
 0x628   :  { %6948 = vst [vmem:[#allocation154_spill] sm:$0xff] %v6134_v28  ;;  %6949 = vst [vmem:[#allocation155_spill] sm:$0xff] %v6137_v38  ;;  %v2178_v26 = vadd.f32 %v2177_v60, %v6009_v58  ;;  %v2339_v7 = vadd.f32 %v2338_v52, %v6013_v35 }
 0x629   :  { %2426 = vst [vmem:[#allocation2 + $0x28] sm:$0xff] %v2174_v8  ;;  %2428 = vst [vmem:[#allocation2 + $0x38] sm:$0xff] %v2335_v41  ;;  %v2179_v28 = vpop.f32.mrf.mxu1  ;;  %v2340_v38 = vpop.f32.mrf.mxu0  ;;  %v6151_v8 = vld [vmem:[%s6893_s5 + $0x158] sm:$0xff]  ;;  %v6154_v41 = vld [vmem:[%s6893_s5 + $0x160] sm:$0xff] }
 0x62a   :  { %6953 = vst [vmem:[#allocation159_spill] sm:$0xff] %v6151_v8  ;;  %6954 = vst [vmem:[#allocation160_spill] sm:$0xff] %v6154_v41  ;;  %v2180_v60 = vadd.f32 %v2179_v28, %v6035_v33  ;;  %v2341_v52 = vadd.f32 %v2340_v38, %v6039_v10 }
 0x62b   :  { %6955 = vst [vmem:[#allocation161_spill] sm:$0xff] %v6157_v31  ;;  %2429 = vst [vmem:[#allocation2 + $0x40] sm:$0xff] %v2178_v26  ;;  %v2183_v8 = vpop.f32.mrf.mxu1  ;;  %v2344_v41 = vpop.f32.mrf.mxu0  ;;  %v6171_v26 = vld [vmem:[%s6893_s5 + $0x188] sm:$0xff]  ;;  %v6177_v31 = vld [vmem:[%s6893_s5 + $0x198] sm:$0xff] }
 0x62c   :  { %2431 = vst [vmem:[#allocation2 + $0x50] sm:$0xff] %v2339_v7  ;;  %6959 = vst [vmem:[#allocation165_spill] sm:$0xff] %v6171_v26  ;;  %v6174_v7 = vld [vmem:[%s6893_s5 + $0x190] sm:$0xff]  ;;  %v2184_v38 = vadd.f32 %v2183_v8, %v6009_v58  ;;  %v2345_v28 = vadd.f32 %v2344_v41, %v6013_v35  ;;  %v6197_v26 = vld [vmem:[%s6893_s5 + $0x1c8] sm:$0xff] }
 0x62d   :  { %6960 = vst [vmem:[#allocation166_spill] sm:$0xff] %v6174_v7  ;;  %6961 = vst [vmem:[#allocation167_spill] sm:$0xff] %v6177_v31  ;;  %v2185_v7 = vpop.f32.mrf.mxu1  ;;  %v2346_v31 = vpop.f32.mrf.mxu0 }
 0x62e   :  { %2430 = vst [vmem:[#allocation2 + $0x48] sm:$0xff] %v2180_v60  ;;  %2432 = vst [vmem:[#allocation2 + $0x58] sm:$0xff] %v2341_v52  ;;  %v6191_v60 = vld [vmem:[%s6893_s5 + $0x1b8] sm:$0xff]  ;;  %v6194_v52 = vld [vmem:[%s6893_s5 + $0x1c0] sm:$0xff]  ;;  %v2186_v8 = vadd.f32 %v2185_v7, %v6035_v33  ;;  %v2347_v41 = vadd.f32 %v2346_v31, %v6039_v10 }
 0x62f   :  { %6965 = vst [vmem:[#allocation171_spill] sm:$0xff] %v6191_v60  ;;  %6966 = vst [vmem:[#allocation172_spill] sm:$0xff] %v6194_v52  ;;  %v2189_v1 = vpop.f32.mrf.mxu1  ;;  %v2350_v39 = vpop.f32.mrf.mxu0  ;;  %v6211_v60 = vld [vmem:[%s6893_s5 + $0x1e8] sm:$0xff]  ;;  %v6214_v52 = vld [vmem:[%s6893_s5 + $0x1f0] sm:$0xff] }
 0x630   :  { %6967 = vst [vmem:[#allocation173_spill] sm:$0xff] %v6197_v26  ;;  %2433 = vst [vmem:[#allocation2 + $0x60] sm:$0xff] %v2184_v38  ;;  %v6217_v26 = vld [vmem:[%s6893_s5 + $0x1f8] sm:$0xff]  ;;  %v2190_v7 = vadd.f32 %v2189_v1, %v6009_v58  ;;  %v2351_v31 = vadd.f32 %v2350_v39, %v6013_v35  ;;  %v6222_v38 = vld [vmem:[%s6968_s13] sm:$0xf] }
 0x631   :  { %2435 = vst [vmem:[#allocation2 + $0x70] sm:$0xff] %v2345_v28  ;;  %6972 = vst [vmem:[#allocation177_spill] sm:$0xff] %v6211_v60  ;;  %v2191_v28 = vpop.f32.mrf.mxu1  ;;  %v2352_v36 = vpop.f32.mrf.mxu0 }
 0x632   :  { %6973 = vst [vmem:[#allocation178_spill] sm:$0xff] %v6214_v52  ;;  %2434 = vst [vmem:[#allocation2 + $0x68] sm:$0xff] %v2186_v8  ;;  %v2192_v48 = vadd.f32 %v2191_v28, %v6035_v33  ;;  %v2353_v9 = vadd.f32 %v2352_v36, %v6039_v10 }
 0x633   :  { %2436 = vst [vmem:[#allocation2 + $0x78] sm:$0xff] %v2347_v41  ;;  %6974 = vst [vmem:[#allocation179_spill] sm:$0xff] %v6222_v38  ;;  %v2195_v60 = vpop.f32.mrf.mxu1  ;;  %v2356_v52 = vpop.f32.mrf.mxu0 }
 0x634   :  { %2437 = vst [vmem:[#allocation2 + $0x80] sm:$0xff] %v2190_v7  ;;  %2439 = vst [vmem:[#allocation2 + $0x90] sm:$0xff] %v2351_v31  ;;  %v2196_v8 = vadd.f32 %v2195_v60, %v6009_v58  ;;  %v2357_v1 = vadd.f32 %v2356_v52, %v6013_v35 }
 0x635   :  { %2438 = vst [vmem:[#allocation2 + $0x88] sm:$0xff] %v2192_v48  ;;  %2440 = vst [vmem:[#allocation2 + $0x98] sm:$0xff] %v2353_v9  ;;  %v2197_v41 = vpop.f32.mrf.mxu1  ;;  %v2358_v39 = vpop.f32.mrf.mxu0 }
 0x636   :  { %2441 = vst [vmem:[#allocation2 + $0xa0] sm:$0xff] %v2196_v8  ;;  %2443 = vst [vmem:[#allocation2 + $0xb0] sm:$0xff] %v2357_v1  ;;  %v2198_v38 = vadd.f32 %v2197_v41, %v6035_v33  ;;  %v2359_v7 = vadd.f32 %v2358_v39, %v6039_v10 }
 0x637   :  { %v2201_v31 = vpop.f32.mrf.mxu1  ;;  %v2362_v28 = vpop.f32.mrf.mxu0 }
 0x638   :  { %2442 = vst [vmem:[#allocation2 + $0xa8] sm:$0xff] %v2198_v38  ;;  %2444 = vst [vmem:[#allocation2 + $0xb8] sm:$0xff] %v2359_v7  ;;  %v2202_v36 = vadd.f32 %v2201_v31, %v6009_v58  ;;  %v2363_v48 = vadd.f32 %v2362_v28, %v6013_v35 }
 0x639   :  { %v2203_v9 = vpop.f32.mrf.mxu1  ;;  %v2364_v60 = vpop.f32.mrf.mxu0 }
 0x63a   :  { %2445 = vst [vmem:[#allocation2 + $0xc0] sm:$0xff] %v2202_v36  ;;  %2447 = vst [vmem:[#allocation2 + $0xd0] sm:$0xff] %v2363_v48  ;;  %v2204_v52 = vadd.f32 %v2203_v9, %v6035_v33  ;;  %v2365_v8 = vadd.f32 %v2364_v60, %v6039_v10 }
 0x63b   :  { %v2207_v1 = vpop.f32.mrf.mxu1  ;;  %v2368_v41 = vpop.f32.mrf.mxu0 }
 0x63c   :  { %2446 = vst [vmem:[#allocation2 + $0xc8] sm:$0xff] %v2204_v52  ;;  %2448 = vst [vmem:[#allocation2 + $0xd8] sm:$0xff] %v2365_v8  ;;  %v2208_v39 = vadd.f32 %v2207_v1, %v6009_v58  ;;  %v2369_v38 = vadd.f32 %v2368_v41, %v6013_v35 }
 0x63d   :  { %v2209_v7 = vpop.f32.mrf.mxu1  ;;  %v2370_v31 = vpop.f32.mrf.mxu0 }
 0x63e   :  { %2449 = vst [vmem:[#allocation2 + $0xe0] sm:$0xff] %v2208_v39  ;;  %2451 = vst [vmem:[#allocation2 + $0xf0] sm:$0xff] %v2369_v38  ;;  %v2210_v28 = vadd.f32 %v2209_v7, %v6035_v33  ;;  %v2371_v36 = vadd.f32 %v2370_v31, %v6039_v10 }
 0x63f   :  { %v2213_v48 = vpop.f32.mrf.mxu1  ;;  %v2374_v9 = vpop.f32.mrf.mxu0 }
 0x640   :  { %2450 = vst [vmem:[#allocation2 + $0xe8] sm:$0xff] %v2210_v28  ;;  %2452 = vst [vmem:[#allocation2 + $0xf8] sm:$0xff] %v2371_v36  ;;  %v2214_v60 = vadd.f32 %v2213_v48, %v6009_v58  ;;  %v2375_v52 = vadd.f32 %v2374_v9, %v6013_v35 }
 0x641   :  { %v2215_v8 = vpop.f32.mrf.mxu1  ;;  %v2376_v1 = vpop.f32.mrf.mxu0 }
 0x642   :  { %2453 = vst [vmem:[#allocation2 + $0x100] sm:$0xff] %v2214_v60  ;;  %2455 = vst [vmem:[#allocation2 + $0x110] sm:$0xff] %v2375_v52  ;;  %v2216_v41 = vadd.f32 %v2215_v8, %v6035_v33  ;;  %v2377_v39 = vadd.f32 %v2376_v1, %v6039_v10 }
 0x643   :  { %v2219_v38 = vpop.f32.mrf.mxu1  ;;  %v2380_v7 = vpop.f32.mrf.mxu0 }
 0x644   :  { %2454 = vst [vmem:[#allocation2 + $0x108] sm:$0xff] %v2216_v41  ;;  %2456 = vst [vmem:[#allocation2 + $0x118] sm:$0xff] %v2377_v39  ;;  %v2220_v31 = vadd.f32 %v2219_v38, %v6009_v58  ;;  %v2381_v28 = vadd.f32 %v2380_v7, %v6013_v35 }
 0x645   :  { %v2221_v36 = vpop.f32.mrf.mxu1  ;;  %v2382_v48 = vpop.f32.mrf.mxu0 }
 0x646   :  { %2457 = vst [vmem:[#allocation2 + $0x120] sm:$0xff] %v2220_v31  ;;  %2459 = vst [vmem:[#allocation2 + $0x130] sm:$0xff] %v2381_v28  ;;  %v2222_v9 = vadd.f32 %v2221_v36, %v6035_v33  ;;  %v2383_v60 = vadd.f32 %v2382_v48, %v6039_v10 }
 0x647   :  { %v2225_v52 = vpop.f32.mrf.mxu1  ;;  %v2386_v8 = vpop.f32.mrf.mxu0 }
 0x648   :  { %2458 = vst [vmem:[#allocation2 + $0x128] sm:$0xff] %v2222_v9  ;;  %2460 = vst [vmem:[#allocation2 + $0x138] sm:$0xff] %v2383_v60  ;;  %v2226_v1 = vadd.f32 %v2225_v52, %v6009_v58  ;;  %v2387_v41 = vadd.f32 %v2386_v8, %v6013_v35 }
 0x649   :  { %v2227_v39 = vpop.f32.mrf.mxu1  ;;  %v2388_v38 = vpop.f32.mrf.mxu0 }
 0x64a   :  { %2461 = vst [vmem:[#allocation2 + $0x140] sm:$0xff] %v2226_v1  ;;  %2463 = vst [vmem:[#allocation2 + $0x150] sm:$0xff] %v2387_v41  ;;  %v2228_v7 = vadd.f32 %v2227_v39, %v6035_v33  ;;  %v2389_v31 = vadd.f32 %v2388_v38, %v6039_v10 }
 0x64b   :  { %v2231_v28 = vpop.f32.mrf.mxu1  ;;  %v2392_v36 = vpop.f32.mrf.mxu0 }
 0x64c   :  { %2462 = vst [vmem:[#allocation2 + $0x148] sm:$0xff] %v2228_v7  ;;  %2464 = vst [vmem:[#allocation2 + $0x158] sm:$0xff] %v2389_v31  ;;  %v2232_v48 = vadd.f32 %v2231_v28, %v6009_v58  ;;  %v2393_v9 = vadd.f32 %v2392_v36, %v6013_v35 }
 0x64d   :  { %v2233_v60 = vpop.f32.mrf.mxu1  ;;  %v2394_v52 = vpop.f32.mrf.mxu0 }
 0x64e   :  { %2465 = vst [vmem:[#allocation2 + $0x160] sm:$0xff] %v2232_v48  ;;  %2467 = vst [vmem:[#allocation2 + $0x170] sm:$0xff] %v2393_v9  ;;  %v2234_v8 = vadd.f32 %v2233_v60, %v6035_v33  ;;  %v2395_v1 = vadd.f32 %v2394_v52, %v6039_v10 }
 0x64f   :  { %v2237_v41 = vpop.f32.mrf.mxu1 }
 0x650   :  { %2466 = vst [vmem:[#allocation2 + $0x168] sm:$0xff] %v2234_v8  ;;  %2468 = vst [vmem:[#allocation2 + $0x178] sm:$0xff] %v2395_v1  ;;  %v2238_v39 = vadd.f32 %v2237_v41, %v6009_v58 }
 0x651   :  { %v2239_v38 = vpop.f32.mrf.mxu1 }
 0x652   :  { %2469 = vst [vmem:[#allocation2 + $0x180] sm:$0xff] %v2238_v39  ;;  %v2240_v7 = vadd.f32 %v2239_v38, %v6035_v33 }
 0x653   :  { %v2243_v31 = vpop.f32.mrf.mxu1 }
 0x654   :  { %2470 = vst [vmem:[#allocation2 + $0x188] sm:$0xff] %v2240_v7  ;;  %v2244_v28 = vadd.f32 %v2243_v31, %v6009_v58 }
 0x655   :  { %v2245_v36 = vpop.f32.mrf.mxu1 }
 0x656   :  { %2473 = vst [vmem:[#allocation2 + $0x1a0] sm:$0xff] %v2244_v28  ;;  %v2246_v48 = vadd.f32 %v2245_v36, %v6035_v33 }
 0x657   :  { %v2249_v9 = vpop.f32.mrf.mxu1 }
 0x658   :  { %2474 = vst [vmem:[#allocation2 + $0x1a8] sm:$0xff] %v2246_v48  ;;  %v2250_v60 = vadd.f32 %v2249_v9, %v6009_v58 }
 0x659   :  { %v2251_v52 = vpop.f32.mrf.mxu1 }
 0x65a   :  { %2477 = vst [vmem:[#allocation2 + $0x1c0] sm:$0xff] %v2250_v60  ;;  %v2252_v8 = vadd.f32 %v2251_v52, %v6035_v33 }
 0x65b   :  { %v2255_v1 = vpop.f32.mrf.mxu1 }
 0x65c   :  { %2478 = vst [vmem:[#allocation2 + $0x1c8] sm:$0xff] %v2252_v8  ;;  %v2256_v41 = vadd.f32 %v2255_v1, %v6009_v58 }
 0x65d   :  { %v2257_v39 = vpop.f32.mrf.mxu1 }
 0x65e   :  { %2481 = vst [vmem:[#allocation2 + $0x1e0] sm:$0xff] %v2256_v41  ;;  %v2258_v38 = vadd.f32 %v2257_v39, %v6035_v33 }
 0x65f   :  { %v2398_v7 = vpop.f32.mrf.mxu1 }
 0x660   :  { %2482 = vst [vmem:[#allocation2 + $0x1e8] sm:$0xff] %v2258_v38  ;;  %v2399_v31 = vadd.f32 %v2398_v7, %v6013_v35 }
 0x661   :  { %v2400_v28 = vpop.f32.mrf.mxu1 }
 0x662   :  { %2471 = vst [vmem:[#allocation2 + $0x190] sm:$0xff] %v2399_v31  ;;  %v2401_v36 = vadd.f32 %v2400_v28, %v6039_v10  ;;  %v6270_v31 = vmov 0.0   ;;  %v6272_v28 = vmov 0.0  }
 0x663   :  { %v2404_v48 = vpop.f32.mrf.mxu1 }
 0x664   :  { %2472 = vst [vmem:[#allocation2 + $0x198] sm:$0xff] %v2401_v36  ;;  %v2405_v9 = vadd.f32 %v2404_v48, %v6013_v35  ;;  %v6274_v36 = vmov 0.0   ;;  %v6276_v48 = vmov 0.0  }
 0x665   :  { %v2406_v60 = vpop.f32.mrf.mxu1 }
 0x666   :  { %2475 = vst [vmem:[#allocation2 + $0x1b0] sm:$0xff] %v2405_v9  ;;  %v2407_v58 = vadd.f32 %v2406_v60, %v6039_v10 }
 0x667   :  { %v2410_v52 = vpop.f32.mrf.mxu1 }
 0x668   :  { %2476 = vst [vmem:[#allocation2 + $0x1b8] sm:$0xff] %v2407_v58  ;;  %v2411_v33 = vadd.f32 %v2410_v52, %v6013_v35 }
 0x669   :  { %v2412_v8 = vpop.f32.mrf.mxu1 }
 0x66a   :  { %2479 = vst [vmem:[#allocation2 + $0x1d0] sm:$0xff] %v2411_v33  ;;  %v2413_v1 = vadd.f32 %v2412_v8, %v6039_v10 }
 0x66b   :  { %v2416_v41 = vpop.f32.mrf.mxu1 }
 0x66c   :  { %2480 = vst [vmem:[#allocation2 + $0x1d8] sm:$0xff] %v2413_v1  ;;  %v2417_v39 = vadd.f32 %v2416_v41, %v6013_v35 }
 0x66d   :  { %v2418_v38 = vpop.f32.mrf.mxu1 }
 0x66e   :  { %2483 = vst [vmem:[#allocation2 + $0x1f0] sm:$0xff] %v2417_v39  ;;  %v2419_v7 = vadd.f32 %v2418_v38, %v6039_v10 }
 0x670   :  { %2484 = vst [vmem:[#allocation2 + $0x1f8] sm:$0xff] %v2419_v7 }
 0x671 LB: > { %v6975_v2 = vld [vmem:[#allocation51_spill] sm:$0xff]  ;;  %2766 = vmatprep.subr.mxu1 %v5796_v20  ;;  %v6976_v5 = vld [vmem:[#allocation50_spill] sm:$0xff]  ;;  %v6977_v12 = vld [vmem:[#allocation48_spill] sm:$0xff]  ;;  %v4740_v35 = vmov 0.0   ;;  %s3902_s21 = sshll.u32 %s4704_s17, 5  ;;  %s2683_s17 = sadd.s32 1, %s4704_s17   ;;  %s4704_s17 = sphi %s6278_s17, %s2683_s17   ;;  %v4700_v48 = vphi %v6276_v48, %v2864_v48   ;;  %v4696_v36 = vphi %v6274_v36, %v2862_v36   ;;  %v4692_v28 = vphi %v6272_v28, %v7136_v28   ;;  %v4688_v31 = vphi %v6270_v31, %v3195_v31  }
 0x672   : > { %2695 = vmatprep.subr.mxu0 %v6975_v2  ;;  %2767 = vmatpush1.msra.mxu1 %v5793_v32  ;;  %v6978_v0 = vld [vmem:[#allocation49_spill] sm:$0xff]  ;;  %v6979_v11 = vld [vmem:[#allocation47_spill] sm:$0xff]  ;;  %v6980_v3 = vld [vmem:[#allocation46_spill] sm:$0xff]  ;;  %s2690_s25 = scalar_lea.vmem [#allocation2], %s3902_s21  ;;  %p2680_p0 = scmp.ge.s32.totalorder %s2683_s17, 16  }
 0x673   : > { %2696 = vmatpush1.msra.mxu0 %v5787_v15  ;;  %2768 = vmatprep.subr.mxu1 %v5784_v24  ;;  %v6981_v6 = vld [vmem:[#allocation45_spill] sm:$0xff]  ;;  %v6982_v4 = vld [vmem:[#allocation44_spill] sm:$0xff]  ;;  %v6983_v13 = vld [vmem:[#allocation43_spill] sm:$0xff]  ;;  %s7138_s29 = sld [smem:[#allocation11_spill]] (%p2680_p0)  ;;  %vm4741_vm2 = vmmov (%p2680_p0), 0  }
 0x674   : > { %2697 = vmatprep.subr.mxu0 %v6976_v5  ;;  %2769 = vmatpush1.msra.mxu1 %v5781_v45  ;;  %v6984_v10 = vld [vmem:[#allocation42_spill] sm:$0xff]  ;;  %v6985_v9 = vld [vmem:[#allocation28_spill] sm:$0xff]  ;;  %v6986_v60 = vld [vmem:[#allocation41_spill] sm:$0xff]  ;;  %s7139_s3 = sld [smem:[#allocation10_spill]] (%p2680_p0) }
 0x675   : > { %2698 = vmatpush1.msra.mxu0 %v5775_v55  ;;  %2770 = vmatprep.subr.mxu1 %v5772_v49  ;;  %v6987_v58 = vld [vmem:[#allocation38_spill] sm:$0xff]  ;;  %v6988_v52 = vld [vmem:[#allocation40_spill] sm:$0xff]  ;;  %v6989_v33 = vld [vmem:[#allocation29_spill] sm:$0xff]  ;;  %s7140_s8 = sld [smem:[#allocation6_spill]] (%p2680_p0) }
 0x676   : > { %2699 = vmatprep.subr.mxu0 %v5766_v29  ;;  %2771 = vmatpush1.msra.mxu1 %v5769_v54  ;;  %v6990_v8 = vld [vmem:[#allocation39_spill] sm:$0xff]  ;;  %v6992_v41 = vld [vmem:[#allocation37_spill] sm:$0xff]  ;;  %v6994_v38 = vld [vmem:[#allocation36_spill] sm:$0xff]  ;;  %s7141_s14 = sld [smem:[#allocation12_spill]] (%p2680_p0) }
 0x677   : > { %2700 = vmatpush1.msra.mxu0 %v5763_v25  ;;  %2772 = vmatprep.subr.mxu1 %v5760_v23  ;;  %v6991_v1 = vld [vmem:[#allocation35_spill] sm:$0xff]  ;;  %v6993_v39 = vld [vmem:[#allocation33_spill] sm:$0xff]  ;;  %v6995_v7 = vld [vmem:[#allocation32_spill] sm:$0xff]  ;;  %s7142_s19 = sld [smem:[#allocation15_spill]] (%p2680_p0) }
 0x678   : > { %2701 = vmatprep.subr.mxu0 %v5754_v27  ;;  %2773 = vmatpush1.msra.mxu1 %v5757_v34  ;;  %v7143_v20 = vld [vmem:[#allocation24_spill] sm:$0xff] (%p2680_p0)  ;;  %s7144_s24 = sld [smem:[#allocation17_spill]] (%p2680_p0) }
 0x679   : > { %2702 = vmatpush1.msra.mxu0 %v5751_v22  ;;  %2774 = vmatprep.subr.mxu1 %v5748_v18  ;;  %v3217_v18 = vld [vmem:[%s7138_s29 + $0x10] sm:$0xff] (%p2680_p0)  ;;  %v3216_v27 = vld [vmem:[%s7138_s29 + $0x8] sm:$0xff] (%p2680_p0)  ;;  %v3215_v23 = vld [vmem:[%s7138_s29] sm:$0xff] (%p2680_p0)  ;;  %s7145_s30 = sld [smem:[#allocation13_spill]] (%p2680_p0) }
 0x67a   : > { %2703 = vmatprep.subr.mxu0 %v6977_v12  ;;  %2775 = vmatpush1.msra.mxu1 %v6978_v0  ;;  %v3200_v22 = vld [vmem:[%s7139_s3 + $0x10] sm:$0xff] (%p2680_p0)  ;;  %v3199_v34 = vld [vmem:[%s7139_s3 + $0x8] sm:$0xff] (%p2680_p0)  ;;  %v3198_v25 = vld [vmem:[%s7139_s3] sm:$0xff] (%p2680_p0)  ;;  %s7146_s6 = sld [smem:[#allocation14_spill]] (%p2680_p0) }
 0x67b   : > { %2704 = vmatpush1.msra.mxu0 %v5739_v46  ;;  %2776 = vmatprep.subr.mxu1 %v5736_v47  ;;  %v3218_v47 = vld [vmem:[%s7138_s29 + $0x18] sm:$0xff] (%p2680_p0)  ;;  %v3214_v29 = vld [vmem:[%s7140_s8] sm:$0xff] (%p2680_p0)  ;;  %s7147_s20 = sld [smem:[#allocation16_spill]] (%p2680_p0) }
 0x67c   : > { %2705 = vmatprep.subr.mxu0 %v5730_v61  ;;  %2777 = vmatpush1.msra.mxu1 %v5733_v21  ;;  %v3219_v61 = vld [vmem:[%s7138_s29 + $0x20] sm:$0xff] (%p2680_p0)  ;;  %v3201_v46 = vld [vmem:[%s7139_s3 + $0x18] sm:$0xff] (%p2680_p0)  ;;  %s7148_s7 = sld [smem:[#allocation18_spill]] (%p2680_p0) }
 0x67d   : > { %2706 = vmatpush1.msra.mxu0 %v5727_v43  ;;  %2778 = vmatprep.subr.mxu1 %v5724_v16  ;;  %v3220_v16 = vld [vmem:[%s7138_s29 + $0x28] sm:$0xff] (%p2680_p0)  ;;  %v3202_v21 = vld [vmem:[%s7139_s3 + $0x20] sm:$0xff] (%p2680_p0)  ;;  %s7150_s10 = sld [smem:[#allocation20_spill]] (%p2680_p0) }
 0x67e   : > { %2707 = vmatprep.subr.mxu0 %v5718_v51  ;;  %2779 = vmatpush1.msra.mxu1 %v5721_v19  ;;  %v3221_v51 = vld [vmem:[%s7138_s29 + $0x30] sm:$0xff] (%p2680_p0)  ;;  %v3203_v43 = vld [vmem:[%s7139_s3 + $0x28] sm:$0xff] (%p2680_p0)  ;;  %v3892_v55 = vld [vmem:[%s7141_s14] ss:$0 sm:$0xff] (%p2680_p0) }
 0x67f   : > { %2708 = vmatpush1.msra.mxu0 %v6979_v11  ;;  %2780 = vmatprep.subr.mxu1 %v6980_v3  ;;  %v3204_v19 = vld [vmem:[%s7139_s3 + $0x30] sm:$0xff] (%p2680_p0) }
 0x680   : > { %2709 = vmatprep.subr.mxu0 %v5706_v57  ;;  %2759 = vmatprep.mubr.f32.mxu0 %v4740_v35  ;;  %v3222_v57 = vld [vmem:[%s7138_s29 + $0x38] sm:$0xff] (%p2680_p0) }
 0x681   : > { %2710 = vmatpush1.msra.mxu0 %v5703_v40  ;;  %2781 = vmatpush1.msra.mxu1 %v5709_v56  ;;  %v3206_v40 = vld [vmem:[%s7139_s3 + $0x40] sm:$0xff] (%p2680_p0)  ;;  %v3205_v56 = vld [vmem:[%s7139_s3 + $0x38] sm:$0xff] (%p2680_p0) }
 0x682   : > { %2711 = vmatprep.subr.mxu0 %v5694_v62  ;;  %2782 = vmatprep.subr.mxu1 %v6981_v6  ;;  %v3223_v62 = vld [vmem:[%s7138_s29 + $0x40] sm:$0xff] (%p2680_p0) }
 0x683   : > { %2712 = vmatpush1.msra.mxu0 %v5691_v17  ;;  %2783 = vmatpush1.msra.mxu1 %v6982_v4  ;;  %v3207_v17 = vld [vmem:[%s7139_s3 + $0x48] sm:$0xff] (%p2680_p0) }
 0x684   : > { %2713 = vmatprep.subr.mxu0 %v5682_v53  ;;  %2784 = vmatprep.subr.mxu1 %v5688_v50  ;;  %v3225_v53 = vld [vmem:[%s7138_s29 + $0x50] sm:$0xff] (%p2680_p0)  ;;  %v3224_v50 = vld [vmem:[%s7138_s29 + $0x48] sm:$0xff] (%p2680_p0) }
 0x685   : > { %2714 = vmatpush1.msra.mxu0 %v5679_v30  ;;  %2785 = vmatpush1.msra.mxu1 %v5685_v44  ;;  %v3209_v30 = vld [vmem:[%s7139_s3 + $0x58] sm:$0xff] (%p2680_p0)  ;;  %v3208_v44 = vld [vmem:[%s7139_s3 + $0x50] sm:$0xff] (%p2680_p0) }
 0x686   : > { %2715 = vmatprep.subr.mxu0 %v5670_v63  ;;  %2786 = vmatprep.subr.mxu1 %v6983_v13  ;;  %v3210_v63 = vld [vmem:[%s7139_s3 + $0x60] sm:$0xff] (%p2680_p0) }
 0x687   : > { %2716 = vmatpush1.msra.mxu0 %v5667_v42  ;;  %2787 = vmatpush1.msra.mxu1 %v5673_v59  ;;  %v3227_v42 = vld [vmem:[%s7138_s29 + $0x60] sm:$0xff] (%p2680_p0)  ;;  %v3226_v59 = vld [vmem:[%s7138_s29 + $0x58] sm:$0xff] (%p2680_p0) }
 0x688   : > { %2717 = vmatprep.subr.mxu0 %v5658_v37  ;;  %2788 = vmatprep.subr.mxu1 %v6984_v10  ;;  %v6996_v10 = vld [vmem:[#allocation34_spill] sm:$0xff] }
 0x689   : > { %2718 = vmatpush1.msra.mxu0 %v5655_v14  ;;  %2789 = vmatpush1.msra.mxu1 %v6986_v60  ;;  %v6998_v60 = vld [vmem:[#allocation26_spill] sm:$0xff] }
 0x68a   : > { %2719 = vmatprep.subr.mxu0 %v6985_v9  ;;  %2790 = vmatprep.subr.mxu1 %v6988_v52  ;;  %v6997_v9 = vld [vmem:[#allocation30_spill] sm:$0xff]  ;;  %v7000_v52 = vld [vmem:[#allocation27_spill] sm:$0xff] }
 0x68b   : > { %2720 = vmatpush1.msra.mxu0 %v6987_v58  ;;  %2791 = vmatpush1.msra.mxu1 %v6990_v8  ;;  %v6999_v58 = vld [vmem:[#allocation25_spill] sm:$0xff]  ;;  %v3228_v14 = vld [vmem:[%s7138_s29 + $0x68] sm:$0xff] (%p2680_p0) }
 0x68c   : > { %2721 = vmatprep.subr.mxu0 %v6989_v33  ;;  %2792 = vmatprep.subr.mxu1 %v6992_v41  ;;  %v7001_v33 = vld [vmem:[#allocation31_spill] sm:$0xff]  ;;  %v7002_v8 = vld [vmem:[#allocation177_spill] sm:$0xff] }
 0x68d   : > { %2722 = vmatpush1.msra.mxu0 %v6991_v1  ;;  %2793 = vmatpush1.msra.mxu1 %v6994_v38  ;;  %v7003_v1 = vld [vmem:[#allocation176_spill] sm:$0xff]  ;;  %v7004_v41 = vld [vmem:[#allocation173_spill] sm:$0xff]  ;;  %v3211_v37 = vld [vmem:[%s7139_s3 + $0x68] sm:$0xff] (%p2680_p0) }
 0x68e   : > { %2723 = vmatprep.subr.mxu0 %v6993_v39  ;;  %2794 = vmatprep.subr.mxu1 %v6996_v10  ;;  %v7005_v39 = vld [vmem:[#allocation178_spill] sm:$0xff]  ;;  %v7006_v38 = vld [vmem:[#allocation172_spill] sm:$0xff]  ;;  %v7008_v10 = vld [vmem:[#allocation169_spill] sm:$0xff] }
 0x68f   : > { %2724 = vmatpush1.msra.mxu0 %v6995_v7  ;;  %2795 = vmatpush1.msra.mxu1 %v6998_v60  ;;  %v7007_v7 = vld [vmem:[#allocation175_spill] sm:$0xff]  ;;  %v7010_v60 = vld [vmem:[#allocation168_spill] sm:$0xff] }
 0x690   : > { %2725 = vmatprep.subr.mxu0 %v6997_v9  ;;  %2796 = vmatprep.subr.mxu1 %v7000_v52  ;;  %v7009_v9 = vld [vmem:[#allocation174_spill] sm:$0xff] }
 0x691   : > { %2726 = vmatpush1.msra.mxu0 %v6999_v58  ;;  %2797 = vmatpush1.msra.mxu1 %v7001_v33  ;;  %v7011_v58 = vld [vmem:[#allocation171_spill] sm:$0xff]  ;;  %v7013_v52 = vld [vmem:[#allocation170_spill] sm:$0xff]  ;;  %v7014_v33 = vld [vmem:[#allocation164_spill] sm:$0xff] }
 0x692   : > { %2760 = vmatmul.mubr.f32.vlgmr.msra.gmra.mxu0 %v4700_v48  ;;  %2830 = vmatprep.mubr.f32.mxu1 %v4740_v35 }
 0x693   : > { %2865 = vmatprep.subr.mxu0 %v7002_v8  ;;  %2831 = vmatmul.mubr.f32.vlgmr.msra.gmra.mxu1 %v4700_v48  ;;  %v7012_v48 = vld [vmem:[#allocation165_spill] sm:$0xff]  ;;  %v7015_v8 = vld [vmem:[#allocation167_spill] sm:$0xff] }
 0x694   : > { %2866 = vmatpush1.msra.mxu0 %v7003_v1  ;;  %2936 = vmatprep.subr.mxu1 %v6217_v26  ;;  %v7016_v1 = vld [vmem:[#allocation161_spill] sm:$0xff] }
 0x695   : > { %2867 = vmatprep.subr.mxu0 %v7004_v41  ;;  %2937 = vmatpush1.msra.mxu1 %v7005_v39  ;;  %v7017_v41 = vld [vmem:[#allocation166_spill] sm:$0xff]  ;;  %v7018_v39 = vld [vmem:[#allocation160_spill] sm:$0xff] }
 0x696   : > { %2868 = vmatpush1.msra.mxu0 %v7006_v38  ;;  %2938 = vmatprep.subr.mxu1 %v7007_v7  ;;  %v7019_v38 = vld [vmem:[#allocation163_spill] sm:$0xff]  ;;  %v7020_v7 = vld [vmem:[#allocation157_spill] sm:$0xff] }
 0x697   : > { %2869 = vmatprep.subr.mxu0 %v7008_v10  ;;  %2939 = vmatpush1.msra.mxu1 %v7009_v9  ;;  %v7021_v10 = vld [vmem:[#allocation162_spill] sm:$0xff]  ;;  %v7022_v9 = vld [vmem:[#allocation156_spill] sm:$0xff] }
 0x698   : > { %2870 = vmatpush1.msra.mxu0 %v7010_v60  ;;  %2940 = vmatprep.subr.mxu1 %v7011_v58  ;;  %v7023_v60 = vld [vmem:[#allocation159_spill] sm:$0xff]  ;;  %v7024_v58 = vld [vmem:[#allocation153_spill] sm:$0xff] }
 0x699   : > { %2871 = vmatprep.subr.mxu0 %v7012_v48  ;;  %2941 = vmatpush1.msra.mxu1 %v7013_v52  ;;  %v7025_v48 = vld [vmem:[#allocation158_spill] sm:$0xff]  ;;  %v7026_v52 = vld [vmem:[#allocation152_spill] sm:$0xff] }
 0x69a   : > { %2872 = vmatpush1.msra.mxu0 %v7014_v33  ;;  %2942 = vmatprep.subr.mxu1 %v7015_v8  ;;  %v7027_v33 = vld [vmem:[#allocation155_spill] sm:$0xff]  ;;  %v7028_v8 = vld [vmem:[#allocation149_spill] sm:$0xff] }
 0x69b   : > { %2873 = vmatprep.subr.mxu0 %v7016_v1  ;;  %2943 = vmatpush1.msra.mxu1 %v7017_v41  ;;  %v7029_v1 = vld [vmem:[#allocation154_spill] sm:$0xff]  ;;  %v7030_v41 = vld [vmem:[#allocation148_spill] sm:$0xff] }
 0x69c   : > { %2874 = vmatpush1.msra.mxu0 %v7018_v39  ;;  %2944 = vmatprep.subr.mxu1 %v7019_v38  ;;  %v7031_v39 = vld [vmem:[#allocation151_spill] sm:$0xff]  ;;  %v7032_v38 = vld [vmem:[#allocation145_spill] sm:$0xff] }
 0x69d   : > { %2875 = vmatprep.subr.mxu0 %v7020_v7  ;;  %2945 = vmatpush1.msra.mxu1 %v7021_v10  ;;  %v7033_v7 = vld [vmem:[#allocation150_spill] sm:$0xff]  ;;  %v7034_v10 = vld [vmem:[#allocation144_spill] sm:$0xff] }
 0x69e   : > { %2876 = vmatpush1.msra.mxu0 %v7022_v9  ;;  %2946 = vmatprep.subr.mxu1 %v7023_v60  ;;  %v7035_v9 = vld [vmem:[#allocation147_spill] sm:$0xff]  ;;  %v7036_v60 = vld [vmem:[#allocation141_spill] sm:$0xff] }
 0x69f   : > { %2877 = vmatprep.subr.mxu0 %v7024_v58  ;;  %2947 = vmatpush1.msra.mxu1 %v7025_v48  ;;  %v7037_v58 = vld [vmem:[#allocation146_spill] sm:$0xff]  ;;  %v7038_v48 = vld [vmem:[#allocation140_spill] sm:$0xff] }
 0x6a0   : > { %2878 = vmatpush1.msra.mxu0 %v7026_v52  ;;  %2948 = vmatprep.subr.mxu1 %v7027_v33  ;;  %v7039_v52 = vld [vmem:[#allocation143_spill] sm:$0xff]  ;;  %v7040_v33 = vld [vmem:[#allocation137_spill] sm:$0xff] }
 0x6a1   : > { %2879 = vmatprep.subr.mxu0 %v7028_v8  ;;  %2949 = vmatpush1.msra.mxu1 %v7029_v1  ;;  %v7041_v8 = vld [vmem:[#allocation142_spill] sm:$0xff]  ;;  %v7042_v1 = vld [vmem:[#allocation136_spill] sm:$0xff] }
 0x6a2   : > { %2880 = vmatpush1.msra.mxu0 %v7030_v41  ;;  %2950 = vmatprep.subr.mxu1 %v7031_v39  ;;  %v7043_v41 = vld [vmem:[#allocation139_spill] sm:$0xff]  ;;  %v7044_v39 = vld [vmem:[#allocation133_spill] sm:$0xff] }
 0x6a3   : > { %2881 = vmatprep.subr.mxu0 %v7032_v38  ;;  %2951 = vmatpush1.msra.mxu1 %v7033_v7  ;;  %v7045_v38 = vld [vmem:[#allocation138_spill] sm:$0xff]  ;;  %v7046_v7 = vld [vmem:[#allocation132_spill] sm:$0xff] }
 0x6a4   : > { %2882 = vmatpush1.msra.mxu0 %v7034_v10  ;;  %2952 = vmatprep.subr.mxu1 %v7035_v9  ;;  %v7047_v10 = vld [vmem:[#allocation135_spill] sm:$0xff]  ;;  %v7048_v9 = vld [vmem:[#allocation129_spill] sm:$0xff] }
 0x6a5   : > { %2883 = vmatprep.subr.mxu0 %v7036_v60  ;;  %2953 = vmatpush1.msra.mxu1 %v7037_v58  ;;  %v7049_v60 = vld [vmem:[#allocation134_spill] sm:$0xff]  ;;  %v7050_v58 = vld [vmem:[#allocation128_spill] sm:$0xff] }
 0x6a6   : > { %2884 = vmatpush1.msra.mxu0 %v7038_v48  ;;  %2954 = vmatprep.subr.mxu1 %v7039_v52  ;;  %v7051_v48 = vld [vmem:[#allocation131_spill] sm:$0xff]  ;;  %v7052_v52 = vld [vmem:[#allocation125_spill] sm:$0xff] }
 0x6a7   : > { %2885 = vmatprep.subr.mxu0 %v7040_v33  ;;  %2955 = vmatpush1.msra.mxu1 %v7041_v8  ;;  %v7053_v33 = vld [vmem:[#allocation130_spill] sm:$0xff]  ;;  %v7054_v8 = vld [vmem:[#allocation124_spill] sm:$0xff] }
 0x6a8   : > { %2886 = vmatpush1.msra.mxu0 %v7042_v1  ;;  %2956 = vmatprep.subr.mxu1 %v7043_v41  ;;  %v7055_v1 = vld [vmem:[#allocation127_spill] sm:$0xff]  ;;  %v7056_v41 = vld [vmem:[#allocation121_spill] sm:$0xff] }
 0x6a9   : > { %2887 = vmatprep.subr.mxu0 %v7044_v39  ;;  %2957 = vmatpush1.msra.mxu1 %v7045_v38  ;;  %v7057_v39 = vld [vmem:[#allocation126_spill] sm:$0xff]  ;;  %v7058_v38 = vld [vmem:[#allocation120_spill] sm:$0xff] }
 0x6aa   : > { %2888 = vmatpush1.msra.mxu0 %v7046_v7  ;;  %2958 = vmatprep.subr.mxu1 %v7047_v10  ;;  %v7059_v7 = vld [vmem:[#allocation123_spill] sm:$0xff]  ;;  %v7060_v10 = vld [vmem:[#allocation117_spill] sm:$0xff] }
 0x6ab   : > { %2889 = vmatprep.subr.mxu0 %v7048_v9  ;;  %2959 = vmatpush1.msra.mxu1 %v7049_v60  ;;  %v7061_v9 = vld [vmem:[#allocation122_spill] sm:$0xff]  ;;  %v7062_v60 = vld [vmem:[#allocation116_spill] sm:$0xff] }
 0x6ac   : > { %2890 = vmatpush1.msra.mxu0 %v7050_v58  ;;  %2960 = vmatprep.subr.mxu1 %v7051_v48  ;;  %v7063_v58 = vld [vmem:[#allocation119_spill] sm:$0xff]  ;;  %v7064_v48 = vld [vmem:[#allocation118_spill] sm:$0xff] }
 0x6ad   : > { %2891 = vmatprep.subr.mxu0 %v7052_v52  ;;  %2961 = vmatpush1.msra.mxu1 %v7053_v33  ;;  %v7065_v52 = vld [vmem:[#allocation113_spill] sm:$0xff]  ;;  %v7066_v33 = vld [vmem:[#allocation115_spill] sm:$0xff] }
 0x6ae   : > { %2892 = vmatpush1.msra.mxu0 %v7054_v8  ;;  %2962 = vmatprep.subr.mxu1 %v7055_v1  ;;  %v7067_v8 = vld [vmem:[#allocation112_spill] sm:$0xff]  ;;  %v7068_v1 = vld [vmem:[#allocation114_spill] sm:$0xff] }
 0x6af   : > { %2893 = vmatprep.subr.mxu0 %v7056_v41  ;;  %2963 = vmatpush1.msra.mxu1 %v7057_v39  ;;  %v7069_v41 = vld [vmem:[#allocation109_spill] sm:$0xff]  ;;  %v7070_v39 = vld [vmem:[#allocation111_spill] sm:$0xff] }
 0x6b0   : > { %2894 = vmatpush1.msra.mxu0 %v7058_v38  ;;  %2964 = vmatprep.subr.mxu1 %v7059_v7  ;;  %v7071_v38 = vld [vmem:[#allocation108_spill] sm:$0xff]  ;;  %v7072_v7 = vld [vmem:[#allocation110_spill] sm:$0xff] }
 0x6b1   : > { %2895 = vmatprep.subr.mxu0 %v7060_v10  ;;  %2965 = vmatpush1.msra.mxu1 %v7061_v9  ;;  %v7073_v10 = vld [vmem:[#allocation105_spill] sm:$0xff]  ;;  %v7074_v9 = vld [vmem:[#allocation107_spill] sm:$0xff] }
 0x6b2   : > { %2896 = vmatpush1.msra.mxu0 %v7062_v60  ;;  %2929 = vmatprep.mubr.f32.mxu0 %v4740_v35  ;;  %v7075_v60 = vld [vmem:[#allocation104_spill] sm:$0xff] }
 0x6b3   : > { %2966 = vmatprep.subr.mxu1 %v7063_v58  ;;  %3000 = vmatprep.mubr.f32.mxu1 %v4740_v35  ;;  %v7076_v58 = vld [vmem:[#allocation106_spill] sm:$0xff] }
 0x6b4   : > { %2967 = vmatpush1.msra.mxu1 %v7064_v48  ;;  %3007 = vmatprep.subr.mxu0 %v7065_v52  ;;  %v7078_v48 = vld [vmem:[#allocation103_spill] sm:$0xff]  ;;  %v7079_v52 = vld [vmem:[#allocation100_spill] sm:$0xff] }
 0x6b5   : > { %3078 = vmatprep.subr.mxu1 %v7066_v33  ;;  %2930 = vmatmul.mubr.f32.vlgmr.msra.gmra.mxu0 %v4692_v28  ;;  %v7080_v33 = vld [vmem:[#allocation102_spill] sm:$0xff] }
 0x6b6   : > { %3001 = vmatmul.mubr.f32.vlgmr.msra.gmra.mxu1 %v4692_v28  ;;  %3008 = vmatpush1.msra.mxu0 %v7067_v8  ;;  %v7077_v28 = vld [vmem:[#allocation101_spill] sm:$0xff] }
 0x6b7   : > { %3079 = vmatpush1.msra.mxu1 %v7068_v1  ;;  %3009 = vmatprep.subr.mxu0 %v7069_v41  ;;  %v7081_v8 = vld [vmem:[#allocation97_spill] sm:$0xff]  ;;  %v7082_v1 = vld [vmem:[#allocation99_spill] sm:$0xff]  ;;  %v7083_v41 = vld [vmem:[#allocation96_spill] sm:$0xff] }
 0x6b8   : > { %3080 = vmatprep.subr.mxu1 %v7070_v39  ;;  %3010 = vmatpush1.msra.mxu0 %v7071_v38  ;;  %v7084_v39 = vld [vmem:[#allocation98_spill] sm:$0xff]  ;;  %v7085_v38 = vld [vmem:[#allocation93_spill] sm:$0xff] }
 0x6b9   : > { %3081 = vmatpush1.msra.mxu1 %v7072_v7  ;;  %3011 = vmatprep.subr.mxu0 %v7073_v10  ;;  %v7086_v7 = vld [vmem:[#allocation95_spill] sm:$0xff]  ;;  %v7087_v10 = vld [vmem:[#allocation92_spill] sm:$0xff] }
 0x6ba   : > { %3082 = vmatprep.subr.mxu1 %v7074_v9  ;;  %3012 = vmatpush1.msra.mxu0 %v7075_v60  ;;  %v7088_v9 = vld [vmem:[#allocation94_spill] sm:$0xff]  ;;  %v7089_v60 = vld [vmem:[#allocation89_spill] sm:$0xff] }
 0x6bb   : > { %3083 = vmatpush1.msra.mxu1 %v7076_v58  ;;  %3013 = vmatprep.subr.mxu0 %v7077_v28  ;;  %v7090_v58 = vld [vmem:[#allocation91_spill] sm:$0xff]  ;;  %v7091_v28 = vld [vmem:[#allocation88_spill] sm:$0xff] }
 0x6bc   : > { %3084 = vmatprep.subr.mxu1 %v7078_v48  ;;  %3014 = vmatpush1.msra.mxu0 %v7079_v52  ;;  %v7092_v48 = vld [vmem:[#allocation90_spill] sm:$0xff]  ;;  %v7093_v52 = vld [vmem:[#allocation85_spill] sm:$0xff] }
 0x6bd   : > { %3085 = vmatpush1.msra.mxu1 %v7080_v33  ;;  %3015 = vmatprep.subr.mxu0 %v7081_v8  ;;  %v7094_v33 = vld [vmem:[#allocation87_spill] sm:$0xff]  ;;  %v7095_v8 = vld [vmem:[#allocation84_spill] sm:$0xff] }
 0x6be   : > { %3086 = vmatprep.subr.mxu1 %v7082_v1  ;;  %3016 = vmatpush1.msra.mxu0 %v7083_v41  ;;  %v7096_v1 = vld [vmem:[#allocation86_spill] sm:$0xff]  ;;  %v7097_v41 = vld [vmem:[#allocation81_spill] sm:$0xff] }
 0x6bf   : > { %3087 = vmatpush1.msra.mxu1 %v7084_v39  ;;  %3017 = vmatprep.subr.mxu0 %v7085_v38  ;;  %v7098_v39 = vld [vmem:[#allocation83_spill] sm:$0xff]  ;;  %v7099_v38 = vld [vmem:[#allocation80_spill] sm:$0xff] }
 0x6c0   : > { %3088 = vmatprep.subr.mxu1 %v7086_v7  ;;  %3018 = vmatpush1.msra.mxu0 %v7087_v10  ;;  %v7100_v7 = vld [vmem:[#allocation82_spill] sm:$0xff]  ;;  %v7101_v10 = vld [vmem:[#allocation77_spill] sm:$0xff] }
 0x6c1   : > { %3089 = vmatpush1.msra.mxu1 %v7088_v9  ;;  %3019 = vmatprep.subr.mxu0 %v7089_v60  ;;  %v7102_v9 = vld [vmem:[#allocation79_spill] sm:$0xff]  ;;  %v7103_v60 = vld [vmem:[#allocation76_spill] sm:$0xff] }
 0x6c2   : > { %3090 = vmatprep.subr.mxu1 %v7090_v58  ;;  %3020 = vmatpush1.msra.mxu0 %v7091_v28  ;;  %v7104_v58 = vld [vmem:[#allocation78_spill] sm:$0xff]  ;;  %v7105_v28 = vld [vmem:[#allocation73_spill] sm:$0xff] }
 0x6c3   : > { %3091 = vmatpush1.msra.mxu1 %v7092_v48  ;;  %3021 = vmatprep.subr.mxu0 %v7093_v52  ;;  %v7106_v48 = vld [vmem:[#allocation75_spill] sm:$0xff]  ;;  %v7107_v52 = vld [vmem:[#allocation72_spill] sm:$0xff] }
 0x6c4   : > { %3092 = vmatprep.subr.mxu1 %v7094_v33  ;;  %3022 = vmatpush1.msra.mxu0 %v7095_v8  ;;  %v7108_v33 = vld [vmem:[#allocation74_spill] sm:$0xff]  ;;  %v7109_v8 = vld [vmem:[#allocation69_spill] sm:$0xff] }
 0x6c5   : > { %3093 = vmatpush1.msra.mxu1 %v7096_v1  ;;  %3023 = vmatprep.subr.mxu0 %v7097_v41  ;;  %v7110_v1 = vld [vmem:[#allocation71_spill] sm:$0xff]  ;;  %v7111_v41 = vld [vmem:[#allocation68_spill] sm:$0xff] }
 0x6c6   : > { %3094 = vmatprep.subr.mxu1 %v7098_v39  ;;  %3024 = vmatpush1.msra.mxu0 %v7099_v38  ;;  %v7112_v39 = vld [vmem:[#allocation70_spill] sm:$0xff]  ;;  %v7113_v38 = vld [vmem:[#allocation65_spill] sm:$0xff] }
 0x6c7   : > { %3095 = vmatpush1.msra.mxu1 %v7100_v7  ;;  %3025 = vmatprep.subr.mxu0 %v7101_v10  ;;  %v7114_v7 = vld [vmem:[#allocation67_spill] sm:$0xff]  ;;  %v7115_v10 = vld [vmem:[#allocation64_spill] sm:$0xff] }
 0x6c8   : > { %3096 = vmatprep.subr.mxu1 %v7102_v9  ;;  %3026 = vmatpush1.msra.mxu0 %v7103_v60  ;;  %v7116_v9 = vld [vmem:[#allocation66_spill] sm:$0xff]  ;;  %v7117_v60 = vld [vmem:[#allocation61_spill] sm:$0xff] }
 0x6c9   : > { %3097 = vmatpush1.msra.mxu1 %v7104_v58  ;;  %3027 = vmatprep.subr.mxu0 %v7105_v28  ;;  %v7118_v58 = vld [vmem:[#allocation63_spill] sm:$0xff]  ;;  %v7119_v28 = vld [vmem:[#allocation60_spill] sm:$0xff] }
 0x6ca   : > { %3098 = vmatprep.subr.mxu1 %v7106_v48  ;;  %3028 = vmatpush1.msra.mxu0 %v7107_v52  ;;  %v7120_v48 = vld [vmem:[#allocation62_spill] sm:$0xff]  ;;  %v7121_v52 = vld [vmem:[#allocation57_spill] sm:$0xff] }
 0x6cb   : > { %3099 = vmatpush1.msra.mxu1 %v7108_v33  ;;  %3029 = vmatprep.subr.mxu0 %v7109_v8  ;;  %v7122_v33 = vld [vmem:[#allocation59_spill] sm:$0xff]  ;;  %v7123_v8 = vld [vmem:[#allocation56_spill] sm:$0xff] }
 0x6cc   : > { %3100 = vmatprep.subr.mxu1 %v7110_v1  ;;  %3030 = vmatpush1.msra.mxu0 %v7111_v41  ;;  %v7124_v1 = vld [vmem:[#allocation58_spill] sm:$0xff]  ;;  %v7125_v41 = vld [vmem:[#allocation53_spill] sm:$0xff] }
 0x6cd   : > { %3101 = vmatpush1.msra.mxu1 %v7112_v39  ;;  %3031 = vmatprep.subr.mxu0 %v7113_v38  ;;  %v7126_v39 = vld [vmem:[#allocation55_spill] sm:$0xff]  ;;  %v7127_v38 = vld [vmem:[#allocation52_spill] sm:$0xff] }
 0x6ce   : > { %3102 = vmatprep.subr.mxu1 %v7114_v7  ;;  %3032 = vmatpush1.msra.mxu0 %v7115_v10  ;;  %v7128_v7 = vld [vmem:[#allocation54_spill] sm:$0xff] }
 0x6cf   : > { %3103 = vmatpush1.msra.mxu1 %v7116_v9  ;;  %3033 = vmatprep.subr.mxu0 %v7117_v60  ;;  %v2691_v10 = vld [vmem:[%s2690_s25] sm:$0xff]  ;;  %v2692_v60 = vld [vmem:[%s2690_s25 + $0x8] sm:$0xff] }
 0x6d0   : > { %3104 = vmatprep.subr.mxu1 %v7118_v58  ;;  %3034 = vmatpush1.msra.mxu0 %v7119_v28 }
 0x6d1   : > { %3105 = vmatpush1.msra.mxu1 %v7120_v48  ;;  %3035 = vmatprep.subr.mxu0 %v7121_v52 }
 0x6d2   : > { %3106 = vmatprep.subr.mxu1 %v7122_v33  ;;  %3036 = vmatpush1.msra.mxu0 %v7123_v8 }
 0x6d3   : > { %3107 = vmatpush1.msra.mxu1 %v7124_v1  ;;  %3037 = vmatprep.subr.mxu0 %v7125_v41  ;;  %v2694_v1 = vld [vmem:[%s2690_s25 + $0x18] sm:$0xff] }
 0x6d4   : > { %3108 = vmatprep.subr.mxu1 %v7126_v39  ;;  %3038 = vmatpush1.msra.mxu0 %v7127_v38  ;;  %v2693_v39 = vld [vmem:[%s2690_s25 + $0x10] sm:$0xff] }
 0x6d5   : > { %3071 = vmatprep.mubr.f32.mxu0 %v4740_v35  ;;  %3109 = vmatpush1.msra.mxu1 %v7128_v7 }
 0x6d6   : > { %3142 = vmatprep.mubr.f32.mxu1 %v4740_v35 }
 0x752   : > { %v2761_v9 = vpop.f32.mrf.mxu0 }
 0x753   : > { %v2837_v58 = vadd.f32 %v2761_v9, %v2691_v10  ;;  %v2832_v8 = vpop.f32.mrf.mxu1 }
 0x754   : > { %v2763_v28 = vpop.f32.mrf.mxu0  ;;  %v2839_v7 = vadd.f32 %v2832_v8, %v2693_v39 }
 0x755   : > { %v3886_v48 = vmul.f32 -1.442695, %v2837_v58  ;;  %v2838_v52 = vadd.f32 %v2763_v28, %v2692_v60  ;;  %v2834_v41 = vpop.f32.mrf.mxu1 }
 0x756   : > { %v2840_v38 = vadd.f32 %v2834_v41, %v2694_v1  ;;  %v7129_v41 = vld [vmem:[#allocation22_spill] sm:$0xff] }
 0x757   : > { %4600 = vpow2.f32 %v3886_v48  ;;  %v3887_v33 = vmul.f32 -1.442695, %v2838_v52  ;;  %v7130_v39 = vsub.s32 0, %v7129_v41  ;;  %v7134_v13 = vsub.s32 2, %v7129_v41 }
 0x758   : > { %v3888_v0 = vmul.f32 -1.442695, %v2840_v38  ;;  %v7131_v38 = vld [vmem:[#allocation179_spill] sm:$0xff] }
 0x759   : > { %4602 = vpow2.f32 %v3887_v33 }
 0x75a   : > { %4604 = vtanh.f32 %v2839_v7  ;;  %v3153_v7 = vrot.slane %v7131_v38, %v7130_v39  ;;  %v7133_v39 = vsub.s32 3, %v7129_v41 }
 0x75b   : > { %4606 = vpow2.f32 %v3888_v0 }
 0x75c   : > { %v3165_v12 = vrot.slane %v7131_v38, %v7133_v39  ;;  %v3213_v39 = vld [vmem:[%s7139_s3 + $0x78] sm:$0xff] (%p2680_p0) }
 0x764   : > { %v4601_v35 = vpop.eup %4600 }
 0x765   : > { %v2844_v2 = vadd.f32 1.0, %v4601_v35 }
 0x766   : > { %v4603_v3 = vpop.eup %4602 }
 0x767   : > { %4608 = vrcp.f32 %v2844_v2  ;;  %v2850_v10 = vadd.f32 1.0, %v4603_v3  ;;  %v4605_v9 = vpop.eup %4604 }
 0x768   : > { %v4607_v60 = vpop.eup %4606 }
 0x769   : > { %4610 = vrcp.f32 %v2850_v10  ;;  %v2857_v48 = vadd.f32 1.0, %v4607_v60 }
 0x76b   : > { %4612 = vrcp.f32 %v2857_v48 }
 0x774   : > { %v4609_v58 = vpop.eup %4608 }
 0x775   : > { %v2861_v33 = vmul.f32 %v4609_v58, %v4605_v9  ;;  %v2931_v0 = vpop.f32.mrf.mxu0  ;;  %v7132_v9 = vsub.s32 1, %v7129_v41 }
 0x776   : > { %v4611_v28 = vpop.eup %4610  ;;  %v3002_v2 = vpop.f32.mrf.mxu1 }
 0x777   : > { %v2860_v52 = vmul.f32 %v4696_v36, %v4611_v28  ;;  %v2933_v3 = vpop.f32.mrf.mxu0  ;;  %v3157_v58 = vrot.slane %v7131_v38, %v7132_v9  ;;  %v3161_v9 = vrot.slane %v7131_v38, %v7134_v13 }
 0x778   : > { %v4613_v8 = vpop.eup %4612  ;;  %v3004_v10 = vpop.f32.mrf.mxu1 }
 0x779   : > { %v2862_v36 = vadd.f32 %v2861_v33, %v2860_v52  }
 0x77b   : > { %4614 = vtanh.f32 %v2862_v36 }
 0x788   : > { %v4615_v1 = vpop.eup %4614 }
 0x789   : > { %v2864_v48 = vmul.f32 %v4615_v1, %v4613_v8  }
 0x78b   : > { %3072 = vmatmul.mubr.f32.vlgmr.msra.gmra.mxu0 %v2864_v48  ;;  %3143 = vmatmul.mubr.f32.vlgmr.msra.gmra.mxu1 %v2864_v48  ;;  %v3212_v48 = vld [vmem:[%s7139_s3 + $0x70] sm:$0xff] (%p2680_p0) }
 0x84b   : > { %v3073_v35 = vpop.f32.mrf.mxu0  ;;  %v3144_v33 = vpop.f32.mrf.mxu1 }
 0x84c   : > { %v3074_v60 = vadd.f32 %v3073_v35, %v2931_v0  ;;  %v3145_v35 = vadd.f32 %v3144_v33, %v3002_v2 }
 0x84d   : > { %v3075_v28 = vpop.f32.mrf.mxu0  ;;  %v3146_v6 = vpop.f32.mrf.mxu1 }
 0x84e   : > { %v3170_v52 = vadd.f32 %v3153_v7, %v3074_v60  ;;  %v3076_v8 = vadd.f32 %v3075_v28, %v2933_v3  ;;  %v3147_v11 = vadd.f32 %v3146_v6, %v3004_v10  ;;  %v3172_v3 = vadd.f32 %v3161_v9, %v3145_v35 }
 0x850   : > { %v3889_v1 = vmul.f32 -1.442695, %v3170_v52  ;;  %v3171_v4 = vadd.f32 %v3157_v58, %v3076_v8  ;;  %v3173_v0 = vadd.f32 %v3165_v12, %v3147_v11  ;;  %v7137_v8 = vmov (%p2680_p0), 0.0  }
 0x851   :  { %4252 = vmatprep.subr.mxu0 (%p2680_p0), %v7137_v8  ;;  %4287 = vmatprep.subr.mxu1 (%p2680_p0), %v7137_v8 }
 0x852   : > { %4616 = vpow2.f32 %v3889_v1  ;;  %v3890_v5 = vmul.f32 -1.442695, %v3171_v4  ;;  %v3891_v7 = vmul.f32 -1.442695, %v3173_v0  ;;  %v3230_v1 = vld [vmem:[%s7138_s29 + $0x78] sm:$0xff] (%p2680_p0)  ;;  %v3229_v0 = vld [vmem:[%s7138_s29 + $0x70] sm:$0xff] (%p2680_p0)  ;;  %4288 = vmatpush3.msra.mxu1 (%p2680_p0), %v3213_v39  ;;  %4284 = vmatprep.mubr.msk.f32.mxu0 (%p2680_p0), %vm4741_vm2, %v7137_v8 }
 0x853   :  { %4253 = vmatpush3.msra.mxu0 (%p2680_p0), %v3230_v1  ;;  %4289 = vmatprep.subr.mxu1 (%p2680_p0), %v7137_v8  ;;  %v3415_v1 = vld [vmem:[%s7142_s19] sm:$0xff] (%p2680_p0)  ;;  %v3524_v39 = vld [vmem:[%s7144_s24 + $0x78] sm:$0xff] (%p2680_p0) }
 0x854   : > { %4618 = vpow2.f32 %v3890_v5  ;;  %4254 = vmatprep.subr.mxu0 (%p2680_p0), %v7137_v8  ;;  %4290 = vmatpush3.msra.mxu1 (%p2680_p0), %v3212_v48  ;;  %v3522_v48 = vld [vmem:[%s7144_s24 + $0x68] sm:$0xff] (%p2680_p0) }
 0x855   : > { %4620 = vpow2.f32 %v3891_v7  ;;  %4255 = vmatpush3.msra.mxu0 (%p2680_p0), %v3229_v0  ;;  %4291 = vmatprep.subr.mxu1 (%p2680_p0), %v7137_v8  ;;  %v3430_v7 = vld [vmem:[%s7142_s19 + $0x78] sm:$0xff] (%p2680_p0)  ;;  %v3523_v0 = vld [vmem:[%s7144_s24 + $0x70] sm:$0xff] (%p2680_p0) }
 0x856   :  { %4256 = vmatprep.subr.mxu0 (%p2680_p0), %v7137_v8  ;;  %4292 = vmatpush3.msra.mxu1 (%p2680_p0), %v3211_v37  ;;  %v3520_v37 = vld [vmem:[%s7144_s24 + $0x58] sm:$0xff] (%p2680_p0) }
 0x857   :  { %4257 = vmatpush3.msra.mxu0 (%p2680_p0), %v3228_v14  ;;  %4293 = vmatprep.subr.mxu1 (%p2680_p0), %v7137_v8  ;;  %v3521_v14 = vld [vmem:[%s7144_s24 + $0x60] sm:$0xff] (%p2680_p0) }
 0x858   :  { %4258 = vmatprep.subr.mxu0 (%p2680_p0), %v7137_v8  ;;  %4294 = vmatpush3.msra.mxu1 (%p2680_p0), %v3210_v63  ;;  %v3518_v63 = vld [vmem:[%s7144_s24 + $0x48] sm:$0xff] (%p2680_p0) }
 0x859   :  { %4259 = vmatpush3.msra.mxu0 (%p2680_p0), %v3227_v42  ;;  %4295 = vmatprep.subr.mxu1 (%p2680_p0), %v7137_v8  ;;  %v3519_v42 = vld [vmem:[%s7144_s24 + $0x50] sm:$0xff] (%p2680_p0) }
 0x85a   :  { %4260 = vmatprep.subr.mxu0 (%p2680_p0), %v7137_v8  ;;  %4296 = vmatpush3.msra.mxu1 (%p2680_p0), %v3209_v30  ;;  %v3516_v30 = vld [vmem:[%s7144_s24 + $0x38] sm:$0xff] (%p2680_p0) }
 0x85b   :  { %4261 = vmatpush3.msra.mxu0 (%p2680_p0), %v3226_v59  ;;  %4297 = vmatprep.subr.mxu1 (%p2680_p0), %v7137_v8  ;;  %v3517_v59 = vld [vmem:[%s7144_s24 + $0x40] sm:$0xff] (%p2680_p0) }
 0x85c   :  { %4262 = vmatprep.subr.mxu0 (%p2680_p0), %v7137_v8  ;;  %4298 = vmatpush3.msra.mxu1 (%p2680_p0), %v3208_v44  ;;  %v3514_v44 = vld [vmem:[%s7144_s24 + $0x28] sm:$0xff] (%p2680_p0) }
 0x85d   :  { %4263 = vmatpush3.msra.mxu0 (%p2680_p0), %v3225_v53  ;;  %4299 = vmatprep.subr.mxu1 (%p2680_p0), %v7137_v8  ;;  %v3515_v53 = vld [vmem:[%s7144_s24 + $0x30] sm:$0xff] (%p2680_p0) }
 0x85e   :  { %4264 = vmatprep.subr.mxu0 (%p2680_p0), %v7137_v8  ;;  %4300 = vmatpush3.msra.mxu1 (%p2680_p0), %v3207_v17  ;;  %v3512_v17 = vld [vmem:[%s7144_s24 + $0x18] sm:$0xff] (%p2680_p0) }
 0x85f   : > { %v4617_v60 = vpop.eup %4616  ;;  %4265 = vmatpush3.msra.mxu0 (%p2680_p0), %v3224_v50  ;;  %4301 = vmatprep.subr.mxu1 (%p2680_p0), %v7137_v8  ;;  %v3513_v50 = vld [vmem:[%s7144_s24 + $0x20] sm:$0xff] (%p2680_p0) }
 0x860   : > { %v3177_v28 = vadd.f32 1.0, %v4617_v60  ;;  %4266 = vmatprep.subr.mxu0 (%p2680_p0), %v7137_v8  ;;  %4302 = vmatpush3.msra.mxu1 (%p2680_p0), %v3206_v40  ;;  %v3429_v60 = vld [vmem:[%s7142_s19 + $0x70] sm:$0xff] (%p2680_p0) }
 0x861   : > { %v4619_v58 = vpop.eup %4618  ;;  %4267 = vmatpush3.msra.mxu0 (%p2680_p0), %v3223_v62  ;;  %4303 = vmatprep.subr.mxu1 (%p2680_p0), %v7137_v8 }
 0x862   : > { %4622 = vrcp.f32 %v3177_v28  ;;  %v3183_v4 = vadd.f32 1.0, %v4619_v58  ;;  %v4621_v6 = vpop.eup %4620  ;;  %4268 = vmatprep.subr.mxu0 (%p2680_p0), %v7137_v8  ;;  %4304 = vmatpush3.msra.mxu1 (%p2680_p0), %v3205_v56  ;;  %v3426_v58 = vld [vmem:[%s7142_s19 + $0x58] sm:$0xff] (%p2680_p0) }
 0x863   : > { %4624 = vtanh.f32 %v3172_v3  ;;  %v3190_v11 = vadd.f32 1.0, %v4621_v6  ;;  %4269 = vmatpush3.msra.mxu0 (%p2680_p0), %v3222_v57  ;;  %4305 = vmatprep.subr.mxu1 (%p2680_p0), %v7137_v8  ;;  %v3428_v3 = vld [vmem:[%s7142_s19 + $0x68] sm:$0xff] (%p2680_p0) }
 0x864   : > { %4626 = vrcp.f32 %v3183_v4  ;;  %4270 = vmatprep.subr.mxu0 (%p2680_p0), %v7137_v8  ;;  %4306 = vmatpush3.msra.mxu1 (%p2680_p0), %v3204_v19  ;;  %v3425_v4 = vld [vmem:[%s7142_s19 + $0x50] sm:$0xff] (%p2680_p0)  ;;  %v3424_v6 = vld [vmem:[%s7142_s19 + $0x48] sm:$0xff] (%p2680_p0) }
 0x865   : > { %4628 = vrcp.f32 %v3190_v11  ;;  %4271 = vmatpush3.msra.mxu0 (%p2680_p0), %v3221_v51  ;;  %4307 = vmatprep.subr.mxu1 (%p2680_p0), %v7137_v8  ;;  %v3420_v11 = vld [vmem:[%s7142_s19 + $0x28] sm:$0xff] (%p2680_p0)  ;;  %v3893_v51 = vld [vmem:[%s7145_s30] ss:$0 sm:$0xff] (%p2680_p0) }
 0x866   :  { %4272 = vmatprep.subr.mxu0 (%p2680_p0), %v7137_v8  ;;  %4308 = vmatpush3.msra.mxu1 (%p2680_p0), %v3203_v43 }
 0x867   :  { %4273 = vmatpush3.msra.mxu0 (%p2680_p0), %v3220_v16  ;;  %4309 = vmatprep.subr.mxu1 (%p2680_p0), %v7137_v8  ;;  %v3894_v16 = vld [vmem:[%s7146_s6] ss:$0 sm:$0xff] (%p2680_p0) }
 0x868   :  { %4274 = vmatprep.subr.mxu0 (%p2680_p0), %v7137_v8  ;;  %4310 = vmatpush3.msra.mxu1 (%p2680_p0), %v3202_v21 }
 0x869   :  { %4275 = vmatpush3.msra.mxu0 (%p2680_p0), %v3219_v61  ;;  %4311 = vmatprep.subr.mxu1 (%p2680_p0), %v7137_v8 }
 0x86a   :  { %4276 = vmatprep.subr.mxu0 (%p2680_p0), %v7137_v8  ;;  %4312 = vmatpush3.msra.mxu1 (%p2680_p0), %v3201_v46 }
 0x86b   :  { %4277 = vmatpush3.msra.mxu0 (%p2680_p0), %v3218_v47  ;;  %4313 = vmatprep.subr.mxu1 (%p2680_p0), %v7137_v8 }
 0x86c   :  { %4278 = vmatprep.subr.mxu0 (%p2680_p0), %v7137_v8  ;;  %4314 = vmatpush3.msra.mxu1 (%p2680_p0), %v3200_v22 }
 0x86d   :  { %4279 = vmatpush3.msra.mxu0 (%p2680_p0), %v3217_v18  ;;  %4315 = vmatprep.subr.mxu1 (%p2680_p0), %v7137_v8 }
 0x86e   :  { %4280 = vmatprep.subr.mxu0 (%p2680_p0), %v7137_v8  ;;  %4316 = vmatpush3.msra.mxu1 (%p2680_p0), %v3199_v34  ;;  %v3665_v34 = vld [vmem:[%s4901_s9 + $0x70] sm:$0xff] (%p2680_p0) }
 0x86f   : > { %v4623_v5 = vpop.eup %4622  ;;  %4281 = vmatpush3.msra.mxu0 (%p2680_p0), %v3216_v27  ;;  %4317 = vmatprep.subr.mxu1 (%p2680_p0), %v7137_v8  ;;  %v3666_v27 = vld [vmem:[%s4901_s9 + $0x78] sm:$0xff] (%p2680_p0) }
 0x870   : > { %v4625_v10 = vpop.eup %4624  ;;  %4282 = vmatprep.subr.mxu0 (%p2680_p0), %v7137_v8  ;;  %4318 = vmatpush3.msra.mxu1 (%p2680_p0), %v3198_v25  ;;  %v3663_v25 = vld [vmem:[%s4901_s9 + $0x60] sm:$0xff] (%p2680_p0) }
 0x871   : > { %v4627_v52 = vpop.eup %4626  ;;  %v3194_v12 = vmul.f32 %v4625_v10, %v4623_v5  ;;  %4283 = vmatpush3.msra.mxu0 (%p2680_p0), %v3215_v23  ;;  %4319 = vmatprep.mubr.msk.f32.mxu1 (%p2680_p0), %vm4741_vm2, %v7137_v8  ;;  %v3423_v5 = vld [vmem:[%s7142_s19 + $0x40] sm:$0xff] (%p2680_p0)  ;;  %v3422_v10 = vld [vmem:[%s7142_s19 + $0x38] sm:$0xff] (%p2680_p0)  ;;  %v3664_v23 = vld [vmem:[%s4901_s9 + $0x68] sm:$0xff] (%p2680_p0) }
 0x872   : > { %v3193_v2 = vmul.f32 %v4688_v31, %v4627_v52  ;;  %v4629_v13 = vpop.eup %4628  ;;  %4285 = vmatmul.mubr.f32.vlgmr.msra.gmra.mxu0 (%p2680_p0), %v3214_v29  ;;  %4322 = vmatprep.subr.mxu0 (%p2680_p0), %v7137_v8  ;;  %v3421_v52 = vld [vmem:[%s7142_s19 + $0x30] sm:$0xff] (%p2680_p0) }
 0x873   :  { %4354 = vmatprep.mubr.msk.f32.mxu0 (%p2680_p0), %vm4741_vm2, %v7137_v8  ;;  %4357 = vmatprep.subr.mxu1 (%p2680_p0), %v7137_v8  ;;  %v3661_v29 = vld [vmem:[%s4901_s9 + $0x50] sm:$0xff] (%p2680_p0) }
 0x874   : > { %v3195_v31 = vadd.f32 %v3194_v12, %v3193_v2   ;;  %4323 = vmatpush3.msra.mxu0 (%p2680_p0), %v3430_v7  ;;  %v3419_v12 = vld [vmem:[%s7142_s19 + $0x20] sm:$0xff] (%p2680_p0)  ;;  %v3418_v2 = vld [vmem:[%s7142_s19 + $0x18] sm:$0xff] (%p2680_p0) }
 0x875   :  { %4324 = vmatprep.subr.mxu0 (%p2680_p0), %v7137_v8  ;;  %v3896_v7 = vld [vmem:[%s7147_s20] ss:$0 sm:$0xff] (%p2680_p0) }
 0x876   : > { %4630 = vtanh.f32 %v3195_v31  ;;  %4325 = vmatpush3.msra.mxu0 (%p2680_p0), %v3429_v60 }
 0x877   :  { %4326 = vmatprep.subr.mxu0 (%p2680_p0), %v7137_v8 }
 0x878   :  { %4327 = vmatpush3.msra.mxu0 (%p2680_p0), %v3428_v3 }
 0x879   :  { %4328 = vmatprep.subr.mxu0 (%p2680_p0), %v7137_v8 }
 0x883   : > { %v4631_v41 = vpop.eup %4630  ;;  %2682 = sbr.rel (!%p2680_p0) target bundleno = 1649 (0x671), region = 197 }
 0x884   : > { %v6512_v28 = vmul.f32 %v4631_v41, %v4629_v13   ;;  %v3417_v13 = vld [vmem:[%s7142_s19 + $0x10] sm:$0xff] (%p2680_p0)  ;;  %v3416_v41 = vld [vmem:[%s7142_s19 + $0x8] sm:$0xff] (%p2680_p0) }
 0x886   : > { %v7135_v33 = vmov %v6512_v28 }
 0x887   : > { %v7136_v28 = vmov %v7135_v33  ;;  %4320 = vmatmul.mubr.f32.vlgmr.msra.gmra.mxu1 (%p2680_p0), %v7135_v33 }
 0x888   :  { %4389 = vmatprep.mubr.msk.f32.mxu1 %vm4741_vm2, %v7137_v8  ;;  %v3427_v28 = vld [vmem:[%s7142_s19 + $0x60] sm:$0xff]  ;;  %4358 = vmatpush3.msra.mxu1 %v3524_v39 }
 0x889   :  { %4329 = vmatpush3.msra.mxu0 %v3427_v28  ;;  %4359 = vmatprep.subr.mxu1 %v7137_v8 }
 0x88a   :  { %4330 = vmatprep.subr.mxu0 %v7137_v8  ;;  %4360 = vmatpush3.msra.mxu1 %v3523_v0 }
 0x88b   :  { %4331 = vmatpush3.msra.mxu0 %v3426_v58  ;;  %4361 = vmatprep.subr.mxu1 %v7137_v8 }
 0x88c   :  { %4332 = vmatprep.subr.mxu0 %v7137_v8  ;;  %4362 = vmatpush3.msra.mxu1 %v3522_v48 }
 0x88d   :  { %4333 = vmatpush3.msra.mxu0 %v3425_v4  ;;  %4363 = vmatprep.subr.mxu1 %v7137_v8  ;;  %v3901_v4 = vld [vmem:[%s4906_s12] ss:$0 sm:$0xff]  ;;  %s7151_s12 = sld [smem:[#allocation21_spill]] }
 0x88e   :  { %4334 = vmatprep.subr.mxu0 %v7137_v8  ;;  %4364 = vmatpush3.msra.mxu1 %v3521_v14 }
 0x88f   :  { %4335 = vmatpush3.msra.mxu0 %v3424_v6  ;;  %4365 = vmatprep.subr.mxu1 %v7137_v8 }
 0x890   :  { %4336 = vmatprep.subr.mxu0 %v7137_v8  ;;  %4366 = vmatpush3.msra.mxu1 %v3520_v37 }
 0x891   :  { %4337 = vmatpush3.msra.mxu0 %v3423_v5  ;;  %4367 = vmatprep.subr.mxu1 %v7137_v8 }
 0x892   :  { %4338 = vmatprep.subr.mxu0 %v7137_v8  ;;  %4368 = vmatpush3.msra.mxu1 %v3519_v42 }
 0x893   :  { %4339 = vmatpush3.msra.mxu0 %v3422_v10  ;;  %4369 = vmatprep.subr.mxu1 %v7137_v8 }
 0x894   :  { %4340 = vmatprep.subr.mxu0 %v7137_v8  ;;  %4370 = vmatpush3.msra.mxu1 %v3518_v63 }
 0x895   :  { %4341 = vmatpush3.msra.mxu0 %v3421_v52  ;;  %4371 = vmatprep.subr.mxu1 %v7137_v8  ;;  %v3897_v52 = vld [vmem:[%s7148_s7] ss:$0 sm:$0xff] }
 0x896   :  { %4342 = vmatprep.subr.mxu0 %v7137_v8  ;;  %4372 = vmatpush3.msra.mxu1 %v3517_v59 }
 0x897   :  { %4343 = vmatpush3.msra.mxu0 %v3420_v11  ;;  %4373 = vmatprep.subr.mxu1 %v7137_v8 }
 0x898   :  { %4344 = vmatprep.subr.mxu0 %v7137_v8  ;;  %4374 = vmatpush3.msra.mxu1 %v3516_v30  ;;  %v3899_v30 = vld [vmem:[%s7150_s10] ss:$0 sm:$0xff] }
 0x899   :  { %4345 = vmatpush3.msra.mxu0 %v3419_v12  ;;  %4375 = vmatprep.subr.mxu1 %v7137_v8 }
 0x89a   :  { %4346 = vmatprep.subr.mxu0 %v7137_v8  ;;  %4376 = vmatpush3.msra.mxu1 %v3515_v53 }
 0x89b   :  { %4347 = vmatpush3.msra.mxu0 %v3418_v2  ;;  %4377 = vmatprep.subr.mxu1 %v7137_v8 }
 0x89c   :  { %4348 = vmatprep.subr.mxu0 %v7137_v8  ;;  %4378 = vmatpush3.msra.mxu1 %v3514_v44 }
 0x89d   :  { %4349 = vmatpush3.msra.mxu0 %v3417_v13  ;;  %4379 = vmatprep.subr.mxu1 %v7137_v8 }
 0x89e   :  { %4350 = vmatprep.subr.mxu0 %v7137_v8  ;;  %4380 = vmatpush3.msra.mxu1 %v3513_v50 }
 0x89f   :  { %4351 = vmatpush3.msra.mxu0 %v3416_v41  ;;  %4381 = vmatprep.subr.mxu1 %v7137_v8 }
 0x8a0   :  { %4352 = vmatprep.subr.mxu0 %v7137_v8  ;;  %4382 = vmatpush3.msra.mxu1 %v3512_v17 }
 0x8a1   :  { %4353 = vmatpush3.msra.mxu0 %v3415_v1  ;;  %4383 = vmatprep.subr.mxu1 %v7137_v8 }
 0x8a2   :  { %4392 = vmatprep.subr.mxu0 %v7137_v8 }
 0x932   :  { %v3297_v54 = vpop.f32.mrf.mxu0 }
 0x934   :  { %v4286_v24 = vpop.f32.mrf.mxu0 }
 0x935   :  { %v3656_v24 = vld [vmem:[%s4901_s9 + $0x28] sm:$0xff] }
 0x947   :  { %v3367_v49 = vpop.f32.mrf.mxu1 }
 0x948   :  { %v3368_v45 = vadd.f32 %v3367_v49, %v3297_v54  ;;  %v3660_v54 = vld [vmem:[%s4901_s9 + $0x48] sm:$0xff]  ;;  %v3659_v49 = vld [vmem:[%s4901_s9 + $0x40] sm:$0xff] }
 0x949   :  { %v4321_v15 = vpop.f32.mrf.mxu1 }
 0x94a   :  { %v3378_v32 = vadd.f32 %v3892_v55, %v3368_v45  ;;  %v3658_v55 = vld [vmem:[%s4901_s9 + $0x38] sm:$0xff]  ;;  %v3657_v45 = vld [vmem:[%s4901_s9 + $0x30] sm:$0xff]  ;;  %v3655_v15 = vld [vmem:[%s4901_s9 + $0x20] sm:$0xff] }
 0x94c   :  { %v3381_v26 = vmul.f32 %v7143_v20, %v3378_v32 }
 0x94e   :  { %3382 = vadd.xlane.f32.xlu0 %v3381_v26  ;;  %v3653_v26 = vld [vmem:[%s4901_s9 + $0x10] sm:$0xff] }
 0x9d7   :  { %v3383_v31 = vpop.xlane.xlu0 %3382 }
 0x9d8   :  { %v3384_v36 = vmul.f32 0.0625, %v3383_v31  ;;  %v3652_v31 = vld [vmem:[%s4901_s9 + $0x8] sm:$0xff] }
 0x9da   :  { %v6604_v38 = vsub.f32 %v3378_v32, %v3384_v36  ;;  %v3654_v32 = vld [vmem:[%s4901_s9 + $0x18] sm:$0xff]  ;;  %v3651_v36 = vld [vmem:[%s4901_s9] sm:$0xff] }
 0x9dc   :  { %v3386_v35 = vmul.f32 %v7143_v20, %v6604_v38 }
 0x9de   :  { %v3387_v9 = vmul.f32 %v3386_v35, %v3386_v35  ;;  %v3510_v35 = vld [vmem:[%s7144_s24 + $0x8] sm:$0xff] }
 0x9e0   :  { %3388 = vadd.xlane.f32.xlu0 %v3387_v9  ;;  %v3509_v9 = vld [vmem:[%s7144_s24] sm:$0xff] }
 0xa69   :  { %v3389_v62 = vpop.xlane.xlu0 %3388 }
 0xa6a   :  { %v3390_v40 = vmul.f32 0.0625, %v3389_v62 }
 0xa6c   :  { %v3391_v57 = vadd.f32 1e-05, %v3390_v40 }
 0xa6e   :  { %4632 = vrsqrt.f32 %v3391_v57  ;;  %v7152_v57 = vld [vmem:[#allocation23_spill] sm:$0xff] }
 0xa7b   :  { %v4633_v56 = vpop.eup %4632 }
 0xa7c   :  { %v3393_v19 = vmul.f32 %v4633_v56, %v6604_v38  ;;  %v3511_v38 = vld [vmem:[%s7144_s24 + $0x10] sm:$0xff] }
 0xa7d   :  { %4384 = vmatpush3.msra.mxu1 %v3511_v38 }
 0xa7e   :  { %v3400_v43 = vmul.f32 %v3893_v51, %v3393_v19  ;;  %4385 = vmatprep.subr.mxu1 %v7137_v8 }
 0xa7f   :  { %4386 = vmatpush3.msra.mxu1 %v3510_v35 }
 0xa80   :  { %v3407_v61 = vadd.f32 %v3894_v16, %v3400_v43  ;;  %4387 = vmatprep.subr.mxu1 %v7137_v8 }
 0xa81   :  { %4388 = vmatpush3.msra.mxu1 %v3509_v9 }
 0xa82   :  { %v3895_v21 = vmul.f32 -1.442695, %v3407_v61 }
 0xa84   :  { %4634 = vpow2.f32 %v3895_v21 }
 0xa91   :  { %v4635_v47 = vpop.eup %4634 }
 0xa92   :  { %v3411_v46 = vadd.f32 1.0, %v4635_v47  ;;  %v3646_v47 = vld [vmem:[%s7151_s12] sm:$0x1] }
 0xa94   :  { %4636 = vrcp.f32 %v3411_v46 }
 0xaa1   :  { %v4637_v18 = vpop.eup %4636 }
 0xaa2   :  { %v3414_v22 = vmul.f32 %v4637_v18, %v7135_v33  ;;  %v3662_v33 = vld [vmem:[%s4901_s9 + $0x58] sm:$0xff]  ;;  %s7149_s9 = sld [smem:[#allocation19_spill]] }
 0xaa4   :  { %4355 = vmatmul.mubr.f32.vlgmr.msra.gmra.mxu0 %v3414_v22 }
 0xaa5   :  { %4393 = vmatpush3.msra.mxu0 %v3666_v27  ;;  %4424 = vmatprep.mubr.msk.f32.mxu0 %vm4741_vm2, %v7137_v8 }
 0xaa6   :  { %4394 = vmatprep.subr.mxu0 %v7137_v8 }
 0xaa7   :  { %4395 = vmatpush3.msra.mxu0 %v3665_v34 }
 0xaa8   :  { %4396 = vmatprep.subr.mxu0 %v7137_v8  ;;  %v3898_v63 = vld [vmem:[%s7149_s9] ss:$0 sm:$0xff] }
 0xaa9   :  { %4397 = vmatpush3.msra.mxu0 %v3664_v23 }
 0xaaa   :  { %4398 = vmatprep.subr.mxu0 %v7137_v8 }
 0xaab   :  { %4399 = vmatpush3.msra.mxu0 %v3663_v25 }
 0xaac   :  { %4400 = vmatprep.subr.mxu0 %v7137_v8 }
 0xaad   :  { %4401 = vmatpush3.msra.mxu0 %v3662_v33 }
 0xaae   :  { %4402 = vmatprep.subr.mxu0 %v7137_v8 }
 0xaaf   :  { %4403 = vmatpush3.msra.mxu0 %v3661_v29 }
 0xab0   :  { %4404 = vmatprep.subr.mxu0 %v7137_v8 }
 0xab1   :  { %4405 = vmatpush3.msra.mxu0 %v3660_v54 }
 0xab2   :  { %4406 = vmatprep.subr.mxu0 %v7137_v8 }
 0xab3   :  { %4407 = vmatpush3.msra.mxu0 %v3659_v49 }
 0xab4   :  { %4408 = vmatprep.subr.mxu0 %v7137_v8 }
 0xab5   :  { %4409 = vmatpush3.msra.mxu0 %v3658_v55 }
 0xab6   :  { %4410 = vmatprep.subr.mxu0 %v7137_v8 }
 0xab7   :  { %4411 = vmatpush3.msra.mxu0 %v3657_v45 }
 0xab8   :  { %4412 = vmatprep.subr.mxu0 %v7137_v8 }
 0xab9   :  { %4413 = vmatpush3.msra.mxu0 %v3656_v24 }
 0xaba   :  { %4414 = vmatprep.subr.mxu0 %v7137_v8 }
 0xabb   :  { %4415 = vmatpush3.msra.mxu0 %v3655_v15 }
 0xabc   :  { %4416 = vmatprep.subr.mxu0 %v7137_v8 }
 0xabd   :  { %4417 = vmatpush3.msra.mxu0 %v3654_v32 }
 0xabe   :  { %4418 = vmatprep.subr.mxu0 %v7137_v8 }
 0xabf   :  { %4419 = vmatpush3.msra.mxu0 %v3653_v26 }
 0xac0   :  { %4420 = vmatprep.subr.mxu0 %v7137_v8 }
 0xac1   :  { %4421 = vmatpush3.msra.mxu0 %v3652_v31 }
 0xac2   :  { %4422 = vmatprep.subr.mxu0 %v7137_v8 }
 0xac3   :  { %4423 = vmatpush3.msra.mxu0 %v3651_v36 }
 0xac4   :  { %4425 = vmatmul.mubr.f32.vlgmr.msra.gmra.mxu0 %v3414_v22 }
 0xb64   :  { %v3504_v60 = vpop.f32.mrf.mxu0 }
 0xb65   :  { %v3505_v3 = vadd.f32 %v3896_v7, %v3504_v60 }
 0xb66   :  { %v4356_v28 = vpop.f32.mrf.mxu0 }
 0xb67   :  { %v3508_v58 = vmax.f32 %v3505_v3, 0.0 }
 0xb69   :  { %4390 = vmatmul.mubr.f32.vlgmr.msra.gmra.mxu1 %v3508_v58 }
 0xb84   :  { %v3740_v6 = vpop.f32.mrf.mxu0 }
 0xb85   :  { %v3741_v5 = vadd.f32 %v3901_v4, %v3740_v6 }
 0xb86   :  { %v4426_v10 = vpop.f32.mrf.mxu0 }
 0xb87   :  { %3744 = vst [vmem:[%s4911_s27] sm:$0xff] %v3741_v5  ;;  %s4742_s27 = smov [#allocation3]  }
 0xb88   :  { %s3753_s11 = sshll.u32 %s4742_s27, 4  ;;  %s3754_s11 = int_to_ptr.vmem [resolvable:$true] %s3753_s11 }
 0xb89   :  { %s4644_s15 = scalar_lea.vmem %s3754_s11, 16  ;;  %s4648_s16 = scalar_lea.vmem %s3754_s11, 32 }
 0xb8a   :  { %p4645_p1 = scmp.ne.s32.totalorder %s3754_s11, %s4644_s15  ;;  %p4649_p2 = scmp.lt.s32.totalorder %s3754_s11, %s3754_s11 }
 0xb8b   :  { %p4650_p3 = scmp.lt.s32.totalorder %s4648_s16, %s4644_s15 }
 0xb8d   :  { %p4651_p4 = por %p4650_p3, %p4649_p2 }
 0xb8f   :  { %p4652_p5 = pnand %p4651_p4, %p4645_p1 }
 0xc29   :  { %v3598_v11 = vpop.f32.mrf.mxu1 }
 0xc2a   :  { %v3599_v12 = vadd.f32 %v3897_v52, %v3598_v11 }
 0xc2b   :  { %v4391_v2 = vpop.f32.mrf.mxu1 }
 0xc2c   :  { %v3604_v8 = vmul.f32 %v7143_v20, %v3599_v12 }
 0xc2e   :  { %3605 = vadd.xlane.f32.xlu1 %v3604_v8 }
 0xcb7   :  { %v3606_v13 = vpop.xlane.xlu1 %3605 }
 0xcb8   :  { %v3607_v41 = vmul.f32 0.0625, %v3606_v13 }
 0xcba   :  { %v3608_v1 = vsub.f32 %v3599_v12, %v3607_v41 }
 0xcbc   :  { %v3609_v39 = vmul.f32 %v7143_v20, %v3608_v1 }
 0xcbe   :  { %v3610_v0 = vmul.f32 %v3609_v39, %v3609_v39 }
 0xcc0   :  { %3611 = vadd.xlane.f32.xlu1 %v3610_v0 }
 0xd49   :  { %v3612_v48 = vpop.xlane.xlu1 %3611 }
 0xd4a   :  { %v3613_v14 = vmul.f32 0.0625, %v3612_v48 }
 0xd4c   :  { %v3614_v37 = vadd.f32 1e-05, %v3613_v14 }
 0xd4e   :  { %4638 = vrsqrt.f32 %v3614_v37 }
 0xd5b   :  { %v4639_v42 = vpop.eup %4638 }
 0xd5c   :  { %v3616_v59 = vmul.f32 %v4639_v42, %v3608_v1 }
 0xd5e   :  { %v3623_v53 = vmul.f32 %v3898_v63, %v3616_v59 }
 0xd60   :  { %v3630_v44 = vadd.f32 %v3899_v30, %v3623_v53 }
 0xd62   :  { %v3900_v50 = vmul.f32 -1.442695, %v3630_v44 }
 0xd64   :  { %4640 = vpow2.f32 %v3900_v50 }
 0xd71   :  { %v4641_v17 = vpop.eup %4640 }
 0xd72   :  { %v3634_v62 = vadd.f32 1.0, %v4641_v17 }
 0xd74   :  { %4642 = vrcp.f32 %v3634_v62 }
 0xd81   :  { %v4643_v40 = vpop.eup %4642 }
 0xd82   :  { %v3637_v20 = vand.u32 2147483647, %v4643_v40 }
 0xd84   :  { %v3638_v56 = vmul.f32 %v7152_v57, %v3637_v20 }
 0xd86   :  { %v3639_v51 = vrot.slane %v3638_v56, 4 }
 0xd88   :  { %v3640_v19 = vadd.f32 %v3639_v51, %v3638_v56 }
 0xd8a   :  { %v3641_v16 = vrot.slane %v3640_v19, 2 }
 0xd8c   :  { %v3642_v43 = vadd.f32 %v3641_v16, %v3640_v19 }
 0xd8e   :  { %v3643_v61 = vrot.slane %v3642_v43, 1 }
 0xd90   :  { %v3644_v21 = vadd.f32 %v3643_v61, %v3642_v43 }
 0xd92   :  { %v3645_v46 = vmul.f32 0.25, %v3644_v21 }
 0xd94   :  { %v3647_v18 = vsub.f32 %v3645_v46, %v3646_v47 }
 0xd96   :  { %v3648_v22 = vmul.f32 0.01, %v3647_v18 }
 0xd98   :  { %v3649_v27 = vadd.f32 %v3648_v22, %v3646_v47 }
 0xd9a   :  { %3650 = vst [vmem:[#allocation3] sm:$0x1] %v3649_v27 }
 0xd9b   :  { %4655 = shalt.err (!%p4652_p5)
}
 0xd9c   :  { %3756 = dma.vmem_to_hbm [thread:$0]  %s3754_s11, 16, %s4916_s4, [#allocation4]  }
 0xd9d   :  { %4684 = dma.done.wait [#allocation4], 16  }
 0xd9e   :  { %4685 = vsyncadd [#allocation4], 4294967280 }
 0xd9f   :  { %3762 = vsyncpa [#allocation4], 1 }

</bundles_post_ra>
